<compile_context>
chip_gen: v7x
topology: tpu7x:2x2x1
jax: 0.10.0
libtpu: 0.0.40
codegen_flags: <defaults>
</compile_context>

<pallas_src>
import numpy as np
import jax
import jax.numpy as jnp
from jax import lax
from jax.experimental import pallas as pl
from jax.experimental.pallas import tpu as pltpu


STRIDE = 3
# (Cin, Cout, K, stride, padding, activation) of the three ConvTranspose2d's.
LAYER_DEFS = (
    (32, 64, 5, 3, 1, lambda v: jnp.maximum(v, 0.0)),
    (64, 32, 5, 3, 0, lambda v: jnp.maximum(v, 0.0)),
    (32, 3, 3, 3, 4, jnp.tanh),
)

_TL2 = 48   # row tile of the fused layer-2/3 kernel (live vregs stay ~30)


# -----------------------------------------------------------------------------
# Sub-pixel geometry.  For a ConvT with stride s, padding p, kernel K:
#   y[oh] = sum_j x[m - j] * W[r + s*j],  q = oh + p, m = q//s, r = q%s,
#   j in [0, J), J = ceil(K/s).
# Macro grid m in [m0, m0 + M), m0 = p//s, M = (Ho-1+p)//s - m0 + 1.
# The image is the s x s interleave of the phases, cropped by off = p % s.
# -----------------------------------------------------------------------------
def _cfg(H, K, s, p):
    Ho = (H - 1) * s - 2 * p + K
    J = -(-K // s)
    m0 = p // s
    M = (Ho - 1 + p) // s - m0 + 1
    return dict(H=H, K=K, s=s, p=p, Ho=Ho, J=J, M=M,
                base=m0 - (J - 1), off=p % s)


# -----------------------------------------------------------------------------
# Offline weight folding (numpy, once; not in the hot path).
# -----------------------------------------------------------------------------
def _fold_weight(w_t, s):
    """PyTorch ConvT weight (Cin,Cout,K,K) -> (J*J*Cin, s*s*Cout).
    Taps (dh,dw) are folded into the contraction dim (tap-major, cin-minor);
    phases (rh,rw) into the output lanes (rh,rw,cout)."""
    Cin, Cout, K, _ = w_t.shape
    J = -(-K // s)
    wf = np.zeros((J, J, Cin, s, s, Cout), np.float32)
    for dh in range(J):
        for dw in range(J):
            for rh in range(s):
                for rw in range(s):
                    kh = rh + s * (J - 1 - dh)
                    kw = rw + s * (J - 1 - dw)
                    if kh < K and kw < K:
                        wf[dh, dw, :, rh, rw, :] = w_t[:, :, kh, kw]
    return wf.reshape(J * J * Cin, s * s * Cout)


def prepare_params(params):
    s = STRIDE
    w1 = np.asarray(params['w1'], np.float32); b1 = np.asarray(params['b1'], np.float32)
    w2 = np.asarray(params['w2'], np.float32); b2 = np.asarray(params['b2'], np.float32)
    w3 = np.asarray(params['w3'], np.float32); b3 = np.asarray(params['b3'], np.float32)

    # Layer 1: tap-folded (128, 576), f32 (tiny, keeps the trunk exact).
    w1f = _fold_weight(w1, s)
    b1f = np.tile(b1, s * s)[None, :]

    # Layer 2: tap-folded (256, 288), bf16 operands for the MXU.
    w2f = _fold_weight(w2, s)
    b2f = np.tile(b2, s * s)[None, :]

    # Layer 3: K=3, stride=3 -> J=1, i.e. a per-pixel 1x1 conv.  Fold it as a
    # block-diagonal matmul over layer 2's nine (r2h, r2w) phase blocks and
    # zero-pad the 9*27 = 243 output lanes to a lane-dense 256.
    C2, C3, _, _ = w3.shape                                   # (32, 3, 3, 3)
    wpix = np.transpose(w3, (0, 2, 3, 1)).reshape(C2, s * s * C3)   # (32, 27)
    w3blk = np.zeros((s * s * C2, 256), np.float32)
    b3blk = np.zeros((1, 256), np.float32)
    for k in range(s * s):
        w3blk[k * C2:(k + 1) * C2, k * 27:(k + 1) * 27] = wpix
        b3blk[0, k * 27:(k + 1) * 27] = np.tile(b3, s * s)

    return {
        'w1f': jnp.asarray(w1f, jnp.float32),
        'b1f': jnp.asarray(b1f, jnp.float32),
        'w2f': jnp.asarray(w2f, jnp.bfloat16),
        'b2f': jnp.asarray(b2f, jnp.float32),
        'w3blk': jnp.asarray(w3blk, jnp.bfloat16),
        'b3blk': jnp.asarray(b3blk, jnp.float32),
    }


# -----------------------------------------------------------------------------
# Small XLA glue (tiny tensors; pure pad / slice / concat / transpose).
# -----------------------------------------------------------------------------
def _gather_taps(x_nhwc, g):
    """Zero-pad to the tap window and fold the J*J taps into the lanes.
    Returns (N, M*M, J*J*C)."""
    N, H, _, C = x_nhwc.shape
    M, J, base = g['M'], g['J'], g['base']
    U = M + J - 1
    lo, hi = -base, U + base - H
    xp = lax.pad(x_nhwc, jnp.zeros((), x_nhwc.dtype),
                 [(0, 0, 0), (lo, hi, 0), (lo, hi, 0), (0, 0, 0)])
    taps = [xp[:, dh:dh + M, dw:dw + M, :]
            for dh in range(J) for dw in range(J)]
    return jnp.concatenate(taps, axis=-1).reshape(N, M * M, J * J * C)


def _unshuffle(z, g):
    """(N, M*M, 9*C) phase-folded -> (N, Ho, Ho, C) interleaved + cropped."""
    N = z.shape[0]
    M, s, off, Ho = g['M'], g['s'], g['off'], g['Ho']
    C = z.shape[-1] // (s * s)
    z = z.reshape(N, M, M, s, s, C)
    z = jnp.transpose(z, (0, 1, 3, 2, 4, 5)).reshape(N, M * s, M * s, C)
    return z[:, off:off + Ho, off:off + Ho, :]


def _final_unshuffle(z, g2, g3, Cout):
    """Fused layer-2/3 kernel output (N, L2pad, 256) -> (N, Ho3, Ho3, Cout).
    Lanes are (r2h, r2w, r3h, r3w, c3) + pad; rows are (t2h, t2w) + pad."""
    N = z.shape[0]
    M2, s = g2['M'], g2['s']
    z = z[:, :M2 * M2, :s * s * s * s * Cout]                 # drop padding
    z = z.reshape(N, M2, M2, s, s, s, s, Cout)
    z = jnp.transpose(z, (0, 1, 3, 5, 2, 4, 6, 7))
    z = z.reshape(N, M2 * s * s, M2 * s * s, Cout)
    start = s * g2['off'] + g3['p']                           # = 4 here
    Ho3 = g3['Ho']
    return z[:, start:start + Ho3, start:start + Ho3, :]


# -----------------------------------------------------------------------------
# Pallas kernels.
# -----------------------------------------------------------------------------
def _layer1_kernel(x_ref, w_ref, b_ref, o_ref):
    # x_ref: (1, L1, 128) tap-gathered latent, w_ref: (128, 576), b: (1, 576)
    z = jnp.dot(x_ref[0], w_ref[...], preferred_element_type=jnp.float32)
    z = jnp.maximum(z + b_ref[...], 0.0)
    o_ref[0] = z.astype(o_ref.dtype)


def _layer1_matmul(lhs, w1f, b1f):
    N, L, Kc = lhs.shape
    lanes = w1f.shape[1]
    return pl.pallas_call(
        _layer1_kernel,
        out_shape=jax.ShapeDtypeStruct((N, L, lanes), jnp.float32),
        grid=(N,),
        in_specs=[
            pl.BlockSpec((1, L, Kc), lambda n: (n, 0, 0)),
            pl.BlockSpec((Kc, lanes), lambda n: (0, 0)),
            pl.BlockSpec((1, lanes), lambda n: (0, 0)),
        ],
        out_specs=pl.BlockSpec((1, L, lanes), lambda n: (n, 0, 0)),
        compiler_params=pltpu.CompilerParams(
            dimension_semantics=("parallel",)),
    )(lhs, w1f, b1f)


def _make_l23_kernel(num_tiles, tl):
    def kernel(x_ref, w2_ref, b2_ref, w3_ref, b3_ref, o_ref):
        # x_ref : (1, L2p, 256) bf16 tap-gathered layer-1 output
        # w2_ref: (256, 288) bf16      b2_ref: (1, 288) f32
        # w3_ref: (288, 256) bf16 block-diag layer-3 weight, b3_ref: (1,256) f32
        # o_ref : (1, L2p, 256) f32, lanes = (r2h, r2w, r3h, r3w, c3) + pad
        for i in range(num_tiles):          # short static loop, fully unrolled
            lhs = x_ref[0, i * tl:(i + 1) * tl, :]
            z2 = jnp.dot(lhs, w2_ref[...], preferred_element_type=jnp.float32)
            z2 = jnp.maximum(z2 + b2_ref[...], 0.0).astype(jnp.bfloat16)
            z3 = jnp.dot(z2, w3_ref[...], preferred_element_type=jnp.float32)
            out = jnp.tanh(z3 + b3_ref[...])
            o_ref[0, i * tl:(i + 1) * tl, :] = out.astype(o_ref.dtype)
    return kernel


def _layer23_matmul(lhs2, w2f, b2f, w3blk, b3blk, num_tiles, tl):
    N, L2p, K2 = lhs2.shape
    lanes = w3blk.shape[1]
    kernel = _make_l23_kernel(num_tiles, tl)
    return pl.pallas_call(
        kernel,
        out_shape=jax.ShapeDtypeStruct((N, L2p, lanes), jnp.float32),
        grid=(N,),
        in_specs=[
            pl.BlockSpec((1, L2p, K2), lambda n: (n, 0, 0)),
            pl.BlockSpec(w2f.shape, lambda n: (0, 0)),
            pl.BlockSpec(b2f.shape, lambda n: (0, 0)),
            pl.BlockSpec(w3blk.shape, lambda n: (0, 0)),
            pl.BlockSpec(b3blk.shape, lambda n: (0, 0)),
        ],
        out_specs=pl.BlockSpec((1, L2p, lanes), lambda n: (n, 0, 0)),
        compiler_params=pltpu.CompilerParams(
            dimension_semantics=("parallel",)),
    )(lhs2, w2f, b2f, w3blk, b3blk)


# -----------------------------------------------------------------------------
# Forward pass (Pallas) and pure-XLA reference.
# -----------------------------------------------------------------------------
def decoders_forward(x_nchw, prep):
    """Forward pass of the PyTorch `decoders` module.  NCHW in, NCHW out."""
    s = STRIDE
    H = x_nchw.shape[2]
    g1 = _cfg(H, 5, s, 1)          # 32 -> 64
    g2 = _cfg(g1['Ho'], 5, s, 0)   # 64 -> 32
    g3 = _cfg(g2['Ho'], 3, s, 4)   # 32 -> 3
    assert g3['J'] == 1            # K=3, stride=3: layer 3 is per-pixel

    x = jnp.transpose(x_nchw, (0, 2, 3, 1)).astype(jnp.float32)   # NHWC

    # --- layer 1: tap-folded (K=128) matmul + bias + ReLU (Pallas) ----------
    lhs1 = _gather_taps(x, g1)                                 # (N, 25, 128)
    z1 = _layer1_matmul(lhs1, prep['w1f'], prep['b1f'])        # (N, 25, 576)
    img1 = _unshuffle(z1, g1)                                  # (N, 12, 12, 64)

    # --- layers 2 + 3 fused: (K=256) matmul+ReLU, block-diag (288x256)
    #     matmul+Tanh in one Pallas kernel -------------------------------------
    lhs2 = _gather_taps(img1, g2).astype(jnp.bfloat16)         # (N, 169, 256)
    L2 = lhs2.shape[1]
    num_tiles = -(-L2 // _TL2)
    L2p = num_tiles * _TL2                                     # 192
    lhs2 = jnp.pad(lhs2, ((0, 0), (0, L2p - L2), (0, 0)))
    z23 = _layer23_matmul(lhs2, prep['w2f'], prep['b2f'],
                          prep['w3blk'], prep['b3blk'],
                          num_tiles, _TL2)                     # (N, 192, 256)

    out = _final_unshuffle(z23, g2, g3, 3)                     # (N, 106, 106, 3)
    return jnp.transpose(out, (0, 3, 1, 2))                    # -> NCHW


def _reference_convt(x_nhwc, w_t, b, stride, padding, act):
    K = w_t.shape[2]
    w_conv = jnp.transpose(w_t[:, :, ::-1, ::-1], (2, 3, 0, 1))
    pad = K - 1 - padding
    x_pad = lax.pad(x_nhwc, jnp.array(0, x_nhwc.dtype),
                    [(0, 0, 0), (pad, pad, stride - 1),
                     (pad, pad, stride - 1), (0, 0, 0)])
    y = lax.conv_general_dilated(x_pad, w_conv, (1, 1), 'VALID',
                                 dimension_numbers=('NHWC', 'HWIO', 'NHWC'))
    return act(y + b[None, None, None, :])


def decoders_reference(x_nchw, params):
    x = jnp.transpose(x_nchw, (0, 2, 3, 1))
    for i, (_, _, _, s, p, act) in enumerate(LAYER_DEFS, 1):
        x = _reference_convt(x, params[f'w{i}'], params[f'b{i}'], s, p, act)
    return jnp.transpose(x, (0, 3, 1, 2))


def init_params(key):
    ks = jax.random.split(key, 6)
    g = lambda k, shp: 0.05 * jax.random.normal(k, shp, jnp.float32)
    return {
        'w1': g(ks[0], (32, 64, 5, 5)), 'b1': g(ks[1], (64,)),
        'w2': g(ks[2], (64, 32, 5, 5)), 'b2': g(ks[3], (32,)),
        'w3': g(ks[4], (32, 3, 3, 3)),  'b3': g(ks[5], (3,)),
    }


if __name__ == "__main__":
    key = jax.random.PRNGKey(0)
    pkey, xkey = jax.random.split(key)
    params = init_params(pkey)
    prep = prepare_params(params)      # fold weights/biases once, offline

    # Latent input (NCHW, as the PyTorch module expects): 4x4 spatial, 32 ch.
    x = jax.random.normal(xkey, (2, 32, 4, 4), jnp.float32)

    out = jax.block_until_ready(jax.jit(decoders_forward)(x, prep))
    assert out.shape == (2, 3, 106, 106), out.shape

    # Cross-check the Pallas path against a pure-XLA reference path.
    # (Kernel 2 uses bf16 matmul operands with f32 accumulation, so the
    #  tolerance is loosened vs. the all-f32 version.)
    ref = jax.block_until_ready(jax.jit(decoders_reference)(x, params))
    np.testing.assert_allclose(np.asarray(out), np.asarray(ref),
                               atol=2e-2, rtol=2e-2)

    print("KERNEL_OK")
</pallas_src>

<mosaic_0001>
module attributes {stable_mosaic.version = 11 : i64} {
  func.func @_layer1_kernel(%arg0: i32, %arg1: memref<1x25x128xf32, #tpu.memory_space<vmem>>, %arg2: memref<128x576xf32, #tpu.memory_space<vmem>>, %arg3: memref<1x576xf32, #tpu.memory_space<vmem>>, %arg4: memref<1x25x576xf32, #tpu.memory_space<vmem>>) attributes {dimension_semantics = [#tpu.dimension_semantics<parallel>], iteration_bounds = array<i64: 2>, scalar_prefetch = 0 : i64, scratch_operands = 0 : i64, tpu.core_type = #tpu.core_type<tc>, window_params = [{transform_indices = @transform_0, window_bounds = array<i64: 1, 25, 128>}, {pipeline_mode = #tpu.pipeline_mode<synchronous>, transform_indices = @transform_1, window_bounds = array<i64: 128, 576>}, {pipeline_mode = #tpu.pipeline_mode<synchronous>, transform_indices = @transform_2, window_bounds = array<i64: 1, 576>}, {transform_indices = @transform_3, window_bounds = array<i64: 1, 25, 576>}]} {
    %c0 = arith.constant 0 : index
    %c0_0 = arith.constant 0 : index
    %c0_1 = arith.constant 0 : index
    %0 = vector.load %arg1[%c0, %c0_0, %c0_1] : memref<1x25x128xf32, #tpu.memory_space<vmem>>, vector<1x25x128xf32>
    %1 = vector.shape_cast %0 : vector<1x25x128xf32> to vector<25x128xf32>
    %c0_2 = arith.constant 0 : index
    %c0_3 = arith.constant 0 : index
    %2 = vector.load %arg2[%c0_2, %c0_3] : memref<128x576xf32, #tpu.memory_space<vmem>>, vector<128x576xf32>
    %cst = arith.constant dense<0.000000e+00> : vector<25x576xf32>
    %3 = tpu.matmul %1, %2, %cst {dimension_numbers = #tpu.dot_dimension_numbers<[1], [0], [0], [1], [0, 0, 1, 1], [], []>} : vector<25x128xf32>, vector<128x576xf32>, vector<25x576xf32> -> vector<25x576xf32>
    %c0_4 = arith.constant 0 : index
    %c0_5 = arith.constant 0 : index
    %4 = vector.load %arg3[%c0_4, %c0_5] : memref<1x576xf32, #tpu.memory_space<vmem>>, vector<1x576xf32>
    %5 = vector.broadcast %4 : vector<1x576xf32> to vector<25x576xf32>
    %6 = arith.addf %3, %5 : vector<25x576xf32>
    %cst_6 = arith.constant 0.000000e+00 : f32
    %7 = vector.broadcast %cst_6 : f32 to vector<25x576xf32>
    %8 = arith.maximumf %6, %7 : vector<25x576xf32>
    %c0_7 = arith.constant 0 : index
    %c0_8 = arith.constant 0 : index
    %c0_9 = arith.constant 0 : index
    %9 = vector.load %arg4[%c0_7, %c0_8, %c0_9] : memref<1x25x576xf32, #tpu.memory_space<vmem>>, vector<1x25x576xf32>
    %10 = vector.shape_cast %9 : vector<1x25x576xf32> to vector<25x576xf32>
    %11 = vector.shape_cast %8 : vector<25x576xf32> to vector<1x25x576xf32>
    tpu.vector_store %arg4[%c0_7, %c0_8, %c0_9], %11 {strides = array<i32>} : memref<1x25x576xf32, #tpu.memory_space<vmem>>, vector<1x25x576xf32>,
    return
  }
  func.func @transform_0(%arg0: i32) -> (i32, i32, i32) {
    %c0_i32 = arith.constant 0 : i32
    %c0_i32_0 = arith.constant 0 : i32
    %c0_i32_1 = arith.constant 0 : i32
    return %arg0, %c0_i32, %c0_i32_0 : i32, i32, i32
  }
  func.func @transform_1(%arg0: i32) -> (i32, i32) {
    %c0_i32 = arith.constant 0 : i32
    %c0_i32_0 = arith.constant 0 : i32
    %c0_i32_1 = arith.constant 0 : i32
    return %c0_i32, %c0_i32_0 : i32, i32
  }
  func.func @transform_2(%arg0: i32) -> (i32, i32) {
    %c0_i32 = arith.constant 0 : i32
    %c0_i32_0 = arith.constant 0 : i32
    %c0_i32_1 = arith.constant 0 : i32
    return %c0_i32, %c0_i32_0 : i32, i32
  }
  func.func @transform_3(%arg0: i32) -> (i32, i32, i32) {
    %c0_i32 = arith.constant 0 : i32
    %c0_i32_0 = arith.constant 0 : i32
    %c0_i32_1 = arith.constant 0 : i32
    return %arg0, %c0_i32, %c0_i32_0 : i32, i32, i32
  }
}

module attributes {stable_mosaic.version = 11 : i64} {
  func.func @kernel(%arg0: i32, %arg1: memref<1x192x256xbf16, #tpu.memory_space<vmem>>, %arg2: memref<256x288xbf16, #tpu.memory_space<vmem>>, %arg3: memref<1x288xf32, #tpu.memory_space<vmem>>, %arg4: memref<288x256xbf16, #tpu.memory_space<vmem>>, %arg5: memref<1x256xf32, #tpu.memory_space<vmem>>, %arg6: memref<1x192x256xf32, #tpu.memory_space<vmem>>) attributes {dimension_semantics = [#tpu.dimension_semantics<parallel>], iteration_bounds = array<i64: 2>, scalar_prefetch = 0 : i64, scratch_operands = 0 : i64, tpu.core_type = #tpu.core_type<tc>, window_params = [{transform_indices = @transform_0, window_bounds = array<i64: 1, 192, 256>}, {pipeline_mode = #tpu.pipeline_mode<synchronous>, transform_indices = @transform_1, window_bounds = array<i64: 256, 288>}, {pipeline_mode = #tpu.pipeline_mode<synchronous>, transform_indices = @transform_2, window_bounds = array<i64: 1, 288>}, {pipeline_mode = #tpu.pipeline_mode<synchronous>, transform_indices = @transform_3, window_bounds = array<i64: 288, 256>}, {pipeline_mode = #tpu.pipeline_mode<synchronous>, transform_indices = @transform_4, window_bounds = array<i64: 1, 256>}, {transform_indices = @transform_5, window_bounds = array<i64: 1, 192, 256>}]} {
    %c0 = arith.constant 0 : index
    %c0_0 = arith.constant 0 : index
    %c0_1 = arith.constant 0 : index
    %0 = vector.load %arg1[%c0, %c0_0, %c0_1] : memref<1x192x256xbf16, #tpu.memory_space<vmem>>, vector<1x48x256xbf16>
    %1 = vector.shape_cast %0 : vector<1x48x256xbf16> to vector<48x256xbf16>
    %c0_2 = arith.constant 0 : index
    %c0_3 = arith.constant 0 : index
    %2 = vector.load %arg2[%c0_2, %c0_3] : memref<256x288xbf16, #tpu.memory_space<vmem>>, vector<256x288xbf16>
    %cst = arith.constant dense<0.000000e+00> : vector<48x288xf32>
    %3 = tpu.matmul %1, %2, %cst {dimension_numbers = #tpu.dot_dimension_numbers<[1], [0], [0], [1], [0, 0, 1, 1], [], []>} : vector<48x256xbf16>, vector<256x288xbf16>, vector<48x288xf32> -> vector<48x288xf32>
    %c0_4 = arith.constant 0 : index
    %c0_5 = arith.constant 0 : index
    %4 = vector.load %arg3[%c0_4, %c0_5] : memref<1x288xf32, #tpu.memory_space<vmem>>, vector<1x288xf32>
    %5 = vector.broadcast %4 : vector<1x288xf32> to vector<48x288xf32>
    %6 = arith.addf %3, %5 : vector<48x288xf32>
    %cst_6 = arith.constant 0.000000e+00 : f32
    %7 = vector.broadcast %cst_6 : f32 to vector<48x288xf32>
    %8 = arith.maximumf %6, %7 : vector<48x288xf32>
    %9 = arith.truncf %8 : vector<48x288xf32> to vector<48x288xbf16>
    %c0_7 = arith.constant 0 : index
    %c0_8 = arith.constant 0 : index
    %10 = vector.load %arg4[%c0_7, %c0_8] : memref<288x256xbf16, #tpu.memory_space<vmem>>, vector<288x256xbf16>
    %cst_9 = arith.constant dense<0.000000e+00> : vector<48x256xf32>
    %11 = tpu.matmul %9, %10, %cst_9 {dimension_numbers = #tpu.dot_dimension_numbers<[1], [0], [0], [1], [0, 0, 1, 1], [], []>} : vector<48x288xbf16>, vector<288x256xbf16>, vector<48x256xf32> -> vector<48x256xf32>
    %c0_10 = arith.constant 0 : index
    %c0_11 = arith.constant 0 : index
    %12 = vector.load %arg5[%c0_10, %c0_11] : memref<1x256xf32, #tpu.memory_space<vmem>>, vector<1x256xf32>
    %13 = vector.broadcast %12 : vector<1x256xf32> to vector<48x256xf32>
    %14 = arith.addf %11, %13 : vector<48x256xf32>
    %15 = math.tanh %14 : vector<48x256xf32>
    %c0_12 = arith.constant 0 : index
    %c0_13 = arith.constant 0 : index
    %c0_14 = arith.constant 0 : index
    %16 = vector.load %arg6[%c0_12, %c0_13, %c0_14] : memref<1x192x256xf32, #tpu.memory_space<vmem>>, vector<1x48x256xf32>
    %17 = vector.shape_cast %16 : vector<1x48x256xf32> to vector<48x256xf32>
    %18 = vector.shape_cast %15 : vector<48x256xf32> to vector<1x48x256xf32>
    tpu.vector_store %arg6[%c0_12, %c0_13, %c0_14], %18 {strides = array<i32>} : memref<1x192x256xf32, #tpu.memory_space<vmem>>, vector<1x48x256xf32>,
    %c0_15 = arith.constant 0 : index
    %c48 = arith.constant 48 : index
    %c0_16 = arith.constant 0 : index
    %19 = vector.load %arg1[%c0_15, %c48, %c0_16] : memref<1x192x256xbf16, #tpu.memory_space<vmem>>, vector<1x48x256xbf16>
    %20 = vector.shape_cast %19 : vector<1x48x256xbf16> to vector<48x256xbf16>
    %c0_17 = arith.constant 0 : index
    %c0_18 = arith.constant 0 : index
    %21 = vector.load %arg2[%c0_17, %c0_18] : memref<256x288xbf16, #tpu.memory_space<vmem>>, vector<256x288xbf16>
    %cst_19 = arith.constant dense<0.000000e+00> : vector<48x288xf32>
    %22 = tpu.matmul %20, %21, %cst_19 {dimension_numbers = #tpu.dot_dimension_numbers<[1], [0], [0], [1], [0, 0, 1, 1], [], []>} : vector<48x256xbf16>, vector<256x288xbf16>, vector<48x288xf32> -> vector<48x288xf32>
    %c0_20 = arith.constant 0 : index
    %c0_21 = arith.constant 0 : index
    %23 = vector.load %arg3[%c0_20, %c0_21] : memref<1x288xf32, #tpu.memory_space<vmem>>, vector<1x288xf32>
    %24 = vector.broadcast %23 : vector<1x288xf32> to vector<48x288xf32>
    %25 = arith.addf %22, %24 : vector<48x288xf32>
    %cst_22 = arith.constant 0.000000e+00 : f32
    %26 = vector.broadcast %cst_22 : f32 to vector<48x288xf32>
    %27 = arith.maximumf %25, %26 : vector<48x288xf32>
    %28 = arith.truncf %27 : vector<48x288xf32> to vector<48x288xbf16>
    %c0_23 = arith.constant 0 : index
    %c0_24 = arith.constant 0 : index
    %29 = vector.load %arg4[%c0_23, %c0_24] : memref<288x256xbf16, #tpu.memory_space<vmem>>, vector<288x256xbf16>
    %cst_25 = arith.constant dense<0.000000e+00> : vector<48x256xf32>
    %30 = tpu.matmul %28, %29, %cst_25 {dimension_numbers = #tpu.dot_dimension_numbers<[1], [0], [0], [1], [0, 0, 1, 1], [], []>} : vector<48x288xbf16>, vector<288x256xbf16>, vector<48x256xf32> -> vector<48x256xf32>
    %c0_26 = arith.constant 0 : index
    %c0_27 = arith.constant 0 : index
    %31 = vector.load %arg5[%c0_26, %c0_27] : memref<1x256xf32, #tpu.memory_space<vmem>>, vector<1x256xf32>
    %32 = vector.broadcast %31 : vector<1x256xf32> to vector<48x256xf32>
    %33 = arith.addf %30, %32 : vector<48x256xf32>
    %34 = math.tanh %33 : vector<48x256xf32>
    %c0_28 = arith.constant 0 : index
    %c48_29 = arith.constant 48 : index
    %c0_30 = arith.constant 0 : index
    %35 = vector.load %arg6[%c0_28, %c48_29, %c0_30] : memref<1x192x256xf32, #tpu.memory_space<vmem>>, vector<1x48x256xf32>
    %36 = vector.shape_cast %35 : vector<1x48x256xf32> to vector<48x256xf32>
    %37 = vector.shape_cast %34 : vector<48x256xf32> to vector<1x48x256xf32>
    tpu.vector_store %arg6[%c0_28, %c48_29, %c0_30], %37 {strides = array<i32>} : memref<1x192x256xf32, #tpu.memory_space<vmem>>, vector<1x48x256xf32>,
    %c0_31 = arith.constant 0 : index
    %c96 = arith.constant 96 : index
    %c0_32 = arith.constant 0 : index
    %38 = vector.load %arg1[%c0_31, %c96, %c0_32] : memref<1x192x256xbf16, #tpu.memory_space<vmem>>, vector<1x48x256xbf16>
    %39 = vector.shape_cast %38 : vector<1x48x256xbf16> to vector<48x256xbf16>
    %c0_33 = arith.constant 0 : index
    %c0_34 = arith.constant 0 : index
    %40 = vector.load %arg2[%c0_33, %c0_34] : memref<256x288xbf16, #tpu.memory_space<vmem>>, vector<256x288xbf16>
    %cst_35 = arith.constant dense<0.000000e+00> : vector<48x288xf32>
    %41 = tpu.matmul %39, %40, %cst_35 {dimension_numbers = #tpu.dot_dimension_numbers<[1], [0], [0], [1], [0, 0, 1, 1], [], []>} : vector<48x256xbf16>, vector<256x288xbf16>, vector<48x288xf32> -> vector<48x288xf32>
    %c0_36 = arith.constant 0 : index
    %c0_37 = arith.constant 0 : index
    %42 = vector.load %arg3[%c0_36, %c0_37] : memref<1x288xf32, #tpu.memory_space<vmem>>, vector<1x288xf32>
    %43 = vector.broadcast %42 : vector<1x288xf32> to vector<48x288xf32>
    %44 = arith.addf %41, %43 : vector<48x288xf32>
    %cst_38 = arith.constant 0.000000e+00 : f32
    %45 = vector.broadcast %cst_38 : f32 to vector<48x288xf32>
    %46 = arith.maximumf %44, %45 : vector<48x288xf32>
    %47 = arith.truncf %46 : vector<48x288xf32> to vector<48x288xbf16>
    %c0_39 = arith.constant 0 : index
    %c0_40 = arith.constant 0 : index
    %48 = vector.load %arg4[%c0_39, %c0_40] : memref<288x256xbf16, #tpu.memory_space<vmem>>, vector<288x256xbf16>
    %cst_41 = arith.constant dense<0.000000e+00> : vector<48x256xf32>
    %49 = tpu.matmul %47, %48, %cst_41 {dimension_numbers = #tpu.dot_dimension_numbers<[1], [0], [0], [1], [0, 0, 1, 1], [], []>} : vector<48x288xbf16>, vector<288x256xbf16>, vector<48x256xf32> -> vector<48x256xf32>
    %c0_42 = arith.constant 0 : index
    %c0_43 = arith.constant 0 : index
    %50 = vector.load %arg5[%c0_42, %c0_43] : memref<1x256xf32, #tpu.memory_space<vmem>>, vector<1x256xf32>
    %51 = vector.broadcast %50 : vector<1x256xf32> to vector<48x256xf32>
    %52 = arith.addf %49, %51 : vector<48x256xf32>
    %53 = math.tanh %52 : vector<48x256xf32>
    %c0_44 = arith.constant 0 : index
    %c96_45 = arith.constant 96 : index
    %c0_46 = arith.constant 0 : index
    %54 = vector.load %arg6[%c0_44, %c96_45, %c0_46] : memref<1x192x256xf32, #tpu.memory_space<vmem>>, vector<1x48x256xf32>
    %55 = vector.shape_cast %54 : vector<1x48x256xf32> to vector<48x256xf32>
    %56 = vector.shape_cast %53 : vector<48x256xf32> to vector<1x48x256xf32>
    tpu.vector_store %arg6[%c0_44, %c96_45, %c0_46], %56 {strides = array<i32>} : memref<1x192x256xf32, #tpu.memory_space<vmem>>, vector<1x48x256xf32>,
    %c0_47 = arith.constant 0 : index
    %c144 = arith.constant 144 : index
    %c0_48 = arith.constant 0 : index
    %57 = vector.load %arg1[%c0_47, %c144, %c0_48] : memref<1x192x256xbf16, #tpu.memory_space<vmem>>, vector<1x48x256xbf16>
    %58 = vector.shape_cast %57 : vector<1x48x256xbf16> to vector<48x256xbf16>
    %c0_49 = arith.constant 0 : index
    %c0_50 = arith.constant 0 : index
    %59 = vector.load %arg2[%c0_49, %c0_50] : memref<256x288xbf16, #tpu.memory_space<vmem>>, vector<256x288xbf16>
    %cst_51 = arith.constant dense<0.000000e+00> : vector<48x288xf32>
    %60 = tpu.matmul %58, %59, %cst_51 {dimension_numbers = #tpu.dot_dimension_numbers<[1], [0], [0], [1], [0, 0, 1, 1], [], []>} : vector<48x256xbf16>, vector<256x288xbf16>, vector<48x288xf32> -> vector<48x288xf32>
    %c0_52 = arith.constant 0 : index
    %c0_53 = arith.constant 0 : index
    %61 = vector.load %arg3[%c0_52, %c0_53] : memref<1x288xf32, #tpu.memory_space<vmem>>, vector<1x288xf32>
    %62 = vector.broadcast %61 : vector<1x288xf32> to vector<48x288xf32>
    %63 = arith.addf %60, %62 : vector<48x288xf32>
    %cst_54 = arith.constant 0.000000e+00 : f32
    %64 = vector.broadcast %cst_54 : f32 to vector<48x288xf32>
    %65 = arith.maximumf %63, %64 : vector<48x288xf32>
    %66 = arith.truncf %65 : vector<48x288xf32> to vector<48x288xbf16>
    %c0_55 = arith.constant 0 : index
    %c0_56 = arith.constant 0 : index
    %67 = vector.load %arg4[%c0_55, %c0_56] : memref<288x256xbf16, #tpu.memory_space<vmem>>, vector<288x256xbf16>
    %cst_57 = arith.constant dense<0.000000e+00> : vector<48x256xf32>
    %68 = tpu.matmul %66, %67, %cst_57 {dimension_numbers = #tpu.dot_dimension_numbers<[1], [0], [0], [1], [0, 0, 1, 1], [], []>} : vector<48x288xbf16>, vector<288x256xbf16>, vector<48x256xf32> -> vector<48x256xf32>
    %c0_58 = arith.constant 0 : index
    %c0_59 = arith.constant 0 : index
    %69 = vector.load %arg5[%c0_58, %c0_59] : memref<1x256xf32, #tpu.memory_space<vmem>>, vector<1x256xf32>
    %70 = vector.broadcast %69 : vector<1x256xf32> to vector<48x256xf32>
    %71 = arith.addf %68, %70 : vector<48x256xf32>
    %72 = math.tanh %71 : vector<48x256xf32>
    %c0_60 = arith.constant 0 : index
    %c144_61 = arith.constant 144 : index
    %c0_62 = arith.constant 0 : index
    %73 = vector.load %arg6[%c0_60, %c144_61, %c0_62] : memref<1x192x256xf32, #tpu.memory_space<vmem>>, vector<1x48x256xf32>
    %74 = vector.shape_cast %73 : vector<1x48x256xf32> to vector<48x256xf32>
    %75 = vector.shape_cast %72 : vector<48x256xf32> to vector<1x48x256xf32>
    tpu.vector_store %arg6[%c0_60, %c144_61, %c0_62], %75 {strides = array<i32>} : memref<1x192x256xf32, #tpu.memory_space<vmem>>, vector<1x48x256xf32>,
    return
  }
  func.func @transform_0(%arg0: i32) -> (i32, i32, i32) {
    %c0_i32 = arith.constant 0 : i32
    %c0_i32_0 = arith.constant 0 : i32
    %c0_i32_1 = arith.constant 0 : i32
    return %arg0, %c0_i32, %c0_i32_0 : i32, i32, i32
  }
  func.func @transform_1(%arg0: i32) -> (i32, i32) {
    %c0_i32 = arith.constant 0 : i32
    %c0_i32_0 = arith.constant 0 : i32
    %c0_i32_1 = arith.constant 0 : i32
    return %c0_i32, %c0_i32_0 : i32, i32
  }
  func.func @transform_2(%arg0: i32) -> (i32, i32) {
    %c0_i32 = arith.constant 0 : i32
    %c0_i32_0 = arith.constant 0 : i32
    %c0_i32_1 = arith.constant 0 : i32
    return %c0_i32, %c0_i32_0 : i32, i32
  }
  func.func @transform_3(%arg0: i32) -> (i32, i32) {
    %c0_i32 = arith.constant 0 : i32
    %c0_i32_0 = arith.constant 0 : i32
    %c0_i32_1 = arith.constant 0 : i32
    return %c0_i32, %c0_i32_0 : i32, i32
  }
  func.func @transform_4(%arg0: i32) -> (i32, i32) {
    %c0_i32 = arith.constant 0 : i32
    %c0_i32_0 = arith.constant 0 : i32
    %c0_i32_1 = arith.constant 0 : i32
    return %c0_i32, %c0_i32_0 : i32, i32
  }
  func.func @transform_5(%arg0: i32) -> (i32, i32, i32) {
    %c0_i32 = arith.constant 0 : i32
    %c0_i32_0 = arith.constant 0 : i32
    %c0_i32_1 = arith.constant 0 : i32
    return %arg0, %c0_i32, %c0_i32_0 : i32, i32, i32
  }
}

</mosaic_0001>

<bundles_post_ra>
// kernel: decoders_forward.2
= control target key start
LH: loop header
LB: loop body
LE: loop exit
PB: predicated region body
PF: predicated region fallthrough
CT: control target
= control target key end

     0   :  { %8 = vsyncpa [#allocation3], 0  ;;  %s933_s12 = smov 0   ;;  %s1285_s0 = inlined_call_operand.vmem [shape: f32[2,25,128], index: 0, kind: input, shape index: {}]   ;;  %s1286_s1 = inlined_call_operand.vmem [shape: f32[128,576], index: 1, kind: input, shape index: {}]   ;;  %s1287_s2 = inlined_call_operand.hbm [shape: f32[1,576], index: 2, kind: input, shape index: {}]   ;;  %s1288_s3 = inlined_call_operand.vmem [shape: f32[2,25,576], index: 3, kind: output, shape index: {}]  }
   0x1 LB: > { %s939_s13 = sadd.s32 4294967295, %s909_s12   ;;  %p669_p0 = scmp.ge.s32.totalorder %s909_s12, 1  ;;  %s909_s12 = sphi %s933_s12, %s14_s12  }
   0x2   : > { %p113_p1 = scmp.lt.s32.totalorder %s909_s12, 3  ;;  %p1289_p3 = scmp.eq.s32.totalorder %s939_s13, 0 }
   0x3   : > { %s911_s15 = smov [#allocation2]   ;;  %s871_s20 = scalar_lea.hbm %s1287_s2, 80 }
   0x4   : > { %p943_p2 = pnand %p669_p0, %p113_p1  ;;  %s129_s16 = sshll.u32 %s911_s15, 4  ;;  %s130_s16 = int_to_ptr.vmem [resolvable:$true] %s129_s16 }
   0x5   : > { %p872_p6 = scmp.ne.s32.totalorder %s1287_s2, %s871_s20  ;;  %p878_p10 = scmp.lt.u32.totalorder %s871_s20, %s1287_s2 }
   0x6   : > { %s1291_s14 = scalar_select %p943_p2, 1, 0 }
   0x7   : > { %p855_p4 = pneg %p943_p2 }
   0x9   : > { %p952_p5 = pnand %p1289_p3, %p855_p4 }
   0xb   : > { %p873_p7 = pneg %p952_p5 }
   0xd   : > { %p874_p8 = pnand %p873_p7, %p872_p6 }
   0xf   : > { %p875_p9 = pneg %p874_p8 }
  0x11   : > { %p880_p11 = pnand %p878_p10, %p875_p9 }
  0x13   : > { %883 = shalt.err (!%p880_p11)
}
  0x14   : > { %s884_s25 = scalar_lea.vmem %s130_s16, 80  ;;  %s891_s26 = scalar_lea.vmem %s130_s16, 96 }
  0x15   : > { %p885_p12 = scmp.ne.s32.totalorder %s130_s16, %s884_s25  ;;  %p892_p1 = scmp.lt.s32.totalorder %s130_s16, %s130_s16 }
  0x16   : > { %p893_p4 = scmp.lt.s32.totalorder %s891_s26, %s884_s25 }
  0x17   : > { %p887_p13 = pnand %p885_p12, %p873_p7 }
  0x18   : > { %p894_p3 = por %p893_p4, %p892_p1 }
  0x19   : > { %p888_p0 = pneg %p887_p13 }
  0x1b   : > { %p895_p2 = pnand %p894_p3, %p888_p0 }
  0x1d   : > { %898 = shalt.err (!%p895_p2)
}
  0x1e   : > { %858 = dma.hbm_to_vmem [thread:$0]  (!%p952_p5), %s1287_s2, 80, %s130_s16, [#allocation3]  }
  0x1f   : > { %p1293_p6 = scmp.ne.s32.totalorder %s1291_s14, 0 }
  0x20   : > { %p1294_p8 = scmp.eq.s32.totalorder (!%p1293_p6), %s939_s13, 0 }
  0x21   : > { %150 = sbr.rel (%p1293_p6) target bundleno = 328 (0x148), region = 32 }
  0x28   : > { %904 = dma.done.wait (%p1294_p8), [#allocation3], 80   ;;  %p1295_p7 = pmov %p1294_p8 }
  0x29   : > { %v912_v0 = vmov 0.0   ;;  %v189_v1 = vld [vmem:[%s1286_s1 + $0x8] sm:$0xff]  ;;  %v194_v2 = vld [vmem:[%s1286_s1 + $0x30] sm:$0xff]  ;;  %v191_v3 = vld [vmem:[%s1286_s1 + $0x18] sm:$0xff]  ;;  %p174_p2 = scmp.lt.s32.totalorder %s939_s13, 1  ;;  %vm582_vm0 = vcmask 523264  }
  0x2a   : > { %906 = vsyncadd (%p1295_p7), [#allocation3], 4294967216  ;;  %359 = vmatprep.mubr.f32.mxu0 %v912_v0  ;;  %448 = vmatprep.mubr.f32.mxu1 %v912_v0  ;;  %v738_v4 = vpack.c.bf16 %v194_v2, %v189_v1  ;;  %v196_v5 = vld [vmem:[%s1286_s1 + $0x40] sm:$0xff]  ;;  %v193_v7 = vld [vmem:[%s1286_s1 + $0x28] sm:$0xff]  ;;  %vm598_vm1 = vcmask 516096  }
  0x2b   : > { %v188_v6 = vld [vmem:[%s1286_s1] sm:$0xff]  ;;  %v770_v8 = vpack.c.bf16 %v196_v5, %v191_v3  ;;  %v190_v10 = vld [vmem:[%s1286_s1 + $0x10] sm:$0xff]  ;;  %v195_v11 = vld [vmem:[%s1286_s1 + $0x38] sm:$0xff]  ;;  %s1297_s13 = smov (!%p174_p2, %s939_s13), 1 }
  0x2c   : > { %v740_v9 = vpack.c.bf16 %v193_v7, %v188_v6  ;;  %v199_v12 = vld [vmem:[%s1286_s1 + $0x58] sm:$0xff]  ;;  %739 = vmatprep.subr.bf16.mxu0 %v738_v4  ;;  %v772_v13 = vpack.c.bf16 %v195_v11, %v190_v10  ;;  %v204_v14 = vld [vmem:[%s1286_s1 + $0x80] sm:$0xff]  ;;  %v201_v15 = vld [vmem:[%s1286_s1 + $0x68] sm:$0xff]  ;;  %s679_s5 = sshll.u32 %s1297_s13, 5  ;;  %s850_s18 = smul.u32 160, %s1297_s13 }
  0x2d   : > { %v206_v16 = vld [vmem:[%s1286_s1 + $0x90] sm:$0xff]  ;;  %771 = vmatprep.subr.bf16.mxu1 %v770_v8  ;;  %v742_v17 = vpack.c.bf16 %v204_v14, %v199_v12  ;;  %v203_v20 = vld [vmem:[%s1286_s1 + $0x78] sm:$0xff]  ;;  %v200_v21 = vld [vmem:[%s1286_s1 + $0x60] sm:$0xff]  ;;  %s1188_s14 = scalar_lea.vmem %s1285_s0, %s679_s5 }
  0x2e   : > { %741 = vmatpush1.bf16.msra.mxu0 %v740_v9  ;;  %v774_v18 = vpack.c.bf16 %v206_v16, %v201_v15  ;;  %v198_v19 = vld [vmem:[%s1286_s1 + $0x50] sm:$0xff]  ;;  %773 = vmatpush1.bf16.msra.mxu1 %v772_v13  ;;  %v205_v23 = vld [vmem:[%s1286_s1 + $0x88] sm:$0xff]  ;;  %v211_v28 = vld [vmem:[%s1286_s1 + $0xb8] sm:$0xff]  ;;  %s1258_s21 = scalar_lea.vmem %s1288_s3, %s850_s18 }
  0x2f   : > { %v744_v22 = vpack.c.bf16 %v203_v20, %v198_v19  ;;  %v209_v24 = vld [vmem:[%s1286_s1 + $0xa8] sm:$0xff]  ;;  %v214_v25 = vld [vmem:[%s1286_s1 + $0xd0] sm:$0xff]  ;;  %743 = vmatprep.subr.bf16.mxu0 %v742_v17  ;;  %v776_v26 = vpack.c.bf16 %v205_v23, %v200_v21  ;;  %v216_v29 = vld [vmem:[%s1286_s1 + $0xe0] sm:$0xff] }
  0x30   : > { %775 = vmatprep.subr.bf16.mxu1 %v774_v18  ;;  %v746_v27 = vpack.c.bf16 %v214_v25, %v209_v24  ;;  %v208_v30 = vld [vmem:[%s1286_s1 + $0xa0] sm:$0xff]  ;;  %v778_v31 = vpack.c.bf16 %v216_v29, %v211_v28  ;;  %v213_v32 = vld [vmem:[%s1286_s1 + $0xc8] sm:$0xff]  ;;  %v210_v33 = vld [vmem:[%s1286_s1 + $0xb0] sm:$0xff] }
  0x31   : > { %v215_v34 = vld [vmem:[%s1286_s1 + $0xd8] sm:$0xff]  ;;  %v748_v35 = vpack.c.bf16 %v213_v32, %v208_v30  ;;  %v224_v37 = vld [vmem:[%s1286_s1 + $0x120] sm:$0xff]  ;;  %v221_v38 = vld [vmem:[%s1286_s1 + $0x108] sm:$0xff] }
  0x32   : > { %745 = vmatpush1.bf16.msra.mxu0 %v744_v22  ;;  %v219_v36 = vld [vmem:[%s1286_s1 + $0xf8] sm:$0xff]  ;;  %777 = vmatpush1.bf16.msra.mxu1 %v776_v26  ;;  %v780_v39 = vpack.c.bf16 %v215_v34, %v210_v33  ;;  %v226_v41 = vld [vmem:[%s1286_s1 + $0x130] sm:$0xff]  ;;  %v220_v45 = vld [vmem:[%s1286_s1 + $0x100] sm:$0xff] }
  0x33   : > { %747 = vmatprep.subr.bf16.mxu0 %v746_v27  ;;  %v750_v40 = vpack.c.bf16 %v224_v37, %v219_v36  ;;  %v218_v42 = vld [vmem:[%s1286_s1 + $0xf0] sm:$0xff]  ;;  %v223_v43 = vld [vmem:[%s1286_s1 + $0x118] sm:$0xff]  ;;  %779 = vmatprep.subr.bf16.mxu1 %v778_v31  ;;  %v782_v44 = vpack.c.bf16 %v226_v41, %v221_v38  ;;  %v225_v46 = vld [vmem:[%s1286_s1 + $0x128] sm:$0xff] }
  0x34   : > { %v229_v47 = vld [vmem:[%s1286_s1 + $0x148] sm:$0xff]  ;;  %v234_v48 = vld [vmem:[%s1286_s1 + $0x170] sm:$0xff]  ;;  %v231_v49 = vld [vmem:[%s1286_s1 + $0x158] sm:$0xff]  ;;  %v752_v51 = vpack.c.bf16 %v223_v43, %v218_v42  ;;  %v784_v52 = vpack.c.bf16 %v225_v46, %v220_v45 }
  0x35   : > { %v236_v50 = vld [vmem:[%s1286_s1 + $0x180] sm:$0xff]  ;;  %v754_v53 = vpack.c.bf16 %v234_v48, %v229_v47  ;;  %v233_v55 = vld [vmem:[%s1286_s1 + $0x168] sm:$0xff]  ;;  %v230_v56 = vld [vmem:[%s1286_s1 + $0x150] sm:$0xff] }
  0x36   : > { %749 = vmatpush1.bf16.msra.mxu0 %v748_v35  ;;  %781 = vmatpush1.bf16.msra.mxu1 %v780_v39  ;;  %v228_v54 = vld [vmem:[%s1286_s1 + $0x140] sm:$0xff]  ;;  %v786_v57 = vpack.c.bf16 %v236_v50, %v231_v49  ;;  %v235_v58 = vld [vmem:[%s1286_s1 + $0x178] sm:$0xff]  ;;  %v241_v61 = vld [vmem:[%s1286_s1 + $0x1a8] sm:$0xff] }
  0x37   : > { %751 = vmatprep.subr.bf16.mxu0 %v750_v40  ;;  %783 = vmatprep.subr.bf16.mxu1 %v782_v44  ;;  %v239_v59 = vld [vmem:[%s1286_s1 + $0x198] sm:$0xff]  ;;  %v244_v60 = vld [vmem:[%s1286_s1 + $0x1c0] sm:$0xff]  ;;  %v246_v62 = vld [vmem:[%s1286_s1 + $0x1d0] sm:$0xff]  ;;  %v756_v63 = vpack.c.bf16 %v233_v55, %v228_v54  ;;  %v788_v1 = vpack.c.bf16 %v235_v58, %v230_v56 }
  0x38   : > { %v758_v2 = vpack.c.bf16 %v244_v60, %v239_v59  ;;  %v238_v3 = vld [vmem:[%s1286_s1 + $0x190] sm:$0xff]  ;;  %v243_v4 = vld [vmem:[%s1286_s1 + $0x1b8] sm:$0xff]  ;;  %v240_v5 = vld [vmem:[%s1286_s1 + $0x1a0] sm:$0xff]  ;;  %v790_v6 = vpack.c.bf16 %v246_v62, %v241_v61  ;;  %v270_v61 = vlaneseq }
  0x39   : > { %v245_v7 = vld [vmem:[%s1286_s1 + $0x1c8] sm:$0xff]  ;;  %v254_v9 = vld [vmem:[%s1286_s1 + $0x210] sm:$0xff]  ;;  %v251_v10 = vld [vmem:[%s1286_s1 + $0x1f8] sm:$0xff]  ;;  %v760_v12 = vpack.c.bf16 %v243_v4, %v238_v3 }
  0x3a   : > { %753 = vmatpush1.bf16.msra.mxu0 %v752_v51  ;;  %785 = vmatpush1.bf16.msra.mxu1 %v784_v52  ;;  %v249_v8 = vld [vmem:[%s1286_s1 + $0x1e8] sm:$0xff]  ;;  %v256_v11 = vld [vmem:[%s1286_s1 + $0x220] sm:$0xff]  ;;  %v792_v13 = vpack.c.bf16 %v245_v7, %v240_v5  ;;  %v250_v17 = vld [vmem:[%s1286_s1 + $0x1f0] sm:$0xff]  ;;  %v1242_v62 = vshrl.u32 %v270_v61, 7 }
  0x3b   : > { %755 = vmatprep.subr.bf16.mxu0 %v754_v53  ;;  %787 = vmatprep.subr.bf16.mxu1 %v786_v57  ;;  %v762_v14 = vpack.c.bf16 %v254_v9, %v249_v8  ;;  %v248_v15 = vld [vmem:[%s1286_s1 + $0x1e0] sm:$0xff]  ;;  %v253_v16 = vld [vmem:[%s1286_s1 + $0x208] sm:$0xff]  ;;  %v794_v18 = vpack.c.bf16 %v256_v11, %v251_v10  ;;  %v255_v19 = vld [vmem:[%s1286_s1 + $0x218] sm:$0xff] }
  0x3c   : > { %v259_v20 = vld [vmem:[%s1286_s1 + $0x238] sm:$0xff]  ;;  %v264_v21 = vld [vmem:[%s1286_s1 + $0x260] sm:$0xff]  ;;  %v261_v22 = vld [vmem:[%s1286_s1 + $0x248] sm:$0xff]  ;;  %v764_v24 = vpack.c.bf16 %v253_v16, %v248_v15  ;;  %v796_v25 = vpack.c.bf16 %v255_v19, %v250_v17  ;;  %v276_v3 = vsub.s32 1, %v1242_v62  ;;  %v284_v4 = vsub.s32 3, %v1242_v62 }
  0x3d   : > { %v266_v23 = vld [vmem:[%s1286_s1 + $0x270] sm:$0xff]  ;;  %v766_v26 = vpack.c.bf16 %v264_v21, %v259_v20  ;;  %v263_v28 = vld [vmem:[%s1286_s1 + $0x258] sm:$0xff]  ;;  %v260_v29 = vld [vmem:[%s1286_s1 + $0x240] sm:$0xff] }
  0x3e   : > { %757 = vmatpush1.bf16.msra.mxu0 %v756_v63  ;;  %789 = vmatpush1.bf16.msra.mxu1 %v788_v1  ;;  %v258_v27 = vld [vmem:[%s1286_s1 + $0x230] sm:$0xff]  ;;  %v798_v30 = vpack.c.bf16 %v266_v23, %v261_v22  ;;  %v265_v31 = vld [vmem:[%s1286_s1 + $0x268] sm:$0xff]  ;;  %v192_v32 = vld [vmem:[%s1286_s1 + $0x20] sm:$0xff]  ;;  %v272_v63 = vsub.s32 0, %v1242_v62 }
  0x3f   : > { %759 = vmatprep.subr.bf16.mxu0 %v758_v2  ;;  %791 = vmatprep.subr.bf16.mxu1 %v790_v6  ;;  %v197_v33 = vld [vmem:[%s1286_s1 + $0x48] sm:$0xff]  ;;  %v768_v34 = vpack.c.bf16 %v263_v28, %v258_v27  ;;  %v800_v35 = vpack.c.bf16 %v265_v31, %v260_v29  ;;  %v202_v37 = vld [vmem:[%s1286_s1 + $0x70] sm:$0xff]  ;;  %v207_v38 = vld [vmem:[%s1286_s1 + $0x98] sm:$0xff]  ;;  %v280_v2 = vsub.s32 2, %v1242_v62 }
  0x40   : > { %v802_v36 = vpack.c.bf16 %v197_v33, %v192_v32  ;;  %v184_v39 = vld [vmem:[%s1188_s14] sm:$0xff]  ;;  %v806_v40 = vpack.c.bf16 %v207_v38, %v202_v37  ;;  %v217_v42 = vld [vmem:[%s1286_s1 + $0xe8] sm:$0xff]  ;;  %v222_v45 = vld [vmem:[%s1286_s1 + $0x110] sm:$0xff] }
  0x41   : > { %v212_v41 = vld [vmem:[%s1286_s1 + $0xc0] sm:$0xff]  ;;  %v185_v43 = vld [vmem:[%s1188_s14 + $0x8] sm:$0xff]  ;;  %v227_v46 = vld [vmem:[%s1286_s1 + $0x138] sm:$0xff] }
  0x42   : > { %761 = vmatpush1.bf16.msra.mxu0 %v760_v12  ;;  %793 = vmatpush1.bf16.msra.mxu1 %v792_v13  ;;  %v810_v44 = vpack.c.bf16 %v217_v42, %v212_v41  ;;  %v186_v47 = vld [vmem:[%s1188_s14 + $0x10] sm:$0xff]  ;;  %v814_v48 = vpack.c.bf16 %v227_v46, %v222_v45  ;;  %v232_v49 = vld [vmem:[%s1286_s1 + $0x160] sm:$0xff]  ;;  %v237_v50 = vld [vmem:[%s1286_s1 + $0x188] sm:$0xff] }
  0x43   : > { %763 = vmatprep.subr.bf16.mxu0 %v762_v14  ;;  %795 = vmatprep.subr.bf16.mxu1 %v794_v18  ;;  %v187_v51 = vld [vmem:[%s1188_s14 + $0x18] sm:$0x1]  ;;  %v818_v52 = vpack.c.bf16 %v237_v50, %v232_v49  ;;  %v242_v53 = vld [vmem:[%s1286_s1 + $0x1b0] sm:$0xff]  ;;  %v252_v56 = vld [vmem:[%s1286_s1 + $0x200] sm:$0xff] }
  0x44   : > { %v247_v54 = vld [vmem:[%s1286_s1 + $0x1d8] sm:$0xff]  ;;  %v257_v57 = vld [vmem:[%s1286_s1 + $0x228] sm:$0xff]  ;;  %v262_v58 = vld [vmem:[%s1286_s1 + $0x250] sm:$0xff] }
  0x45   : > { %v822_v55 = vpack.c.bf16 %v247_v54, %v242_v53  ;;  %v267_v59 = vld [vmem:[%s1286_s1 + $0x278] sm:$0xff]  ;;  %v1245_v1 = vld [vmem:[#allocation2] sm:$0x1f] }
  0x46   : > { %765 = vmatpush1.bf16.msra.mxu0 %v764_v24  ;;  %797 = vmatpush1.bf16.msra.mxu1 %v796_v25  ;;  %v830_v60 = vpack.c.bf16 %v267_v59, %v262_v58  ;;  %v273_v5 = vrot.slane %v1245_v1, %v272_v63  ;;  %v281_v6 = vrot.slane %v1245_v1, %v280_v2 }
  0x47   : > { %767 = vmatprep.subr.bf16.mxu0 %v766_v26  ;;  %799 = vmatprep.subr.bf16.mxu1 %v798_v30  ;;  %v277_v7 = vrot.slane %v1245_v1, %v276_v3  ;;  %v285_v8 = vrot.slane %v1245_v1, %v284_v4 }
  0x4a   : > { %769 = vmatpush1.bf16.msra.mxu0 %v768_v34  ;;  %801 = vmatpush1.bf16.msra.mxu1 %v800_v35 }
  0x4b   : > { %803 = vmatprep.subr.bf16.mxu0 %v802_v36  ;;  %834 = vmatprep.subr.bf16.mxu1 %v802_v36 }
  0x4d   : > { %360 = vmatmul.mubr.f32.vlgmr.msra.gmra.mrb[0].mxu0 %v184_v39  ;;  %449 = vmatmul.mubr.f32.vlgmr.msra.gmra.mrb[0].mxu1 %v184_v39 }
  0x4e   : > { %805 = vmatpush3.bf16.msra.mxu0 %v802_v36  ;;  %842 = vmatpush3.bf16.msra.mxu1 %v802_v36 }
  0x4f   : > { %807 = vmatprep.subr.bf16.mxu0 %v806_v40  ;;  %835 = vmatprep.subr.bf16.mxu1 %v806_v40 }
  0x50   : > { %365 = vmatprep.mubr.f32.mxu0 %v912_v0  ;;  %454 = vmatprep.mubr.f32.mxu1 %v912_v0 }
  0x51   : > { %366 = vmatmul.mubr.f32.gmra.mrb[2].mxu0 %v185_v43  ;;  %455 = vmatmul.mubr.f32.gmra.mrb[2].mxu1 %v185_v43 }
  0x52   : > { %809 = vmatpush3.bf16.msra.mxu0 %v806_v40  ;;  %843 = vmatpush3.bf16.msra.mxu1 %v806_v40 }
  0x53   : > { %811 = vmatprep.subr.bf16.mxu0 %v810_v44  ;;  %836 = vmatprep.subr.bf16.mxu1 %v810_v44 }
  0x54   : > { %371 = vmatprep.mubr.f32.mxu0 %v912_v0  ;;  %460 = vmatprep.mubr.f32.mxu1 %v912_v0 }
  0x55   : > { %372 = vmatmul.mubr.f32.gmra.mrb[4].mxu0 %v186_v47  ;;  %461 = vmatmul.mubr.f32.gmra.mrb[4].mxu1 %v186_v47 }
  0x56   : > { %813 = vmatpush3.bf16.msra.mxu0 %v810_v44  ;;  %844 = vmatpush3.bf16.msra.mxu1 %v810_v44 }
  0x57   : > { %815 = vmatprep.subr.bf16.mxu0 %v814_v48  ;;  %837 = vmatprep.subr.bf16.mxu1 %v814_v48 }
  0x58   : > { %377 = vmatprep.mubr.f32.mxu0 %v912_v0  ;;  %466 = vmatprep.mubr.f32.mxu1 %v912_v0  ;;  %v826_v0 = vpack.c.bf16 %v257_v57, %v252_v56  ;;  %v288_v57 = vsub.s32 4, %v1242_v62 }
  0x59   : > { %378 = vmatmul.mubr.f32.gmra.mrb[6].mxu0 %v187_v51  ;;  %467 = vmatmul.mubr.f32.gmra.mrb[6].mxu1 %v187_v51 }
  0x5a   : > { %817 = vmatpush3.bf16.msra.mxu0 %v814_v48  ;;  %845 = vmatpush3.bf16.msra.mxu1 %v814_v48 }
  0x5b   : > { %819 = vmatprep.subr.bf16.mxu0 %v818_v52  ;;  %838 = vmatprep.subr.bf16.mxu1 %v818_v52 }
  0x5c   : > { %732 = vmatprep.mubr.f32.mxu0 %v184_v39  ;;  %735 = vmatprep.mubr.f32.mxu1 %v186_v47 }
  0x5e   : > { %821 = vmatpush3.bf16.msra.mxu0 %v818_v52  ;;  %846 = vmatpush3.bf16.msra.mxu1 %v818_v52 }
  0x5f   : > { %823 = vmatprep.subr.bf16.mxu0 %v822_v55  ;;  %839 = vmatprep.subr.bf16.mxu1 %v822_v55 }
  0x62   : > { %825 = vmatpush3.bf16.msra.mxu0 %v822_v55  ;;  %847 = vmatpush3.bf16.msra.mxu1 %v822_v55 }
  0x63   : > { %827 = vmatprep.subr.bf16.mxu0 %v826_v0  ;;  %840 = vmatprep.subr.bf16.mxu1 %v826_v0 }
  0x66   : > { %829 = vmatpush3.bf16.msra.mxu0 %v826_v0  ;;  %848 = vmatpush3.bf16.msra.mxu1 %v826_v0  ;;  %v289_v0 = vrot.slane %v1245_v1, %v288_v57 }
  0x67   : > { %831 = vmatprep.subr.bf16.mxu0 %v830_v60  ;;  %841 = vmatprep.subr.bf16.mxu1 %v830_v60 }
  0x6a   : > { %833 = vmatpush3.bf16.msra.mxu0 %v830_v60  ;;  %849 = vmatpush3.bf16.msra.mxu1 %v830_v60 }
  0x6d   : > { %733 = vmatmul.mubr.f32.vlgmr.msra.gmra.mrb[8].mxu0 %v185_v43  ;;  %736 = vmatmul.mubr.f32.vlgmr.msra.gmra.mrb[8].mxu1 %v187_v51 }
 0x120   : > { %v361_v9 = vpop.f32.mrb[0].mxu0  ;;  %v450_v11 = vpop.f32.mrb[0].mxu1 }
 0x121   : > { %v362_v10 = vadd.f32 %v361_v9, %v273_v5  ;;  %v363_v12 = vpop.f32.mrb[1].mxu0  ;;  %v451_v13 = vadd.f32 %v450_v11, %v281_v6  ;;  %v452_v15 = vpop.f32.mrb[1].mxu1 }
 0x122   : > { %v364_v14 = vadd.f32 %v363_v12, %v277_v7  ;;  %v453_v17 = vadd.f32 %v452_v15, %v285_v8 }
 0x123   : > { %v558_v16 = vmax.f32 %v362_v10, 0.0  ;;  %v560_v18 = vmax.f32 %v451_v13, 0.0 }
 0x124   : > { %v559_v19 = vmax.f32 %v364_v14, 0.0  ;;  %v367_v20 = vpop.f32.mrb[2].mxu0  ;;  %v561_v21 = vmax.f32 %v453_v17, 0.0  ;;  %v456_v23 = vpop.f32.mrb[2].mxu1 }
 0x125   : > { %578 = vst [vmem:[%s1258_s21] sm:$0xff] %v558_v16  ;;  %v368_v22 = vadd.f32 %v367_v20, %v273_v5  ;;  %v369_v24 = vpop.f32.mrb[3].mxu0  ;;  %580 = vst [vmem:[%s1258_s21 + $0x10] sm:$0xff] %v560_v18  ;;  %v457_v25 = vadd.f32 %v456_v23, %v281_v6  ;;  %v458_v27 = vpop.f32.mrb[3].mxu1 }
 0x126   : > { %579 = vst [vmem:[%s1258_s21 + $0x8] sm:$0xff] %v559_v19  ;;  %v370_v26 = vadd.f32 %v369_v24, %v277_v7  ;;  %581 = vst [vmem:[%s1258_s21 + $0x18] sm:$0xff] %v561_v21  ;;  %v459_v29 = vadd.f32 %v458_v27, %v285_v8 }
 0x127   : > { %v563_v28 = vmax.f32 %v368_v22, 0.0  ;;  %v565_v30 = vmax.f32 %v457_v25, 0.0 }
 0x128   : > { %v564_v31 = vmax.f32 %v370_v26, 0.0  ;;  %v373_v32 = vpop.f32.mrb[4].mxu0  ;;  %v566_v33 = vmax.f32 %v459_v29, 0.0  ;;  %v462_v35 = vpop.f32.mrb[4].mxu1 }
 0x129   : > { %584 = vst [vmem:[%s1258_s21 + $0x28] sm:$0xff] %v563_v28  ;;  %v374_v34 = vadd.f32 %v373_v32, %v273_v5  ;;  %v375_v36 = vpop.f32.mrb[5].mxu0  ;;  %586 = vst [vmem:[%s1258_s21 + $0x38] sm:$0xff] %v565_v30  ;;  %v463_v37 = vadd.f32 %v462_v35, %v281_v6  ;;  %v464_v39 = vpop.f32.mrb[5].mxu1 }
 0x12a   : > { %585 = vst [vmem:[%s1258_s21 + $0x30] sm:$0xff] %v564_v31  ;;  %v376_v38 = vadd.f32 %v375_v36, %v277_v7  ;;  %587 = vst [vmem:[%s1258_s21 + $0x40] sm:$0xff] %v566_v33  ;;  %v465_v41 = vadd.f32 %v464_v39, %v285_v8 }
 0x12b   : > { %v568_v40 = vmax.f32 %v374_v34, 0.0  ;;  %v570_v42 = vmax.f32 %v463_v37, 0.0 }
 0x12c   : > { %v569_v43 = vmax.f32 %v376_v38, 0.0  ;;  %v379_v44 = vpop.f32.mrb[6].mxu0  ;;  %v571_v45 = vmax.f32 %v465_v41, 0.0  ;;  %v468_v47 = vpop.f32.mrb[6].mxu1 }
 0x12d   : > { %589 = vst [vmem:[%s1258_s21 + $0x50] sm:$0xff] %v568_v40  ;;  %v380_v46 = vadd.f32 %v379_v44, %v273_v5  ;;  %v381_v48 = vpop.f32.mrb[7].mxu0  ;;  %591 = vst [vmem:[%s1258_s21 + $0x60] sm:$0xff] %v570_v42  ;;  %v469_v49 = vadd.f32 %v468_v47, %v281_v6  ;;  %v470_v51 = vpop.f32.mrb[7].mxu1 }
 0x12e   : > { %590 = vst [vmem:[%s1258_s21 + $0x58] sm:$0xff] %v569_v43  ;;  %v382_v50 = vadd.f32 %v381_v48, %v277_v7  ;;  %592 = vst [vmem:[%s1258_s21 + $0x68] sm:$0xff] %v571_v45  ;;  %v471_v53 = vadd.f32 %v470_v51, %v285_v8 }
 0x12f   : > { %v573_v52 = vmax.f32 %v380_v46, 0.0  ;;  %v575_v54 = vmax.f32 %v469_v49, 0.0 }
 0x130   : > { %v574_v55 = vmax.f32 %v382_v50, 0.0  ;;  %v576_v56 = vmax.f32 %v471_v53, 0.0 }
 0x131   : > { %594 = vst [vmem:[%s1258_s21 + $0x78] sm:$0x1] %v573_v52  ;;  %596 = vst [vmem:[%s1258_s21 + $0x88] sm:$0x1] %v575_v54 }
 0x132   : > { %595 = vst [vmem:[%s1258_s21 + $0x80] sm:$0x1] %v574_v55  ;;  %597 = vst [vmem:[%s1258_s21 + $0x90] sm:$0x1] %v576_v56 }
 0x140   : > { %v734_v58 = vpop.f32.mrb[8].mxu0  ;;  %v737_v60 = vpop.f32.mrb[8].mxu1 }
 0x141   : > { %v545_v59 = vadd.f32 %v734_v58, %v289_v0  ;;  %v539_v61 = vpop.f32.mrb[9].mxu0  ;;  %v555_v63 = vadd.f32 %v737_v60, %v289_v0  ;;  %v549_v3 = vpop.f32.mrb[9].mxu1 }
 0x142   : > { %v540_v2 = vadd.f32 %v539_v61, %v289_v0  ;;  %v550_v5 = vadd.f32 %v549_v3, %v289_v0 }
 0x143   : > { %v567_v4 = vmax.f32 %v545_v59, 0.0  ;;  %v577_v6 = vmax.f32 %v555_v63, 0.0 }
 0x144   : > { %v562_v7 = vmax.f32 %v540_v2, 0.0  ;;  %v572_v62 = vmax.f32 %v550_v5, 0.0 }
 0x145   : > { %588 = vst.msk [vmem:[%s1258_s21 + $0x48] sm:$0xff] %vm582_vm0, %v567_v4 }
 0x146   : > { %599 = vst.msk [vmem:[%s1258_s21 + $0x98] sm:$0x1] %vm598_vm1, %v577_v6 }
 0x147   : > { %583 = vst.msk [vmem:[%s1258_s21 + $0x20] sm:$0xff] %vm582_vm0, %v562_v7  ;;  %593 = vst.msk [vmem:[%s1258_s21 + $0x70] sm:$0xff] %vm582_vm0, %v572_v62 }
 0x148 PF: > { %s14_s12 = sadd.s32 1, %s909_s12  }
 0x149   : > { %p11_p3 = scmp.ge.s32.totalorder %s14_s12, 4  }
 0x14b   :  { %13 = sbr.rel (!%p11_p3) target bundleno = 1 (0x1), region = 67 }
 0x152   :  { %621 = vsyncpa [#allocation3], 1 }
 0x153   :  { %623 = vsyncpa [#allocation3 + $0x1], 1 }

// kernel: decoders_forward.3
= control target key start
LH: loop header
LB: loop body
LE: loop exit
PB: predicated region body
PF: predicated region fallthrough
CT: control target
= control target key end

     0   :  { %10 = vsyncpa [#allocation3], 0  ;;  %s6412_s0 = inlined_call_operand.vmem [shape: bf16[2,192,256], index: 0, kind: input, shape index: {}]   ;;  %s6413_s1 = inlined_call_operand.vmem [shape: bf16[256,288], index: 1, kind: input, shape index: {}]   ;;  %s6414_s2 = inlined_call_operand.hbm [shape: f32[1,288], index: 2, kind: input, shape index: {}]   ;;  %s6415_s3 = inlined_call_operand.hbm [shape: bf16[288,256], index: 3, kind: input, shape index: {}]   ;;  %s6416_s4 = inlined_call_operand.hbm [shape: f32[1,256], index: 4, kind: input, shape index: {}]   ;;  %s6417_s5 = inlined_call_operand.vmem [shape: f32[2,192,256], index: 5, kind: output, shape index: {}]  }
   0x1   :  { %11 = vsyncpa [#allocation5], 0  ;;  %s5273_s18 = smov 0  }
   0x2 LB: > { %s5237_s19 = smov [#allocation4]   ;;  %s5279_s21 = sadd.s32 4294967295, %s5235_s18   ;;  %s5235_s18 = sphi %s5273_s18, %s17_s18  }
   0x3   : > { %s184_s20 = sshll.u32 %s5237_s19, 4  ;;  %p3983_p0 = scmp.ge.s32.totalorder %s5235_s18, 1  ;;  %s5288_s20 = int_to_ptr.vmem [resolvable:$true] %s184_s20 }
   0x4   : > { %p158_p1 = scmp.lt.s32.totalorder %s5235_s18, 3  ;;  %p4624_p2 = scmp.eq.s32.totalorder %s5279_s21, 0 }
   0x5   : > { %s5238_s23 = smov [#allocation2]   ;;  %s5239_s26 = smov [#allocation6]  }
   0x6   : > { %p5284_p3 = pnand %p3983_p0, %p158_p1  ;;  %s174_s24 = sshll.u32 %s5238_s23, 4  ;;  %s5298_s24 = int_to_ptr.vmem [resolvable:$true] %s174_s24 }
   0x7   : > { %s198_s27 = sshll.u32 %s5239_s26, 4  ;;  %s5137_s30 = scalar_lea.hbm %s6415_s3, 4608  ;;  %s5300_s27 = int_to_ptr.vmem [resolvable:$true] %s198_s27 }
   0x8   : > { %p4614_p4 = pneg %p5284_p3  ;;  %p5138_p6 = scmp.ne.s32.totalorder %s6415_s3, %s5137_s30 }
   0x9   : > { %p5144_p10 = scmp.lt.u32.totalorder %s5137_s30, %s6415_s3 }
   0xa   : > { %p5294_p5 = pnand %p4624_p2, %p4614_p4 }
   0xc   : > { %p5310_p7 = pneg %p5294_p5 }
   0xe   : > { %p5140_p8 = pnand %p5310_p7, %p5138_p6 }
  0x10   : > { %p5141_p9 = pneg %p5140_p8 }
  0x12   : > { %p5146_p11 = pnand %p5144_p10, %p5141_p9 }
  0x14   : > { %5149 = shalt.err (!%p5146_p11)
}
  0x15   : > { %s5150_s11 = scalar_lea.vmem %s5288_s20, 4608  ;;  %p5158_p1 = scmp.lt.s32.totalorder %s5288_s20, %s5288_s20 }
  0x16   : > { %p5151_p12 = scmp.ne.s32.totalorder %s5288_s20, %s5150_s11  ;;  %p5159_p4 = scmp.lt.s32.totalorder %s5150_s11, %s5150_s11 }
  0x18   : > { %p5153_p13 = pnand %p5151_p12, %p5310_p7  ;;  %p5160_p6 = por %p5159_p4, %p5158_p1 }
  0x1a   : > { %p5154_p0 = pneg %p5153_p13 }
  0x1c   : > { %p5161_p8 = pnand %p5160_p6, %p5154_p0 }
  0x1e   : > { %5164 = shalt.err (!%p5161_p8)
}
  0x1f   : > { %s5240_s12 = smov 128   ;;  %s5241_s13 = smov 8  }
  0x20   : > { %4620 = dma.hbm_to_vmem [thread:$0]  (!%p5294_p5), %s6415_s3, 4608, %s5288_s20, [#allocation5], %s5240_s12, %s5240_s12, %s5241_s13  }
  0x21   : > { %s5165_s19 = scalar_lea.hbm %s6414_s2, 48 }
  0x22   : > { %p5166_p9 = scmp.ne.s32.totalorder %s6414_s2, %s5165_s19  ;;  %p5172_p12 = scmp.lt.u32.totalorder %s5165_s19, %s6414_s2 }
  0x24   : > { %p5168_p10 = pnand %p5166_p9, %p5310_p7 }
  0x26   : > { %p5169_p11 = pneg %p5168_p10 }
  0x28   : > { %p5174_p13 = pnand %p5172_p12, %p5169_p11 }
  0x2a   : > { %5177 = shalt.err (!%p5174_p13)
}
  0x2b   : > { %s5178_s20 = scalar_lea.vmem %s5298_s24, 48  ;;  %s5185_s30 = scalar_lea.vmem %s5298_s24, 64 }
  0x2c   : > { %p5179_p0 = scmp.ne.s32.totalorder %s5298_s24, %s5178_s20  ;;  %p5186_p6 = scmp.lt.s32.totalorder %s5298_s24, %s5298_s24 }
  0x2d   : > { %p5187_p8 = scmp.lt.s32.totalorder %s5185_s30, %s5178_s20 }
  0x2e   : > { %p5181_p1 = pnand %p5179_p0, %p5310_p7 }
  0x2f   : > { %p5188_p9 = por %p5187_p8, %p5186_p6 }
  0x30   : > { %p5182_p4 = pneg %p5181_p1 }
  0x32   : > { %p5189_p10 = pnand %p5188_p9, %p5182_p4 }
  0x34   : > { %5192 = shalt.err (!%p5189_p10)
}
  0x35   : > { %4617 = dma.hbm_to_vmem [thread:$0]  (!%p5294_p5), %s6414_s2, 48, %s5298_s24, [#allocation3]  }
  0x36   : > { %s5193_s11 = scalar_lea.hbm %s6416_s4, 32 }
  0x37   : > { %p5194_p11 = scmp.ne.s32.totalorder %s6416_s4, %s5193_s11  ;;  %p5200_p0 = scmp.lt.u32.totalorder %s5193_s11, %s6416_s4 }
  0x39   : > { %p5196_p12 = pnand %p5194_p11, %p5310_p7 }
  0x3b   : > { %p5197_p13 = pneg %p5196_p12 }
  0x3d   : > { %p5202_p1 = pnand %p5200_p0, %p5197_p13 }
  0x3f   : > { %5205 = shalt.err (!%p5202_p1)
}
  0x40   : > { %s5206_s24 = scalar_lea.vmem %s5300_s27, 32  ;;  %p5214_p9 = scmp.lt.s32.totalorder %s5300_s27, %s5300_s27 }
  0x41   : > { %p5207_p4 = scmp.ne.s32.totalorder %s5300_s27, %s5206_s24  ;;  %p5215_p10 = scmp.lt.s32.totalorder %s5206_s24, %s5206_s24 }
  0x43   : > { %p5209_p6 = pnand %p5207_p4, %p5310_p7  ;;  %p5216_p11 = por %p5215_p10, %p5214_p9 }
  0x45   : > { %p5210_p8 = pneg %p5209_p6 }
  0x47   : > { %p5217_p12 = pnand %p5216_p11, %p5210_p8 }
  0x49   : > { %5220 = shalt.err (!%p5217_p12)
}
  0x4a   : > { %4623 = dma.hbm_to_vmem [thread:$0]  (!%p5294_p5), %s6416_s4, 32, %s5300_s27, [#allocation5]  }
  0x4b   : > { %219 = sbr.rel (%p5284_p3) target bundleno = 1247 (0x4df), region = 40 }
  0x52   : > { %5226 = dma.done.wait (%p4624_p2), [#allocation3], 48  }
  0x53   : > { %5228 = vsyncadd (%p4624_p2), [#allocation3], 4294967248 }
  0x54   : > { %5230 = dma.done.wait (%p4624_p2), [#allocation5], 4640  }
  0x55   : > { %5232 = vsyncadd (%p4624_p2), [#allocation5], 4294962656  ;;  %v5391_v0 = vld [vmem:[%s6413_s1 + $0x4] ss:$12 sps:$4 sm:$0xff]   ;;  %v5396_v1 = vld [vmem:[%s6413_s1] ss:$12 sps:$4 sm:$0xff]  }
  0x56   : > { %639 = vmatprep.subr.bf16.mxu0 %v5391_v0  ;;  %v5402_v2 = vld [vmem:[%s6413_s1 + $0x1c] ss:$12 sps:$4 sm:$0xff]   ;;  %v5408_v3 = vld [vmem:[%s6413_s1 + $0x18] ss:$12 sps:$4 sm:$0xff]   ;;  %v5414_v4 = vld [vmem:[%s6413_s1 + $0x34] ss:$12 sps:$4 sm:$0xff]  }
  0x57   : > { %640 = vmatpush1.bf16.msra.mxu0 %v5396_v1  ;;  %v5420_v5 = vld [vmem:[%s6413_s1 + $0x30] ss:$12 sps:$4 sm:$0xff]   ;;  %v5426_v6 = vld [vmem:[%s6413_s1 + $0x4c] ss:$12 sps:$4 sm:$0xff]   ;;  %v5432_v7 = vld [vmem:[%s6413_s1 + $0x48] ss:$12 sps:$4 sm:$0xff]  }
  0x58   : > { %641 = vmatprep.subr.bf16.mxu0 %v5402_v2  ;;  %v5438_v8 = vld [vmem:[%s6413_s1 + $0x64] ss:$12 sps:$4 sm:$0xff]   ;;  %p255_p2 = scmp.lt.s32.totalorder %s5279_s21, 1  ;;  %v5445_v9 = vld [vmem:[%s6413_s1 + $0x60] ss:$12 sps:$4 sm:$0xff]   ;;  %vm1014_vm0 = vcmask 261120  }
  0x59   : > { %v5451_v10 = vld [vmem:[%s6413_s1 + $0x7c] ss:$12 sps:$4 sm:$0xff]   ;;  %v5459_v11 = vld [vmem:[%s6413_s1 + $0x78] ss:$12 sps:$4 sm:$0xff]   ;;  %v5465_v12 = vld [vmem:[%s6413_s1 + $0x94] ss:$12 sps:$4 sm:$0xff]  }
  0x5a   : > { %s6434_s21 = smov (!%p255_p2, %s5279_s21), 1  ;;  %v4685_v13 = vld [vmem:[%s6413_s1 + $0xc8] ss:$12 sps:$4 sm:$0xff]   ;;  %v5478_v15 = vld [vmem:[%s6413_s1 + $0x90] ss:$12 sps:$4 sm:$0xff]  }
  0x5b   : > { %642 = vmatpush1.bf16.msra.mxu0 %v5408_v3  ;;  %v4687_v14 = vld [vmem:[%s6413_s1 + $0x8] ss:$12 sps:$4 sm:$0xff]   ;;  %4368 = vmatprep.subr.bf16.mxu1 %v4685_v13  ;;  %s4600_s28 = smul.u32 192, %s6434_s21  ;;  %v4690_v16 = vld [vmem:[%s6413_s1 + $0xe0] ss:$12 sps:$4 sm:$0xff]  }
  0x5c   : > { %643 = vmatprep.subr.bf16.mxu0 %v5414_v4  ;;  %4369 = vmatpush3.bf16.msra.mxu1 %v4687_v14  ;;  %v4692_v17 = vld [vmem:[%s6413_s1 + $0x20] ss:$12 sps:$4 sm:$0xff]   ;;  %v4695_v19 = vld [vmem:[%s6413_s1 + $0xf8] ss:$12 sps:$4 sm:$0xff]   ;;  %v5504_v20 = vld [vmem:[%s6413_s1 + $0xa8] ss:$12 sps:$4 sm:$0xff]  }
  0x5d   : > { %v5491_v18 = vld [vmem:[%s6413_s1 + $0xac] ss:$12 sps:$4 sm:$0xff]   ;;  %4370 = vmatprep.subr.bf16.mxu1 %v4690_v16  ;;  %s5499_s24 = scalar_lea.vmem %s6412_s0, %s4600_s28  ;;  %v5514_v22 = vld [vmem:[%s6413_s1 + $0xc4] ss:$12 sps:$4 sm:$0xff]   ;;  %v4703_v27 = vld [vmem:[%s6413_s1 + $0x128] ss:$12 sps:$4 sm:$0xff]  }
  0x5e   : > { %v4697_v21 = vld [vmem:[%s6413_s1 + $0x38] ss:$12 sps:$4 sm:$0xff]   ;;  %v5520_v24 = vld [vmem:[%s6413_s1 + $0xc0] ss:$12 sps:$4 sm:$0xff]   ;;  %v4701_v25 = vld [vmem:[%s6413_s1 + $0x110] ss:$12 sps:$4 sm:$0xff]  }
  0x5f   : > { %644 = vmatpush1.bf16.msra.mxu0 %v5420_v5  ;;  %v4700_v23 = vld [vmem:[%s5499_s24 + $0x4] ss:$8 sps:$4 sm:$0xff]   ;;  %v4702_v26 = vld [vmem:[%s6413_s1 + $0x50] ss:$12 sps:$4 sm:$0xff]   ;;  %v4704_v30 = vld [vmem:[%s6413_s1 + $0x68] ss:$12 sps:$4 sm:$0xff]  }
  0x60   : > { %645 = vmatprep.subr.bf16.mxu0 %v5426_v6  ;;  %4371 = vmatpush3.bf16.msra.mxu1 %v4692_v17  ;;  %v5536_v28 = vld [vmem:[%s6413_s1 + $0xdc] ss:$12 sps:$4 sm:$0xff]   ;;  %v5541_v29 = vld [vmem:[%s6413_s1 + $0xd8] ss:$12 sps:$4 sm:$0xff]   ;;  %v4708_v31 = vld [vmem:[%s6413_s1 + $0x140] ss:$12 sps:$4 sm:$0xff]  }
  0x61   : > { %4372 = vmatprep.subr.bf16.mxu1 %v4695_v19  ;;  %671 = vmatprep.mubr.bf16.mxu0 %v4700_v23  ;;  %v5554_v32 = vld [vmem:[%s6413_s1 + $0xf4] ss:$12 sps:$4 sm:$0xff]   ;;  %v5559_v33 = vld [vmem:[%s6413_s1 + $0xf0] ss:$12 sps:$4 sm:$0xff]   ;;  %v4710_v35 = vld [vmem:[%s6413_s1 + $0x158] ss:$12 sps:$4 sm:$0xff]  }
  0x62   : > { %734 = vmatprep.mubr.bf16.mxu1 %v4700_v23  ;;  %v4709_v34 = vld [vmem:[%s6413_s1 + $0x80] ss:$12 sps:$4 sm:$0xff]   ;;  %v4711_v37 = vld [vmem:[%s6413_s1 + $0x98] ss:$12 sps:$4 sm:$0xff]   ;;  %v5581_v38 = vld [vmem:[%s6413_s1 + $0x108] ss:$12 sps:$4 sm:$0xff]  }
  0x63   : > { %646 = vmatpush1.bf16.msra.mxu0 %v5432_v7  ;;  %v5572_v36 = vld [vmem:[%s6413_s1 + $0x10c] ss:$12 sps:$4 sm:$0xff]   ;;  %v4715_v39 = vld [vmem:[%s6413_s1 + $0x170] ss:$12 sps:$4 sm:$0xff]   ;;  %v5615_v46 = vld [vmem:[%s6413_s1 + $0x154] ss:$12 sps:$4 sm:$0xff]  }
  0x64   : > { %647 = vmatprep.subr.bf16.mxu0 %v5438_v8  ;;  %4373 = vmatpush3.bf16.msra.mxu1 %v4697_v21  ;;  %v5590_v40 = vld [vmem:[%s6413_s1 + $0x124] ss:$12 sps:$4 sm:$0xff]   ;;  %v5599_v42 = vld [vmem:[%s6413_s1 + $0x120] ss:$12 sps:$4 sm:$0xff]   ;;  %v5605_v44 = vld [vmem:[%s6413_s1 + $0x13c] ss:$12 sps:$4 sm:$0xff]  }
  0x65   : > { %4374 = vmatprep.subr.bf16.mxu1 %v4701_v25  ;;  %v4716_v41 = vld [vmem:[%s6413_s1 + $0xb0] ss:$12 sps:$4 sm:$0xff]   ;;  %v5610_v45 = vld [vmem:[%s6413_s1 + $0x138] ss:$12 sps:$4 sm:$0xff]   ;;  %v4698_v48 = vld [vmem:[%s5499_s24] ss:$8 sps:$4 sm:$0xff]  }
  0x66   : > { %v4719_v43 = vld [vmem:[#allocation4 + $0x4] ss:$8 sps:$4 sm:$0xff]   ;;  %v4717_v47 = vld [vmem:[#allocation4] ss:$8 sps:$4 sm:$0xff]   ;;  %v4722_v49 = vld [vmem:[#allocation4 + $0x14] ss:$8 sps:$4 sm:$0xff]  }
  0x67   : > { %648 = vmatpush1.bf16.msra.mxu0 %v5445_v9  ;;  %v4705_v50 = vld [vmem:[%s5499_s24 + $0x14] ss:$8 sps:$4 sm:$0xff]   ;;  %v4725_v53 = vld [vmem:[#allocation4 + $0x24] ss:$8 sps:$4 sm:$0xff]   ;;  %v5631_v54 = vld [vmem:[%s6413_s1 + $0x16c] ss:$12 sps:$4 sm:$0xff]  }
  0x68   : > { %649 = vmatprep.subr.bf16.mxu0 %v5451_v10  ;;  %4375 = vmatpush3.bf16.msra.mxu1 %v4702_v26  ;;  %v4720_v51 = vld [vmem:[#allocation4 + $0x10] ss:$8 sps:$4 sm:$0xff]   ;;  %v4707_v56 = vld [vmem:[%s5499_s24 + $0x10] ss:$8 sps:$4 sm:$0xff]   ;;  %v4723_v57 = vld [vmem:[#allocation4 + $0x20] ss:$8 sps:$4 sm:$0xff]  }
  0x69   : > { %4376 = vmatprep.subr.bf16.mxu1 %v4703_v27  ;;  %v5625_v52 = vld [vmem:[%s6413_s1 + $0x150] ss:$12 sps:$4 sm:$0xff]   ;;  %v5636_v55 = vld [vmem:[%s6413_s1 + $0x168] ss:$12 sps:$4 sm:$0xff]   ;;  %v4712_v58 = vld [vmem:[%s5499_s24 + $0x24] ss:$8 sps:$4 sm:$0xff]  }
  0x6a   : > { %v4728_v59 = vld [vmem:[#allocation4 + $0x34] ss:$8 sps:$4 sm:$0xff]   ;;  %v4726_v60 = vld [vmem:[#allocation4 + $0x30] ss:$8 sps:$4 sm:$0xff]   ;;  %v4731_v61 = vld [vmem:[#allocation4 + $0x44] ss:$8 sps:$4 sm:$0xff]  }
  0x6b   : > { %650 = vmatpush1.bf16.msra.mxu0 %v5459_v11  ;;  %v4729_v62 = vld [vmem:[#allocation4 + $0x40] ss:$8 sps:$4 sm:$0xff]   ;;  %v4714_v63 = vld [vmem:[%s5499_s24 + $0x20] ss:$8 sps:$4 sm:$0xff]   ;;  %v4732_v14 = vld [vmem:[#allocation4 + $0x50] ss:$8 sps:$4 sm:$0xff]  }
  0x6c   : > { %651 = vmatprep.subr.bf16.mxu0 %v5465_v12  ;;  %4377 = vmatpush3.bf16.msra.mxu1 %v4704_v30  ;;  %v4734_v13 = vld [vmem:[#allocation4 + $0x54] ss:$8 sps:$4 sm:$0xff]   ;;  %v4737_v16 = vld [vmem:[#allocation4 + $0x64] ss:$8 sps:$4 sm:$0xff]   ;;  %v4735_v17 = vld [vmem:[#allocation4 + $0x60] ss:$8 sps:$4 sm:$0xff]  }
  0x6d   : > { %4378 = vmatprep.subr.bf16.mxu1 %v4708_v31  ;;  %v4740_v19 = vld [vmem:[#allocation4 + $0x74] ss:$8 sps:$4 sm:$0xff]   ;;  %v5685_v25 = vld [vmem:[%s5499_s24 + $0x44] ss:$8 sps:$4 sm:$0xff]   ;;  %v5693_v27 = vld [vmem:[%s5499_s24 + $0x54] ss:$8 sps:$4 sm:$0xff]  }
  0x6e   : > { %v4746_v21 = vld [vmem:[#allocation4 + $0x94] ss:$8 sps:$4 sm:$0xff]   ;;  %s4601_s26 = smul.u32 384, %s6434_s21 }
  0x6f   : > { %652 = vmatpush1.bf16.msra.mxu0 %v5478_v15  ;;  %v5677_v23 = vld [vmem:[%s5499_s24 + $0x30] ss:$8 sps:$4 sm:$0xff]   ;;  %v5689_v26 = vld [vmem:[%s5499_s24 + $0x40] ss:$8 sps:$4 sm:$0xff]  }
  0x70   : > { %653 = vmatprep.subr.bf16.mxu0 %v5491_v18  ;;  %4379 = vmatpush3.bf16.msra.mxu1 %v4709_v34  ;;  %s6146_s20 = scalar_lea.vmem %s6417_s5, %s4601_s26 }
  0x71   : > { %4380 = vmatprep.subr.bf16.mxu1 %v4710_v35 }
  0x73   : > { %654 = vmatpush1.bf16.msra.mxu0 %v5504_v20 }
  0x74   : > { %655 = vmatprep.subr.bf16.mxu0 %v5514_v22  ;;  %4381 = vmatpush3.bf16.msra.mxu1 %v4711_v37 }
  0x75   : > { %4382 = vmatprep.subr.bf16.mxu1 %v4715_v39 }
  0x77   : > { %656 = vmatpush1.bf16.msra.mxu0 %v5520_v24 }
  0x78   : > { %657 = vmatprep.subr.bf16.mxu0 %v5536_v28  ;;  %4383 = vmatpush3.bf16.msra.mxu1 %v4716_v41 }
  0x79   : > { %1024 = vmatprep.subr.bf16.mxu1 %v4719_v43 }
  0x7b   : > { %658 = vmatpush1.bf16.msra.mxu0 %v5541_v29  ;;  %735 = vmatmul.mubr.bf16.vlgmr.msra.gmra.mrb[0].mxu1 %v4698_v48 }
  0x7c   : > { %659 = vmatprep.subr.bf16.mxu0 %v5554_v32  ;;  %742 = vmatprep.mubr.bf16.mxu1 %v4705_v50 }
  0x7d   : > { %1025 = vmatpush1.bf16.msra.mxu1 %v4717_v47 }
  0x7e   : > { %1026 = vmatprep.subr.bf16.mxu1 %v4722_v49 }
  0x7f   : > { %660 = vmatpush1.bf16.msra.mxu0 %v5559_v33 }
  0x80   : > { %661 = vmatprep.subr.bf16.mxu0 %v5572_v36 }
  0x81   : > { %1027 = vmatpush1.bf16.msra.mxu1 %v4720_v51 }
  0x82   : > { %1028 = vmatprep.subr.bf16.mxu1 %v4725_v53 }
  0x83   : > { %662 = vmatpush1.bf16.msra.mxu0 %v5581_v38  ;;  %743 = vmatmul.mubr.bf16.gmra.mrb[4].mxu1 %v4707_v56 }
  0x84   : > { %663 = vmatprep.subr.bf16.mxu0 %v5590_v40  ;;  %750 = vmatprep.mubr.bf16.mxu1 %v4712_v58 }
  0x85   : > { %1029 = vmatpush1.bf16.msra.mxu1 %v4723_v57 }
  0x86   : > { %1030 = vmatprep.subr.bf16.mxu1 %v4728_v59 }
  0x87   : > { %664 = vmatpush1.bf16.msra.mxu0 %v5599_v42 }
  0x88   : > { %665 = vmatprep.subr.bf16.mxu0 %v5605_v44 }
  0x89   : > { %1031 = vmatpush1.bf16.msra.mxu1 %v4726_v60 }
  0x8a   : > { %1032 = vmatprep.subr.bf16.mxu1 %v4731_v61 }
  0x8b   : > { %666 = vmatpush1.bf16.msra.mxu0 %v5610_v45  ;;  %751 = vmatmul.mubr.bf16.gmra.mrb[8].mxu1 %v4714_v63 }
  0x8c   : > { %667 = vmatprep.subr.bf16.mxu0 %v5615_v46 }
  0x8d   : > { %1033 = vmatpush1.bf16.msra.mxu1 %v4729_v62 }
  0x8e   : > { %1034 = vmatprep.subr.bf16.mxu1 %v4734_v13 }
  0x8f   : > { %668 = vmatpush1.bf16.msra.mxu0 %v5625_v52 }
  0x90   : > { %669 = vmatprep.subr.bf16.mxu0 %v5631_v54 }
  0x91   : > { %1035 = vmatpush1.bf16.msra.mxu1 %v4732_v14 }
  0x92   : > { %1036 = vmatprep.subr.bf16.mxu1 %v4737_v16 }
  0x93   : > { %670 = vmatpush1.bf16.msra.mxu0 %v5636_v55 }
  0x94   : > { %1547 = vmatprep.subr.bf16.mxu0 %v5391_v0  ;;  %v4738_v0 = vld [vmem:[#allocation4 + $0x70] ss:$8 sps:$4 sm:$0xff]  }
  0x95   : > { %1037 = vmatpush1.bf16.msra.mxu1 %v4735_v17 }
  0x96   : > { %672 = vmatmul.mubr.bf16.vlgmr.msra.gmra.mrb[0].mxu0 %v4698_v48  ;;  %1038 = vmatprep.subr.bf16.mxu1 %v4740_v19 }
  0x97   : > { %681 = vmatprep.mubr.bf16.mxu0 %v4705_v50  ;;  %1548 = vmatpush1.bf16.msra.mxu0 %v5396_v1  ;;  %v4743_v1 = vld [vmem:[#allocation4 + $0x84] ss:$8 sps:$4 sm:$0xff]  }
  0x98   : > { %1549 = vmatprep.subr.bf16.mxu0 %v5402_v2  ;;  %v4741_v2 = vld [vmem:[#allocation4 + $0x80] ss:$8 sps:$4 sm:$0xff]  }
  0x99   : > { %1039 = vmatpush1.bf16.msra.mxu1 %v4738_v0 }
  0x9a   : > { %1040 = vmatprep.subr.bf16.mxu1 %v4743_v1 }
  0x9b   : > { %1550 = vmatpush1.bf16.msra.mxu0 %v5408_v3  ;;  %v4744_v3 = vld [vmem:[#allocation4 + $0x90] ss:$8 sps:$4 sm:$0xff]  }
  0x9c   : > { %1551 = vmatprep.subr.bf16.mxu0 %v5414_v4  ;;  %v4749_v4 = vld [vmem:[#allocation4 + $0xa4] ss:$8 sps:$4 sm:$0xff]  }
  0x9d   : > { %1041 = vmatpush1.bf16.msra.mxu1 %v4741_v2 }
  0x9e   : > { %682 = vmatmul.mubr.bf16.gmra.mrb[4].mxu0 %v4707_v56  ;;  %1042 = vmatprep.subr.bf16.mxu1 %v4746_v21 }
  0x9f   : > { %691 = vmatprep.mubr.bf16.mxu0 %v4712_v58  ;;  %1552 = vmatpush1.bf16.msra.mxu0 %v5420_v5  ;;  %v4747_v5 = vld [vmem:[#allocation4 + $0xa0] ss:$8 sps:$4 sm:$0xff]  }
  0xa0   : > { %1553 = vmatprep.subr.bf16.mxu0 %v5426_v6  ;;  %v4752_v6 = vld [vmem:[#allocation4 + $0xb4] ss:$8 sps:$4 sm:$0xff]  }
  0xa1   : > { %1043 = vmatpush1.bf16.msra.mxu1 %v4744_v3 }
  0xa2   : > { %1044 = vmatprep.subr.bf16.mxu1 %v4749_v4 }
  0xa3   : > { %1554 = vmatpush1.bf16.msra.mxu0 %v5432_v7  ;;  %v4750_v7 = vld [vmem:[#allocation4 + $0xb0] ss:$8 sps:$4 sm:$0xff]  }
  0xa4   : > { %1555 = vmatprep.subr.bf16.mxu0 %v5438_v8  ;;  %v4755_v8 = vld [vmem:[#allocation4 + $0xc4] ss:$8 sps:$4 sm:$0xff]  }
  0xa5   : > { %1045 = vmatpush1.bf16.msra.mxu1 %v4747_v5 }
  0xa6   : > { %692 = vmatmul.mubr.bf16.gmra.mrb[8].mxu0 %v4714_v63  ;;  %1046 = vmatprep.subr.bf16.mxu1 %v4752_v6 }
  0xa7   : > { %1556 = vmatpush1.bf16.msra.mxu0 %v5445_v9  ;;  %v4753_v9 = vld [vmem:[#allocation4 + $0xc0] ss:$8 sps:$4 sm:$0xff]  }
  0xa8   : > { %1557 = vmatprep.subr.bf16.mxu0 %v5451_v10  ;;  %v4758_v10 = vld [vmem:[#allocation4 + $0xd4] ss:$8 sps:$4 sm:$0xff]  }
  0xa9   : > { %1047 = vmatpush1.bf16.msra.mxu1 %v4750_v7 }
  0xaa   : > { %1048 = vmatprep.subr.bf16.mxu1 %v4755_v8 }
  0xab   : > { %1558 = vmatpush1.bf16.msra.mxu0 %v5459_v11  ;;  %v4756_v11 = vld [vmem:[#allocation4 + $0xd0] ss:$8 sps:$4 sm:$0xff]  }
  0xac   : > { %1559 = vmatprep.subr.bf16.mxu0 %v5465_v12  ;;  %v4761_v12 = vld [vmem:[#allocation4 + $0xe4] ss:$8 sps:$4 sm:$0xff]  }
  0xad   : > { %1049 = vmatpush1.bf16.msra.mxu1 %v4753_v9 }
  0xae   : > { %1050 = vmatprep.subr.bf16.mxu1 %v4758_v10 }
  0xaf   : > { %1560 = vmatpush1.bf16.msra.mxu0 %v5478_v15  ;;  %v4759_v15 = vld [vmem:[#allocation4 + $0xe0] ss:$8 sps:$4 sm:$0xff]  }
  0xb0   : > { %1561 = vmatprep.subr.bf16.mxu0 %v5491_v18  ;;  %v4764_v18 = vld [vmem:[#allocation4 + $0xf4] ss:$8 sps:$4 sm:$0xff]  }
  0xb1   : > { %1051 = vmatpush1.bf16.msra.mxu1 %v4756_v11 }
  0xb2   : > { %1052 = vmatprep.subr.bf16.mxu1 %v4761_v12  ;;  %v4765_v12 = vld [vmem:[#allocation4 + $0x100] ss:$8 sps:$4 sm:$0xff]  }
  0xb3   : > { %1562 = vmatpush1.bf16.msra.mxu0 %v5504_v20  ;;  %v4762_v20 = vld [vmem:[#allocation4 + $0xf0] ss:$8 sps:$4 sm:$0xff]  }
  0xb4   : > { %1563 = vmatprep.subr.bf16.mxu0 %v5514_v22  ;;  %v4767_v22 = vld [vmem:[#allocation4 + $0x104] ss:$8 sps:$4 sm:$0xff]  }
  0xb5   : > { %1053 = vmatpush1.bf16.msra.mxu1 %v4759_v15 }
  0xb6   : > { %1054 = vmatprep.subr.bf16.mxu1 %v4764_v18 }
  0xb7   : > { %1564 = vmatpush1.bf16.msra.mxu0 %v5520_v24  ;;  %v5680_v24 = vld [vmem:[%s5499_s24 + $0x34] ss:$8 sps:$4 sm:$0xff]  }
  0xb8   : > { %1565 = vmatprep.subr.bf16.mxu0 %v5536_v28  ;;  %1579 = vmatprep.mubr.bf16.mxu0 %v5680_v24  ;;  %v5696_v28 = vld [vmem:[%s5499_s24 + $0x50] ss:$8 sps:$4 sm:$0xff]  }
  0xb9   : > { %1055 = vmatpush1.bf16.msra.mxu1 %v4762_v20  ;;  %v4770_v20 = vld [vmem:[#allocation4 + $0x114] ss:$8 sps:$4 sm:$0xff]  }
  0xba   : > { %1087 = vmatprep.subr.bf16.mxu1 %v4767_v22 }
  0xbb   : > { %1566 = vmatpush1.bf16.msra.mxu0 %v5541_v29  ;;  %v338_v29 = vlaneseq }
  0xbc   : > { %1567 = vmatprep.subr.bf16.mxu0 %v5554_v32  ;;  %v336_v32 = vld [vmem:[#allocation2] sm:$0x7] }
  0xbd   : > { %v339_v30 = vshrl.u32 %v338_v29, 7 }
  0xbf   : > { %1568 = vmatpush1.bf16.msra.mxu0 %v5559_v33  ;;  %v5700_v31 = vsub.s32 2, %v339_v30  ;;  %v5703_v41 = vsub.s32 0, %v339_v30 }
  0xc0   : > { %1569 = vmatprep.subr.bf16.mxu0 %v5572_v36 }
  0xc1   : > { %v349_v34 = vrot.slane %v336_v32, %v5700_v31  ;;  %v5708_v48 = vrot.slane %v336_v32, %v5703_v41 }
  0xc3   : > { %1570 = vmatpush1.bf16.msra.mxu0 %v5581_v38 }
  0xc4   : > { %1571 = vmatprep.subr.bf16.mxu0 %v5590_v40 }
  0xc7   : > { %1572 = vmatpush1.bf16.msra.mxu0 %v5599_v42 }
  0xc8   : > { %1573 = vmatprep.subr.bf16.mxu0 %v5605_v44  ;;  %v5705_v44 = vsub.s32 1, %v339_v30 }
  0xcb   : > { %1574 = vmatpush1.bf16.msra.mxu0 %v5610_v45 }
  0xcc   : > { %1575 = vmatprep.subr.bf16.mxu0 %v5615_v46 }
  0xcf   : > { %1576 = vmatpush1.bf16.msra.mxu0 %v5625_v52  ;;  %v5713_v52 = vrot.slane %v336_v32, %v5705_v44 }
  0xd0   : > { %1577 = vmatprep.subr.bf16.mxu0 %v5631_v54 }
  0xd3   : > { %1578 = vmatpush1.bf16.msra.mxu0 %v5636_v55 }
  0xd6   : > { %1580 = vmatmul.mubr.bf16.vlgmr.msra.gmra.mrb[12].mxu0 %v5677_v23 }
  0xd7   : > { %1589 = vmatprep.mubr.bf16.mxu0 %v5685_v25 }
  0xde   : > { %1590 = vmatmul.mubr.bf16.gmra.mrb[16].mxu0 %v5689_v26 }
  0xdf   : > { %1599 = vmatprep.mubr.bf16.mxu0 %v5693_v27 }
  0xe6   : > { %1600 = vmatmul.mubr.bf16.gmra.mrb[20].mxu0 %v5696_v28 }
 0x14e   : > { %v4384_v33 = vpop.f32.mrb[0].mxu1 }
 0x14f   : > { %v4385_v35 = vpop.f32.mrb[1].mxu1 }
 0x150   : > { %v4386_v36 = vadd.f32 %v4385_v35, %v4384_v33  ;;  %v4387_v37 = vpop.f32.mrb[2].mxu1 }
 0x151   : > { %v4388_v38 = vpop.f32.mrb[3].mxu1 }
 0x152   : > { %v737_v39 = vadd.f32 %v4386_v36, %v349_v34  ;;  %v4389_v40 = vadd.f32 %v4388_v38, %v4387_v37  ;;  %v4768_v38 = vld [vmem:[#allocation4 + $0x110] ss:$8 sps:$4 sm:$0xff]  }
 0x154   : > { %v761_v42 = vmax.f32 %v737_v39, 0.0  ;;  %v740_v43 = vadd.f32 %v4389_v40, %v349_v34 }
 0x156   : > { %v764_v45 = vmax.f32 %v740_v43, 0.0  ;;  %v4390_v46 = vpop.f32.mrb[4].mxu1 }
 0x157   : > { %v4391_v47 = vpop.f32.mrb[5].mxu1 }
 0x158   : > { %v5710_v49 = vpack.c.bf16 %v764_v45, %v761_v42  ;;  %v4392_v50 = vadd.f32 %v4391_v47, %v4390_v46  ;;  %v4393_v51 = vpop.f32.mrb[6].mxu1 }
 0x159   : > { %v4394_v53 = vpop.f32.mrb[7].mxu1 }
 0x15a   : > { %v745_v54 = vadd.f32 %v4392_v50, %v349_v34  ;;  %v4395_v55 = vadd.f32 %v4394_v53, %v4393_v51 }
 0x15c   : > { %v767_v59 = vmax.f32 %v745_v54, 0.0  ;;  %v748_v60 = vadd.f32 %v4395_v55, %v349_v34 }
 0x15e   : > { %v770_v14 = vmax.f32 %v748_v60, 0.0  ;;  %v4396_v16 = vpop.f32.mrb[8].mxu1 }
 0x15f   : > { %v4397_v19 = vpop.f32.mrb[9].mxu1 }
 0x160   : > { %v5719_v2 = vpack.c.bf16 %v770_v14, %v767_v59  ;;  %v4398_v21 = vadd.f32 %v4397_v19, %v4396_v16  ;;  %v4399_v3 = vpop.f32.mrb[10].mxu1  ;;  %v6418_v14 = vmov 0   ;;  %v4774_v16 = vld [vmem:[%s6413_s1 + $0x20] ss:$12 sps:$4 sm:$0xff]   ;;  %v4779_v19 = vld [vmem:[%s6413_s1 + $0x38] ss:$12 sps:$4 sm:$0xff]  }
 0x161   : > { %v4400_v6 = vpop.f32.mrb[11].mxu1 }
 0x162   : > { %v753_v8 = vadd.f32 %v4398_v21, %v349_v34  ;;  %v4401_v9 = vadd.f32 %v4400_v6, %v4399_v3  ;;  %v4786_v21 = vld [vmem:[%s6413_s1 + $0x68] ss:$12 sps:$4 sm:$0xff]   ;;  %v5770_v3 = vld [vmem:[#allocation4] ss:$8 sps:$4 sm:$0xff]   ;;  %v5778_v6 = vld [vmem:[#allocation4 + $0x14] ss:$8 sps:$4 sm:$0xff]  }
 0x164   : > { %v773_v22 = vmax.f32 %v753_v8, 0.0  ;;  %v756_v29 = vadd.f32 %v4401_v9, %v349_v34  ;;  %v4771_v34 = vld [vmem:[%s6413_s1 + $0xc8] ss:$12 sps:$4 sm:$0xff]  }
 0x165   : > { %v5785_v8 = vld [vmem:[#allocation4 + $0x10] ss:$8 sps:$4 sm:$0xff]   ;;  %v5788_v9 = vld [vmem:[#allocation4 + $0x24] ss:$8 sps:$4 sm:$0xff]  }
 0x166   : > { %v776_v36 = vmax.f32 %v756_v29, 0.0  ;;  %v5819_v29 = vld [vmem:[%s6413_s1] ss:$12 sps:$4 sm:$0xff]  }
 0x168   : > { %v785_v42 = vpack.c.bf16 %v776_v36, %v773_v22  ;;  %v5814_v22 = vld [vmem:[#allocation4 + $0x44] ss:$8 sps:$4 sm:$0xff]   ;;  %v5845_v36 = vld [vmem:[%s6413_s1 + $0x34] ss:$12 sps:$4 sm:$0xff]  }
 0x169   : > { %v673_v56 = vpop.f32.mrb[0].mxu0  ;;  %6427 = vst [vmem:[#allocation10_spill] sm:$0xff] %v5845_v36 }
 0x16a   : > { %v674_v57 = vadd.f32 %v673_v56, %v5708_v48  ;;  %v675_v58 = vpop.f32.mrb[1].mxu0 }
 0x16b   : > { %v676_v61 = vadd.f32 %v675_v58, %v5713_v52  ;;  %v677_v62 = vpop.f32.mrb[2].mxu0 }
 0x16c   : > { %v678_v63 = vadd.f32 %v677_v62, %v5708_v48  ;;  %v679_v13 = vpop.f32.mrb[3].mxu0  ;;  %v759_v0 = vmax.f32 %v674_v57, 0.0 }
 0x16d   : > { %v680_v17 = vadd.f32 %v679_v13, %v5713_v52  ;;  %v760_v4 = vmax.f32 %v676_v61, 0.0 }
 0x16e   : > { %v762_v1 = vmax.f32 %v678_v63, 0.0 }
 0x16f   : > { %v763_v5 = vmax.f32 %v680_v17, 0.0  ;;  %v4778_v17 = vld [vmem:[%s6413_s1 + $0xf8] ss:$12 sps:$4 sm:$0xff]  }
 0x170   : > { %v777_v7 = vpack.c.bf16 %v762_v1, %v759_v0  ;;  %v4781_v0 = vld [vmem:[%s6413_s1 + $0x50] ss:$12 sps:$4 sm:$0xff]   ;;  %v4784_v1 = vld [vmem:[%s6413_s1 + $0x128] ss:$12 sps:$4 sm:$0xff]  }
 0x171   : > { %v778_v10 = vpack.c.bf16 %v763_v5, %v760_v4  ;;  %v683_v11 = vpop.f32.mrb[4].mxu0  ;;  %v5772_v4 = vld [vmem:[#allocation4 + $0x4] ss:$8 sps:$4 sm:$0xff]   ;;  %v4788_v5 = vld [vmem:[%s6413_s1 + $0x80] ss:$12 sps:$4 sm:$0xff]  }
 0x172   : > { %v684_v15 = vadd.f32 %v683_v11, %v5708_v48  ;;  %v685_v18 = vpop.f32.mrb[5].mxu0  ;;  %1931 = vmatprep.subr.bf16.mxu0 %v5772_v4  ;;  %v5797_v11 = vld [vmem:[#allocation4 + $0x20] ss:$8 sps:$4 sm:$0xff]  }
 0x173   : > { %v686_v30 = vadd.f32 %v685_v18, %v5713_v52  ;;  %v687_v32 = vpop.f32.mrb[6].mxu0  ;;  %1056 = vmatprep.mubr.bf16.mxu1 %v778_v10  ;;  %1932 = vmatpush1.bf16.msra.mxu0 %v5770_v3  ;;  %v4794_v10 = vld [vmem:[%s6413_s1 + $0x170] ss:$12 sps:$4 sm:$0xff]  }
 0x174   : > { %v688_v33 = vadd.f32 %v687_v32, %v5708_v48  ;;  %v689_v35 = vpop.f32.mrb[7].mxu0  ;;  %1057 = vmatmul.mubr.bf16.vlgmr.msra.gmra.mrb[12].mxu1 %v777_v7  ;;  %v765_v39 = vmax.f32 %v684_v15, 0.0  ;;  %v4791_v7 = vld [vmem:[%s6413_s1 + $0x158] ss:$12 sps:$4 sm:$0xff]   ;;  %1933 = vmatprep.subr.bf16.mxu0 %v5778_v6  ;;  %v4795_v15 = vld [vmem:[%s6413_s1 + $0xb0] ss:$12 sps:$4 sm:$0xff]  }
 0x175   : > { %v690_v37 = vadd.f32 %v689_v35, %v5713_v52  ;;  %1088 = vmatpush1.bf16.msra.mxu1 %v4765_v12  ;;  %v766_v43 = vmax.f32 %v686_v30, 0.0  ;;  %v5800_v12 = vld [vmem:[#allocation4 + $0x34] ss:$8 sps:$4 sm:$0xff]   ;;  %v5808_v18 = vld [vmem:[%s6413_s1 + $0x4] ss:$12 sps:$4 sm:$0xff]  }
 0x176   : > { %v768_v40 = vmax.f32 %v688_v33, 0.0  ;;  %1089 = vmatprep.subr.bf16.mxu1 %v4770_v20  ;;  %v5811_v20 = vld [vmem:[#allocation4 + $0x30] ss:$8 sps:$4 sm:$0xff]   ;;  %v5828_v32 = vld [vmem:[#allocation4 + $0x40] ss:$8 sps:$4 sm:$0xff]  }
 0x177   : > { %v769_v45 = vmax.f32 %v690_v37, 0.0  ;;  %1934 = vmatpush1.bf16.msra.mxu0 %v5785_v8  ;;  %v5825_v30 = vld [vmem:[%s6413_s1 + $0x1c] ss:$12 sps:$4 sm:$0xff]   ;;  %v5832_v33 = vld [vmem:[#allocation4 + $0x54] ss:$8 sps:$4 sm:$0xff]  }
 0x178   : > { %v780_v46 = vpack.c.bf16 %v768_v40, %v765_v39  ;;  %1935 = vmatprep.subr.bf16.mxu0 %v5788_v9  ;;  %v5838_v35 = vld [vmem:[%s6413_s1 + $0x18] ss:$12 sps:$4 sm:$0xff]   ;;  %v5851_v37 = vld [vmem:[#allocation4 + $0x64] ss:$8 sps:$4 sm:$0xff]  }
 0x179   : > { %v781_v47 = vpack.c.bf16 %v769_v45, %v766_v43  ;;  %v693_v50 = vpop.f32.mrb[8].mxu0  ;;  %1090 = vmatpush1.bf16.msra.mxu1 %v4768_v38  ;;  %6426 = vst [vmem:[#allocation9_spill] sm:$0xff] %v5838_v35  ;;  %v4807_v38 = vld [vmem:[%s6413_s1 + $0x4c] ss:$12 sps:$4 sm:$0xff]   ;;  %v5882_v43 = vld [vmem:[#allocation4 + $0x84] ss:$8 sps:$4 sm:$0xff]  }
 0x17a   : > { %v694_v51 = vadd.f32 %v693_v50, %v5708_v48  ;;  %v695_v53 = vpop.f32.mrb[9].mxu0  ;;  %4402 = vmatprep.subr.bf16.mxu1 %v4771_v34  ;;  %v5864_v39 = vld [vmem:[#allocation4 + $0x60] ss:$8 sps:$4 sm:$0xff]   ;;  %v5868_v40 = vld [vmem:[#allocation4 + $0x74] ss:$8 sps:$4 sm:$0xff]  }
 0x17b   : > { %v696_v54 = vadd.f32 %v695_v53, %v5713_v52  ;;  %v697_v55 = vpop.f32.mrb[10].mxu0  ;;  %1066 = vmatprep.mubr.bf16.mxu1 %v781_v47  ;;  %1936 = vmatpush1.bf16.msra.mxu0 %v5797_v11  ;;  %v4805_v34 = vld [vmem:[%s6413_s1 + $0x48] ss:$12 sps:$4 sm:$0xff]   ;;  %v4808_v45 = vld [vmem:[%s6413_s1 + $0x60] ss:$12 sps:$4 sm:$0xff]  }
 0x17c   : > { %v698_v56 = vadd.f32 %v697_v55, %v5708_v48  ;;  %v699_v57 = vpop.f32.mrb[11].mxu0  ;;  %1067 = vmatmul.mubr.bf16.gmra.mrb[16].mxu1 %v780_v46  ;;  %v771_v59 = vmax.f32 %v694_v51, 0.0  ;;  %v4772_v48 = vld [vmem:[%s6413_s1 + $0x8] ss:$12 sps:$4 sm:$0xff]   ;;  %1937 = vmatprep.subr.bf16.mxu0 %v5800_v12  ;;  %v5888_v46 = vld [vmem:[%s5499_s24 + $0x64] ss:$8 sps:$4 sm:$0xff]  }
 0x17d   : > { %v700_v58 = vadd.f32 %v699_v57, %v5713_v52  ;;  %v772_v61 = vmax.f32 %v696_v54, 0.0  ;;  %v4773_v52 = vld [vmem:[%s6413_s1 + $0xe0] ss:$12 sps:$4 sm:$0xff]   ;;  %v4811_v51 = vld [vmem:[%s6413_s1 + $0x78] ss:$12 sps:$4 sm:$0xff]  }
 0x17e   : > { %v774_v60 = vmax.f32 %v698_v56, 0.0  ;;  %v5894_v47 = vld [vmem:[#allocation4 + $0x80] ss:$8 sps:$4 sm:$0xff]   ;;  %v5898_v50 = vld [vmem:[#allocation4 + $0x94] ss:$8 sps:$4 sm:$0xff]  }
 0x17f   : > { %v775_v62 = vmax.f32 %v700_v58, 0.0  ;;  %1938 = vmatpush1.bf16.msra.mxu0 %v5811_v20  ;;  %v4816_v53 = vld [vmem:[%s6413_s1 + $0x94] ss:$12 sps:$4 sm:$0xff]   ;;  %v4814_v55 = vld [vmem:[%s6413_s1 + $0x90] ss:$12 sps:$4 sm:$0xff]  }
 0x180   : > { %v783_v63 = vpack.c.bf16 %v774_v60, %v771_v59  ;;  %1939 = vmatprep.subr.bf16.mxu0 %v5814_v22  ;;  %v5908_v54 = vld [vmem:[#allocation4 + $0x90] ss:$8 sps:$4 sm:$0xff]   ;;  %v4819_v56 = vld [vmem:[%s6413_s1 + $0xac] ss:$12 sps:$4 sm:$0xff]   ;;  %v4822_v60 = vld [vmem:[%s6413_s1 + $0xc4] ss:$12 sps:$4 sm:$0xff]  }
 0x181   : > { %v784_v13 = vpack.c.bf16 %v775_v62, %v772_v61  ;;  %v5920_v57 = vld [vmem:[#allocation4 + $0xa0] ss:$8 sps:$4 sm:$0xff]   ;;  %v5923_v58 = vld [vmem:[#allocation4 + $0xb4] ss:$8 sps:$4 sm:$0xff]   ;;  %v4817_v59 = vld [vmem:[%s6413_s1 + $0xa8] ss:$12 sps:$4 sm:$0xff]  }
 0x182   : > { %v5932_v61 = vld [vmem:[#allocation4 + $0xb0] ss:$8 sps:$4 sm:$0xff]   ;;  %v4820_v62 = vld [vmem:[%s6413_s1 + $0xc0] ss:$12 sps:$4 sm:$0xff]  }
 0x183   : > { %1076 = vmatprep.mubr.bf16.mxu1 %v784_v13  ;;  %1940 = vmatpush1.bf16.msra.mxu0 %v5828_v32  ;;  %v4823_v13 = vld [vmem:[%s6413_s1 + $0xd8] ss:$12 sps:$4 sm:$0xff]  }
 0x184   : > { %1077 = vmatmul.mubr.bf16.gmra.mrb[20].mxu1 %v783_v63  ;;  %1941 = vmatprep.subr.bf16.mxu0 %v5832_v33  ;;  %v4825_v63 = vld [vmem:[%s6413_s1 + $0xdc] ss:$12 sps:$4 sm:$0xff]  }
 0x185   : > { %1119 = vmatprep.mubr.bf16.mxu1 %v6418_v14 }
 0x18c   : > { %4084 = vmatmul.mubr.msk.bf16.vlgmr.msra.gmra.mrb[12].mxu1 %vm1014_vm0, %v5710_v49  ;;  %v4780_v49 = vld [vmem:[%s6413_s1 + $0x110] ss:$12 sps:$4 sm:$0xff]  }
 0x18d   : > { %4403 = vmatpush3.bf16.msra.mxu1 %v4772_v48  ;;  %1129 = vmatprep.mubr.bf16.mxu1 %v6418_v14  ;;  %v4828_v48 = vld [vmem:[%s6413_s1 + $0xf4] ss:$12 sps:$4 sm:$0xff]  }
 0x18e   : > { %4404 = vmatprep.subr.bf16.mxu1 %v4773_v52  ;;  %v4826_v52 = vld [vmem:[%s6413_s1 + $0xf0] ss:$12 sps:$4 sm:$0xff]  }
 0x191   : > { %4405 = vmatpush3.bf16.msra.mxu1 %v4774_v16  ;;  %v4831_v16 = vld [vmem:[%s6413_s1 + $0x10c] ss:$12 sps:$4 sm:$0xff]  }
 0x192   : > { %4406 = vmatprep.subr.bf16.mxu1 %v4778_v17  ;;  %v4829_v17 = vld [vmem:[%s6413_s1 + $0x108] ss:$12 sps:$4 sm:$0xff]  }
 0x194   : > { %4085 = vmatmul.mubr.msk.bf16.gmra.mrb[16].mxu1 %vm1014_vm0, %v5719_v2  ;;  %v4787_v2 = vld [vmem:[%s6413_s1 + $0x140] ss:$12 sps:$4 sm:$0xff]  }
 0x195   : > { %4407 = vmatpush3.bf16.msra.mxu1 %v4779_v19  ;;  %1139 = vmatprep.mubr.bf16.mxu1 %v6418_v14  ;;  %v4834_v19 = vld [vmem:[%s6413_s1 + $0x124] ss:$12 sps:$4 sm:$0xff]  }
 0x196   : > { %4408 = vmatprep.subr.bf16.mxu1 %v4780_v49  ;;  %v4832_v49 = vld [vmem:[%s6413_s1 + $0x120] ss:$12 sps:$4 sm:$0xff]  }
 0x199   : > { %4409 = vmatpush3.bf16.msra.mxu1 %v4781_v0  ;;  %v4837_v0 = vld [vmem:[%s6413_s1 + $0x13c] ss:$12 sps:$4 sm:$0xff]  }
 0x19a   : > { %4410 = vmatprep.subr.bf16.mxu1 %v4784_v1  ;;  %v4835_v1 = vld [vmem:[%s6413_s1 + $0x138] ss:$12 sps:$4 sm:$0xff]  }
 0x19c   : > { %4086 = vmatmul.mubr.msk.bf16.gmra.mrb[20].mxu1 %vm1014_vm0, %v785_v42  ;;  %v4810_v42 = vld [vmem:[%s6413_s1 + $0x64] ss:$12 sps:$4 sm:$0xff]  }
 0x19d   : > { %4411 = vmatpush3.bf16.msra.mxu1 %v4786_v21  ;;  %1642 = vmatprep.mubr.bf16.mxu1 %v5680_v24  ;;  %v4793_v24 = vld [vmem:[%s6413_s1 + $0x98] ss:$12 sps:$4 sm:$0xff]   ;;  %v4840_v21 = vld [vmem:[%s6413_s1 + $0x154] ss:$12 sps:$4 sm:$0xff]  }
 0x19e   : > { %4412 = vmatprep.subr.bf16.mxu1 %v4787_v2  ;;  %v4838_v2 = vld [vmem:[%s6413_s1 + $0x150] ss:$12 sps:$4 sm:$0xff]  }
 0x1a1   : > { %4413 = vmatpush3.bf16.msra.mxu1 %v4788_v5  ;;  %v5975_v5 = vld [vmem:[#allocation4 + $0xc4] ss:$8 sps:$4 sm:$0xff]  }
 0x1a2   : > { %4414 = vmatprep.subr.bf16.mxu1 %v4791_v7  ;;  %v4843_v7 = vld [vmem:[%s6413_s1 + $0x16c] ss:$12 sps:$4 sm:$0xff]  }
 0x1a5   : > { %4415 = vmatpush3.bf16.msra.mxu1 %v4793_v24  ;;  %v5980_v24 = vld [vmem:[#allocation4 + $0xc0] ss:$8 sps:$4 sm:$0xff]  }
 0x1a6   : > { %4416 = vmatprep.subr.bf16.mxu1 %v4794_v10  ;;  %v4841_v10 = vld [vmem:[%s6413_s1 + $0x168] ss:$12 sps:$4 sm:$0xff]  }
 0x1a9   : > { %4417 = vmatpush3.bf16.msra.mxu1 %v4795_v15  ;;  %v5987_v15 = vld [vmem:[#allocation4 + $0xd4] ss:$8 sps:$4 sm:$0xff]  }
 0x1aa   : > { %2454 = vmatprep.subr.bf16.mxu1 %v5808_v18 }
 0x1ac   : > { %1643 = vmatmul.mubr.bf16.vlgmr.msra.gmra.mrb[24].mxu1 %v5677_v23  ;;  %v5848_v23 = vld [vmem:[#allocation4 + $0x50] ss:$8 sps:$4 sm:$0xff]  }
 0x1ad   : > { %2455 = vmatpush1.bf16.msra.mxu1 %v5819_v29  ;;  %1650 = vmatprep.mubr.bf16.mxu1 %v5685_v25  ;;  %v5857_v25 = vld [vmem:[%s6413_s1 + $0x30] ss:$12 sps:$4 sm:$0xff]  }
 0x1ae   : > { %2456 = vmatprep.subr.bf16.mxu1 %v5825_v30  ;;  %6428 = vst [vmem:[#allocation11_spill] sm:$0xff] %v5857_v25  ;;  %1942 = vmatpush1.bf16.msra.mxu0 %v5848_v23 }
 0x1af   : > { %1943 = vmatprep.subr.bf16.mxu0 %v5851_v37 }
 0x1b1   : > { %2457 = vmatpush1.bf16.msra.mxu1 %v5838_v35 }
 0x1b2   : > { %2458 = vmatprep.subr.bf16.mxu1 %v5845_v36  ;;  %1944 = vmatpush1.bf16.msra.mxu0 %v5864_v39  ;;  %v4859_v36 = vld [vmem:[%s6413_s1 + $0x68] ss:$12 sps:$4 sm:$0xff]  }
 0x1b3   : > { %1945 = vmatprep.subr.bf16.mxu0 %v5868_v40 }
 0x1b4   : > { %1651 = vmatmul.mubr.bf16.gmra.mrb[28].mxu1 %v5689_v26  ;;  %v5879_v26 = vld [vmem:[#allocation4 + $0x70] ss:$8 sps:$4 sm:$0xff]  }
 0x1b5   : > { %2459 = vmatpush1.bf16.msra.mxu1 %v5857_v25  ;;  %1658 = vmatprep.mubr.bf16.mxu1 %v5693_v27  ;;  %v4813_v27 = vld [vmem:[%s6413_s1 + $0x7c] ss:$12 sps:$4 sm:$0xff]  }
 0x1b6   : > { %2460 = vmatprep.subr.bf16.mxu1 %v4807_v38  ;;  %1946 = vmatpush1.bf16.msra.mxu0 %v5879_v26  ;;  %v4847_v38 = vld [vmem:[%s6413_s1 + $0xc8] ss:$12 sps:$4 sm:$0xff]  }
 0x1b7   : > { %1947 = vmatprep.subr.bf16.mxu0 %v5882_v43 }
 0x1b9   : > { %2461 = vmatpush1.bf16.msra.mxu1 %v4805_v34  ;;  %v5992_v34 = vld [vmem:[#allocation4 + $0xd0] ss:$8 sps:$4 sm:$0xff]  }
 0x1ba   : > { %2462 = vmatprep.subr.bf16.mxu1 %v4810_v42  ;;  %1948 = vmatpush1.bf16.msra.mxu0 %v5894_v47  ;;  %v5995_v42 = vld [vmem:[%s5499_s24 + $0x60] ss:$8 sps:$4 sm:$0xff]  }
 0x1bb   : > { %1949 = vmatprep.subr.bf16.mxu0 %v5898_v50 }
 0x1bc   : > { %1659 = vmatmul.mubr.bf16.gmra.mrb[32].mxu1 %v5696_v28  ;;  %v5911_v28 = vld [vmem:[#allocation4 + $0xa4] ss:$8 sps:$4 sm:$0xff]  }
 0x1bd   : > { %2463 = vmatpush1.bf16.msra.mxu1 %v4808_v45  ;;  %2486 = vmatprep.mubr.bf16.mxu1 %v5888_v46  ;;  %v4848_v45 = vld [vmem:[%s6413_s1 + $0x8] ss:$12 sps:$4 sm:$0xff]  }
 0x1be   : > { %2464 = vmatprep.subr.bf16.mxu1 %v4813_v27  ;;  %1950 = vmatpush1.bf16.msra.mxu0 %v5908_v54  ;;  %v6002_v27 = vld [vmem:[%s5499_s24 + $0x74] ss:$8 sps:$4 sm:$0xff]  }
 0x1bf   : > { %1951 = vmatprep.subr.bf16.mxu0 %v5911_v28 }
 0x1c1   : > { %2465 = vmatpush1.bf16.msra.mxu1 %v4811_v51  ;;  %v1581_v51 = vpop.f32.mrb[12].mxu0 }
 0x1c2   : > { %2466 = vmatprep.subr.bf16.mxu1 %v4816_v53  ;;  %1952 = vmatpush1.bf16.msra.mxu0 %v5920_v57  ;;  %v6005_v53 = vld [vmem:[#allocation2] sm:$0x7] }
 0x1c3   : > { %1953 = vmatprep.subr.bf16.mxu0 %v5923_v58 }
 0x1c5   : > { %2467 = vmatpush1.bf16.msra.mxu1 %v4814_v55  ;;  %v1583_v55 = vpop.f32.mrb[13].mxu0 }
 0x1c6   : > { %2468 = vmatprep.subr.bf16.mxu1 %v4819_v56  ;;  %1954 = vmatpush1.bf16.msra.mxu0 %v5932_v61  ;;  %v6007_v56 = vld [vmem:[#allocation4 + $0xe4] ss:$8 sps:$4 sm:$0xff]  }
 0x1c7   : > { %1955 = vmatprep.subr.bf16.mxu0 %v5975_v5 }
 0x1c9   : > { %2469 = vmatpush1.bf16.msra.mxu1 %v4817_v59  ;;  %v4849_v59 = vld [vmem:[%s6413_s1 + $0xe0] ss:$12 sps:$4 sm:$0xff]  }
 0x1ca   : > { %2470 = vmatprep.subr.bf16.mxu1 %v4822_v60  ;;  %1956 = vmatpush1.bf16.msra.mxu0 %v5980_v24  ;;  %v6014_v60 = vrot.slane %v6005_v53, %v5705_v44 }
 0x1cb   : > { %1957 = vmatprep.subr.bf16.mxu0 %v5987_v15 }
 0x1cd   : > { %2471 = vmatpush1.bf16.msra.mxu1 %v4820_v62  ;;  %v1585_v62 = vpop.f32.mrb[14].mxu0 }
 0x1ce   : > { %2472 = vmatprep.subr.bf16.mxu1 %v4825_v63  ;;  %1958 = vmatpush1.bf16.msra.mxu0 %v5992_v34  ;;  %v6016_v63 = vld [vmem:[#allocation4 + $0xe0] ss:$8 sps:$4 sm:$0xff]  }
 0x1cf   : > { %1959 = vmatprep.subr.bf16.mxu0 %v6007_v56 }
 0x1d1   : > { %2473 = vmatpush1.bf16.msra.mxu1 %v4823_v13  ;;  %v6020_v13 = vrot.slane %v6005_v53, %v5703_v41 }
 0x1d2   : > { %2474 = vmatprep.subr.bf16.mxu1 %v4828_v48  ;;  %v1587_v48 = vpop.f32.mrb[15].mxu0  ;;  %1960 = vmatpush1.bf16.msra.mxu0 %v6016_v63 }
 0x1d5   : > { %2475 = vmatpush1.bf16.msra.mxu1 %v4826_v52  ;;  %v1584_v52 = vadd.f32 %v1583_v55, %v6014_v60  ;;  %v1591_v55 = vpop.f32.mrb[16].mxu0 }
 0x1d6   : > { %2476 = vmatprep.subr.bf16.mxu1 %v4831_v16  ;;  %v1588_v16 = vadd.f32 %v1587_v48, %v6014_v60 }
 0x1d9   : > { %2477 = vmatpush1.bf16.msra.mxu1 %v4829_v17  ;;  %v4850_v17 = vld [vmem:[%s6413_s1 + $0x20] ss:$12 sps:$4 sm:$0xff]  }
 0x1da   : > { %2478 = vmatprep.subr.bf16.mxu1 %v4834_v19  ;;  %v1582_v19 = vadd.f32 %v1581_v51, %v6020_v13 }
 0x1dd   : > { %2479 = vmatpush1.bf16.msra.mxu1 %v4832_v49  ;;  %v1586_v49 = vadd.f32 %v1585_v62, %v6020_v13  ;;  %v6049_v62 = vld [vmem:[%s5499_s24 + $0x84] ss:$8 sps:$4 sm:$0xff]  }
 0x1de   : > { %2480 = vmatprep.subr.bf16.mxu1 %v4837_v0  ;;  %v6033_v0 = vld [vmem:[#allocation4 + $0xf4] ss:$8 sps:$4 sm:$0xff]  }
 0x1df   : > { %1961 = vmatprep.subr.bf16.mxu0 %v6033_v0 }
 0x1e1   : > { %2481 = vmatpush1.bf16.msra.mxu1 %v4835_v1  ;;  %v4851_v1 = vld [vmem:[%s6413_s1 + $0xf8] ss:$12 sps:$4 sm:$0xff]  }
 0x1e2   : > { %2482 = vmatprep.subr.bf16.mxu1 %v4840_v21  ;;  %v1668_v21 = vmax.f32 %v1584_v52, 0.0  ;;  %v1593_v52 = vpop.f32.mrb[17].mxu0 }
 0x1e5   : > { %2483 = vmatpush1.bf16.msra.mxu1 %v4838_v2  ;;  %v1671_v2 = vmax.f32 %v1588_v16, 0.0  ;;  %v4856_v16 = vld [vmem:[%s6413_s1 + $0x110] ss:$12 sps:$4 sm:$0xff]  }
 0x1e6   : > { %2484 = vmatprep.subr.bf16.mxu1 %v4843_v7  ;;  %v6038_v7 = vld [vmem:[#allocation4 + $0xf0] ss:$8 sps:$4 sm:$0xff]  }
 0x1e7   : > { %v1686_v51 = vpack.c.bf16 %v1671_v2, %v1668_v21  ;;  %1962 = vmatpush1.bf16.msra.mxu0 %v6038_v7  ;;  %v1592_v2 = vadd.f32 %v1591_v55, %v6020_v13 }
 0x1e9   : > { %2485 = vmatpush1.bf16.msra.mxu1 %v4841_v10  ;;  %v1667_v10 = vmax.f32 %v1582_v19, 0.0  ;;  %v1595_v19 = vpop.f32.mrb[18].mxu0  ;;  %1963 = vmatprep.mubr.bf16.mxu0 %v1686_v51 }
 0x1ea   : > { %4436 = vmatprep.subr.bf16.mxu1 %v4847_v38  ;;  %v1670_v38 = vmax.f32 %v1586_v49, 0.0  ;;  %v1597_v49 = vpop.f32.mrb[19].mxu0 }
 0x1eb   : > { %v1598_v21 = vadd.f32 %v1597_v49, %v6014_v60  ;;  %v1601_v25 = vpop.f32.mrb[20].mxu0 }
 0x1ec   : > { %2487 = vmatmul.mubr.bf16.vlgmr.msra.gmra.mrb[36].mxu1 %v5995_v42  ;;  %v1685_v48 = vpack.c.bf16 %v1670_v38, %v1667_v10  ;;  %v1596_v10 = vadd.f32 %v1595_v19, %v6020_v13  ;;  %v4858_v38 = vld [vmem:[%s6413_s1 + $0x128] ss:$12 sps:$4 sm:$0xff]   ;;  %v1603_v35 = vpop.f32.mrb[21].mxu0 }
 0x1ed   : > { %4437 = vmatpush3.bf16.msra.mxu1 %v4848_v45  ;;  %2496 = vmatprep.mubr.bf16.mxu1 %v6002_v27  ;;  %v6042_v45 = vld [vmem:[%s5499_s24 + $0x70] ss:$8 sps:$4 sm:$0xff]   ;;  %v1605_v19 = vpop.f32.mrb[22].mxu0 }
 0x1ee   : > { %4438 = vmatprep.subr.bf16.mxu1 %v4849_v59  ;;  %v4852_v59 = vld [vmem:[%s6413_s1 + $0x38] ss:$12 sps:$4 sm:$0xff]   ;;  %1964 = vmatmul.mubr.bf16.vlgmr.msra.gmra.mrb[24].mxu0 %v1685_v48  ;;  %v1677_v48 = vmax.f32 %v1598_v21, 0.0  ;;  %v1676_v49 = vmax.f32 %v1596_v10, 0.0  ;;  %v1604_v21 = vadd.f32 %v1603_v35, %v6014_v60  ;;  %v1602_v10 = vadd.f32 %v1601_v25, %v6020_v13  ;;  %v4867_v25 = vld [vmem:[%s6413_s1 + $0x170] ss:$12 sps:$4 sm:$0xff]  }
 0x1f1   : > { %4439 = vmatpush3.bf16.msra.mxu1 %v4850_v17  ;;  %v1594_v17 = vadd.f32 %v1593_v52, %v6014_v60  ;;  %v1673_v52 = vmax.f32 %v1592_v2, 0.0  ;;  %v4864_v2 = vld [vmem:[%s6413_s1 + $0x80] ss:$12 sps:$4 sm:$0xff]  }
 0x1f2   : > { %4440 = vmatprep.subr.bf16.mxu1 %v4851_v1  ;;  %v4857_v1 = vld [vmem:[%s6413_s1 + $0x50] ss:$12 sps:$4 sm:$0xff]  }
 0x1f3   : > { %v1674_v51 = vmax.f32 %v1594_v17, 0.0  ;;  %v1688_v55 = vpack.c.bf16 %v1676_v49, %v1673_v52  ;;  %v1607_v17 = vpop.f32.mrb[23].mxu0  ;;  %v4866_v52 = vld [vmem:[%s6413_s1 + $0x98] ss:$12 sps:$4 sm:$0xff]   ;;  %v4919_v49 = vld [vmem:[#allocation4 + $0x104] ss:$8 sps:$4 sm:$0xff]  }
 0x1f4   : > { %2497 = vmatmul.mubr.bf16.gmra.mrb[40].mxu1 %v6042_v45  ;;  %1994 = vmatprep.subr.bf16.mxu0 %v4919_v49 }
 0x1f5   : > { %4441 = vmatpush3.bf16.msra.mxu1 %v4852_v59  ;;  %2506 = vmatprep.mubr.bf16.mxu1 %v6049_v62  ;;  %v4862_v59 = vld [vmem:[%s5499_s24 + $0x80] ss:$8 sps:$4 sm:$0xff]   ;;  %v1689_v14 = vpack.c.bf16 %v1677_v48, %v1674_v51  ;;  %v1680_v51 = vmax.f32 %v1604_v21, 0.0  ;;  %v1679_v48 = vmax.f32 %v1602_v10, 0.0 }
 0x1f6   : > { %4442 = vmatprep.subr.bf16.mxu1 %v4856_v16  ;;  %v4863_v16 = vld [vmem:[%s6413_s1 + $0x140] ss:$12 sps:$4 sm:$0xff]  }
 0x1f7   : > { %1973 = vmatprep.mubr.bf16.mxu0 %v1689_v14  ;;  %v4865_v14 = vld [vmem:[%s6413_s1 + $0x158] ss:$12 sps:$4 sm:$0xff]  }
 0x1f8   : > { %1974 = vmatmul.mubr.bf16.gmra.mrb[28].mxu0 %v1688_v55  ;;  %v6429_v55 = vmov 0  }
 0x1f9   : > { %4443 = vmatpush3.bf16.msra.mxu1 %v4857_v1  ;;  %v1608_v1 = vadd.f32 %v1607_v17, %v6014_v60  ;;  %v6099_v17 = vld [vmem:[#allocation4 + $0x110] ss:$8 sps:$4 sm:$0xff]  }
 0x1fa   : > { %4444 = vmatprep.subr.bf16.mxu1 %v4858_v38  ;;  %v1606_v38 = vadd.f32 %v1605_v19, %v6020_v13  ;;  %v6090_v13 = vld [vmem:[#allocation4 + $0x100] ss:$8 sps:$4 sm:$0xff]   ;;  %v6097_v19 = vld [vmem:[#allocation4 + $0x114] ss:$8 sps:$4 sm:$0xff]  }
 0x1fb   : > { %v1683_v35 = vmax.f32 %v1608_v1, 0.0  ;;  %1995 = vmatpush1.bf16.msra.mxu0 %v6090_v13 }
 0x1fc   : > { %2507 = vmatmul.mubr.bf16.gmra.mrb[44].mxu1 %v4862_v59  ;;  %v1682_v60 = vmax.f32 %v1606_v38, 0.0  ;;  %1996 = vmatprep.subr.bf16.mxu0 %v6097_v19 }
 0x1fd   : > { %4445 = vmatpush3.bf16.msra.mxu1 %v4859_v36  ;;  %2549 = vmatprep.mubr.bf16.mxu1 %v5888_v46  ;;  %v1692_v36 = vpack.c.bf16 %v1683_v35, %v1680_v51 }
 0x1fe   : > { %4446 = vmatprep.subr.bf16.mxu1 %v4863_v16  ;;  %v1691_v46 = vpack.c.bf16 %v1682_v60, %v1679_v48  ;;  %v4868_v16 = vld [vmem:[%s6413_s1 + $0xb0] ss:$12 sps:$4 sm:$0xff]  }
 0x1ff   : > { %1983 = vmatprep.mubr.bf16.mxu0 %v1692_v36  ;;  %1997 = vmatpush1.bf16.msra.mxu0 %v6099_v17 }
 0x200   : > { %1984 = vmatmul.mubr.bf16.gmra.mrb[32].mxu0 %v1691_v46  ;;  %3361 = vmatprep.subr.bf16.mxu0 %v5808_v18 }
 0x201   : > { %4447 = vmatpush3.bf16.msra.mxu1 %v4864_v2  ;;  %2026 = vmatprep.mubr.bf16.mxu0 %v6429_v55  ;;  %v1257_v2 = vrot.slane %v6005_v53, %v5700_v31 }
 0x202   : > { %4448 = vmatprep.subr.bf16.mxu1 %v4865_v14 }
 0x205   : > { %4449 = vmatpush3.bf16.msra.mxu1 %v4866_v52 }
 0x206   : > { %4450 = vmatprep.subr.bf16.mxu1 %v4867_v25 }
 0x209   : > { %4451 = vmatpush3.bf16.msra.mxu1 %v4868_v16 }
 0x20a   : > { %2838 = vmatprep.subr.bf16.mxu1 %v5772_v4 }
 0x20c   : > { %2550 = vmatmul.mubr.bf16.vlgmr.msra.gmra.mrb[48].mxu1 %v5995_v42 }
 0x20d   : > { %2557 = vmatprep.mubr.bf16.mxu1 %v6002_v27  ;;  %2839 = vmatpush1.bf16.msra.mxu1 %v5770_v3  ;;  %v822_v3 = vld [vmem:[#allocation6] sm:$0x3] }
 0x20e   : > { %2840 = vmatprep.subr.bf16.mxu1 %v5778_v6  ;;  %v827_v4 = vrot.slane %v822_v3, %v5703_v41  ;;  %v831_v6 = vrot.slane %v822_v3, %v5705_v44 }
 0x211   : > { %2841 = vmatpush1.bf16.msra.mxu1 %v5785_v8 }
 0x212   : > { %2842 = vmatprep.subr.bf16.mxu1 %v5788_v9 }
 0x214   : > { %2558 = vmatmul.mubr.bf16.gmra.mrb[52].mxu1 %v6042_v45 }
 0x215   : > { %2565 = vmatprep.mubr.bf16.mxu1 %v6049_v62  ;;  %2843 = vmatpush1.bf16.msra.mxu1 %v5797_v11 }
 0x216   : > { %2844 = vmatprep.subr.bf16.mxu1 %v5800_v12 }
 0x219   : > { %2845 = vmatpush1.bf16.msra.mxu1 %v5811_v20 }
 0x21a   : > { %2846 = vmatprep.subr.bf16.mxu1 %v5814_v22 }
 0x21c   : > { %2566 = vmatmul.mubr.bf16.gmra.mrb[56].mxu1 %v4862_v59 }
 0x21d   : > { %2847 = vmatpush1.bf16.msra.mxu1 %v5828_v32 }
 0x21e   : > { %2848 = vmatprep.subr.bf16.mxu1 %v5832_v33 }
 0x221   : > { %2849 = vmatpush1.bf16.msra.mxu1 %v5848_v23 }
 0x222   : > { %2850 = vmatprep.subr.bf16.mxu1 %v5851_v37 }
 0x225   : > { %2851 = vmatpush1.bf16.msra.mxu1 %v5864_v39 }
 0x226   : > { %2852 = vmatprep.subr.bf16.mxu1 %v5868_v40 }
 0x229   : > { %2853 = vmatpush1.bf16.msra.mxu1 %v5879_v26 }
 0x22a   : > { %2854 = vmatprep.subr.bf16.mxu1 %v5882_v43 }
 0x22d   : > { %2855 = vmatpush1.bf16.msra.mxu1 %v5894_v47 }
 0x22e   : > { %2856 = vmatprep.subr.bf16.mxu1 %v5898_v50 }
 0x231   : > { %2857 = vmatpush1.bf16.msra.mxu1 %v5908_v54 }
 0x232   : > { %2858 = vmatprep.subr.bf16.mxu1 %v5911_v28 }
 0x235   : > { %2859 = vmatpush1.bf16.msra.mxu1 %v5920_v57 }
 0x236   : > { %2860 = vmatprep.subr.bf16.mxu1 %v5923_v58 }
 0x239   : > { %2861 = vmatpush1.bf16.msra.mxu1 %v5932_v61 }
 0x23a   : > { %2862 = vmatprep.subr.bf16.mxu1 %v5975_v5 }
 0x23d   : > { %2863 = vmatpush1.bf16.msra.mxu1 %v5980_v24 }
 0x23e   : > { %2864 = vmatprep.subr.bf16.mxu1 %v5987_v15 }
 0x241   : > { %2865 = vmatpush1.bf16.msra.mxu1 %v5992_v34 }
 0x242   : > { %2866 = vmatprep.subr.bf16.mxu1 %v6007_v56 }
 0x245   : > { %2867 = vmatpush1.bf16.msra.mxu1 %v6016_v63 }
 0x246   : > { %2868 = vmatprep.subr.bf16.mxu1 %v6033_v0 }
 0x249   : > { %2869 = vmatpush1.bf16.msra.mxu1 %v6038_v7 }
 0x24a   : > { %2901 = vmatprep.subr.bf16.mxu1 %v4919_v49 }
 0x25f   : > { %v1121_v8 = vpop.f32.mrb[12].mxu1 }
 0x260   : > { %v4504_v9 = vadd.f32 %v1121_v8, %v827_v4  ;;  %v1123_v11 = vpop.f32.mrb[13].mxu1 }
 0x261   : > { %v4505_v12 = vadd.f32 %v1123_v11, %v831_v6  ;;  %v1125_v18 = vpop.f32.mrb[14].mxu1 }
 0x262   : > { %5041 = vtanh.f32 %v4504_v9  ;;  %v4506_v20 = vadd.f32 %v1125_v18, %v827_v4  ;;  %v1127_v22 = vpop.f32.mrb[15].mxu1 }
 0x263   : > { %5043 = vtanh.f32 %v4505_v12  ;;  %v4507_v32 = vadd.f32 %v1127_v22, %v831_v6 }
 0x264   : > { %5045 = vtanh.f32 %v4506_v20  ;;  %v6430_v20 = vld [vmem:[#allocation9_spill] sm:$0xff] }
 0x265   : > { %5047 = vtanh.f32 %v4507_v32 }
 0x267   : > { %v1131_v33 = vpop.f32.mrb[16].mxu1 }
 0x268   : > { %v4508_v23 = vadd.f32 %v1131_v33, %v827_v4  ;;  %v1133_v37 = vpop.f32.mrb[17].mxu1 }
 0x269   : > { %v4509_v39 = vadd.f32 %v1133_v37, %v831_v6  ;;  %v1135_v40 = vpop.f32.mrb[18].mxu1  ;;  %v4925_v37 = vld [vmem:[%s6413_s1 + $0x4c] ss:$12 sps:$4 sm:$0xff]  }
 0x26a   : > { %5049 = vtanh.f32 %v4508_v23  ;;  %v4510_v26 = vadd.f32 %v1135_v40, %v827_v4  ;;  %v1137_v43 = vpop.f32.mrb[19].mxu1  ;;  %v6431_v23 = vld [vmem:[#allocation10_spill] sm:$0xff] }
 0x26b   : > { %5051 = vtanh.f32 %v4509_v39  ;;  %v4511_v47 = vadd.f32 %v1137_v43, %v831_v6 }
 0x26c   : > { %v5042_v50 = vpop.eup %5041  ;;  %5053 = vtanh.f32 %v4510_v26  ;;  %v4923_v26 = vld [vmem:[%s6413_s1 + $0x48] ss:$12 sps:$4 sm:$0xff]  }
 0x26d   : > { %v5044_v54 = vpop.eup %5043  ;;  %1162 = vst [vmem:[%s6146_s20] sm:$0xff] %v5042_v50  ;;  %5055 = vtanh.f32 %v4511_v47  ;;  %v4928_v50 = vld [vmem:[%s6413_s1 + $0x64] ss:$12 sps:$4 sm:$0xff]  }
 0x26e   : > { %v5046_v28 = vpop.eup %5045  ;;  %1163 = vst [vmem:[%s6146_s20 + $0x8] sm:$0xff] %v5044_v54 }
 0x26f   : > { %v5048_v57 = vpop.eup %5047  ;;  %1164 = vst [vmem:[%s6146_s20 + $0x10] sm:$0xff] %v5046_v28  ;;  %v1141_v58 = vpop.f32.mrb[20].mxu1  ;;  %v4926_v28 = vld [vmem:[%s6413_s1 + $0x60] ss:$12 sps:$4 sm:$0xff]  }
 0x270   : > { %1165 = vst [vmem:[%s6146_s20 + $0x18] sm:$0xff] %v5048_v57  ;;  %v4512_v61 = vadd.f32 %v1141_v58, %v827_v4  ;;  %v1143_v5 = vpop.f32.mrb[21].mxu1  ;;  %v6184_v57 = vld [vmem:[%s5499_s24 + $0x94] ss:$8 sps:$4 sm:$0xff]  }
 0x271   : > { %v4513_v24 = vadd.f32 %v1143_v5, %v831_v6  ;;  %v1145_v15 = vpop.f32.mrb[22].mxu1  ;;  %v4929_v5 = vld [vmem:[%s6413_s1 + $0x78] ss:$12 sps:$4 sm:$0xff]  }
 0x272   : > { %5057 = vtanh.f32 %v4512_v61  ;;  %v4514_v34 = vadd.f32 %v1145_v15, %v827_v4  ;;  %v1147_v42 = vpop.f32.mrb[23].mxu1  ;;  %v4931_v61 = vld [vmem:[%s6413_s1 + $0x7c] ss:$12 sps:$4 sm:$0xff]  }
 0x273   : > { %5059 = vtanh.f32 %v4513_v24  ;;  %v4515_v27 = vadd.f32 %v1147_v42, %v831_v6  ;;  %v4934_v24 = vld [vmem:[%s6413_s1 + $0x94] ss:$12 sps:$4 sm:$0xff]   ;;  %v4932_v15 = vld [vmem:[%s6413_s1 + $0x90] ss:$12 sps:$4 sm:$0xff]  }
 0x274   : > { %v5050_v56 = vpop.eup %5049  ;;  %5061 = vtanh.f32 %v4514_v34  ;;  %v4937_v34 = vld [vmem:[%s6413_s1 + $0xac] ss:$12 sps:$4 sm:$0xff]   ;;  %v4935_v42 = vld [vmem:[%s6413_s1 + $0xa8] ss:$12 sps:$4 sm:$0xff]  }
 0x275   : > { %v5052_v63 = vpop.eup %5051  ;;  %1166 = vst [vmem:[%s6146_s20 + $0x20] sm:$0xff] %v5050_v56  ;;  %5063 = vtanh.f32 %v4515_v27  ;;  %v4940_v27 = vld [vmem:[%s6413_s1 + $0xc4] ss:$12 sps:$4 sm:$0xff]   ;;  %v4938_v56 = vld [vmem:[%s6413_s1 + $0xc0] ss:$12 sps:$4 sm:$0xff]  }
 0x276   : > { %v5054_v0 = vpop.eup %5053  ;;  %1167 = vst [vmem:[%s6146_s20 + $0x28] sm:$0xff] %v5052_v63  ;;  %v4943_v63 = vld [vmem:[%s6413_s1 + $0xdc] ss:$12 sps:$4 sm:$0xff]  }
 0x277   : > { %v5056_v7 = vpop.eup %5055  ;;  %1168 = vst [vmem:[%s6146_s20 + $0x30] sm:$0xff] %v5054_v0  ;;  %v4941_v0 = vld [vmem:[%s6413_s1 + $0xd8] ss:$12 sps:$4 sm:$0xff]  }
 0x278   : > { %1169 = vst [vmem:[%s6146_s20 + $0x38] sm:$0xff] %v5056_v7  ;;  %v4946_v7 = vld [vmem:[%s6413_s1 + $0xf4] ss:$12 sps:$4 sm:$0xff]  }
 0x27c   : > { %v5058_v45 = vpop.eup %5057 }
 0x27d   : > { %v5060_v62 = vpop.eup %5059  ;;  %1170 = vst [vmem:[%s6146_s20 + $0x40] sm:$0xff] %v5058_v45  ;;  %v4944_v45 = vld [vmem:[%s6413_s1 + $0xf0] ss:$12 sps:$4 sm:$0xff]  }
 0x27e   : > { %v5062_v59 = vpop.eup %5061  ;;  %1171 = vst [vmem:[%s6146_s20 + $0x48] sm:$0xff] %v5060_v62  ;;  %v4949_v62 = vld [vmem:[%s6413_s1 + $0x10c] ss:$12 sps:$4 sm:$0xff]  }
 0x27f   : > { %v5064_v21 = vpop.eup %5063  ;;  %1172 = vst [vmem:[%s6146_s20 + $0x50] sm:$0xff] %v5062_v59  ;;  %v4418_v1 = vpop.f32.mrb[24].mxu1  ;;  %v4947_v59 = vld [vmem:[%s6413_s1 + $0x108] ss:$12 sps:$4 sm:$0xff]  }
 0x280   : > { %1173 = vst [vmem:[%s6146_s20 + $0x58] sm:$0xff] %v5064_v21  ;;  %v4419_v10 = vpop.f32.mrb[25].mxu1  ;;  %v4952_v21 = vld [vmem:[%s6413_s1 + $0x124] ss:$12 sps:$4 sm:$0xff]  }
 0x281   : > { %v4420_v38 = vadd.f32 %v4419_v10, %v4418_v1  ;;  %v4421_v14 = vpop.f32.mrb[26].mxu1  ;;  %v4950_v1 = vld [vmem:[%s6413_s1 + $0x120] ss:$12 sps:$4 sm:$0xff]   ;;  %v4955_v10 = vld [vmem:[%s6413_s1 + $0x13c] ss:$12 sps:$4 sm:$0xff]  }
 0x282   : > { %v4422_v51 = vpop.f32.mrb[27].mxu1 }
 0x283   : > { %v1645_v35 = vadd.f32 %v4420_v38, %v1257_v2  ;;  %v4423_v48 = vadd.f32 %v4422_v51, %v4421_v14  ;;  %v4953_v14 = vld [vmem:[%s6413_s1 + $0x138] ss:$12 sps:$4 sm:$0xff]  }
 0x285   : > { %v1648_v60 = vadd.f32 %v4423_v48, %v1257_v2  ;;  %v1669_v36 = vmax.f32 %v1645_v35, 0.0  ;;  %v4958_v35 = vld [vmem:[%s6413_s1 + $0x154] ss:$12 sps:$4 sm:$0xff]  }
 0x287   : > { %v1672_v52 = vmax.f32 %v1648_v60, 0.0  ;;  %v4424_v46 = vpop.f32.mrb[28].mxu1 }
 0x288   : > { %v4425_v49 = vpop.f32.mrb[29].mxu1 }
 0x289   : > { %v1687_v25 = vpack.c.bf16 %v1672_v52, %v1669_v36  ;;  %v4426_v16 = vadd.f32 %v4425_v49, %v4424_v46  ;;  %v4427_v3 = vpop.f32.mrb[30].mxu1  ;;  %v4956_v52 = vld [vmem:[%s6413_s1 + $0x150] ss:$12 sps:$4 sm:$0xff]  }
 0x28a   : > { %v4428_v4 = vpop.f32.mrb[31].mxu1 }
 0x28b   : > { %4177 = vmatmul.mubr.msk.bf16.vlgmr.msra.gmra.mrb[24].mxu0 %vm1014_vm0, %v1687_v25  ;;  %v1653_v6 = vadd.f32 %v4426_v16, %v1257_v2  ;;  %v4429_v53 = vadd.f32 %v4428_v4, %v4427_v3  ;;  %v4962_v25 = vld [vmem:[%s6413_s1 + $0x16c] ss:$12 sps:$4 sm:$0xff]  }
 0x28c   : > { %2036 = vmatprep.mubr.bf16.mxu0 %v6429_v55  ;;  %3362 = vmatpush1.bf16.msra.mxu0 %v5819_v29 }
 0x28d   : > { %v1675_v8 = vmax.f32 %v1653_v6, 0.0  ;;  %v1656_v9 = vadd.f32 %v4429_v53, %v1257_v2  ;;  %3363 = vmatprep.subr.bf16.mxu0 %v5825_v30  ;;  %v6432_v30 = vld [vmem:[#allocation11_spill] sm:$0xff] }
 0x28f   : > { %v1678_v11 = vmax.f32 %v1656_v9, 0.0  ;;  %v4430_v12 = vpop.f32.mrb[32].mxu1 }
 0x290   : > { %v4431_v18 = vpop.f32.mrb[33].mxu1  ;;  %3364 = vmatpush1.bf16.msra.mxu0 %v6430_v20 }
 0x291   : > { %v1690_v22 = vpack.c.bf16 %v1678_v11, %v1675_v8  ;;  %v4432_v32 = vadd.f32 %v4431_v18, %v4430_v12  ;;  %v4433_v33 = vpop.f32.mrb[34].mxu1  ;;  %3365 = vmatprep.subr.bf16.mxu0 %v6431_v23  ;;  %v4960_v8 = vld [vmem:[%s6413_s1 + $0x168] ss:$12 sps:$4 sm:$0xff]   ;;  %v6268_v23 = vld [vmem:[%s5499_s24 + $0xa4] ss:$8 sps:$4 sm:$0xff]  }
 0x292   : > { %v4434_v29 = vpop.f32.mrb[35].mxu1 }
 0x293   : > { %v1661_v39 = vadd.f32 %v4432_v32, %v1257_v2  ;;  %v4435_v40 = vadd.f32 %v4434_v29, %v4433_v33  ;;  %4178 = vmatmul.mubr.msk.bf16.gmra.mrb[28].mxu0 %vm1014_vm0, %v1690_v22  ;;  %v6265_v22 = vld [vmem:[%s5499_s24 + $0x90] ss:$8 sps:$4 sm:$0xff]  }
 0x294   : > { %2046 = vmatprep.mubr.bf16.mxu0 %v6429_v55  ;;  %3366 = vmatpush1.bf16.msra.mxu0 %v6432_v30 }
 0x295   : > { %v1681_v43 = vmax.f32 %v1661_v39, 0.0  ;;  %v1664_v47 = vadd.f32 %v4435_v40, %v1257_v2  ;;  %3367 = vmatprep.subr.bf16.mxu0 %v4925_v37  ;;  %v6236_v2 = vld [vmem:[#allocation2] sm:$0x7] }
 0x296   : > { %v2156_v38 = vrot.slane %v6236_v2, %v5703_v41  ;;  %v6248_v51 = vrot.slane %v6236_v2, %v5705_v44 }
 0x297   : > { %v1684_v54 = vmax.f32 %v1664_v47, 0.0 }
 0x298   : > { %3368 = vmatpush1.bf16.msra.mxu0 %v4923_v26 }
 0x299   : > { %v1693_v58 = vpack.c.bf16 %v1684_v54, %v1681_v43  ;;  %3369 = vmatprep.subr.bf16.mxu0 %v4928_v50  ;;  %v4959_v50 = vld [vmem:[%s6413_s1 + $0xc8] ss:$12 sps:$4 sm:$0xff]  }
 0x29b   : > { %4179 = vmatmul.mubr.msk.bf16.gmra.mrb[32].mxu0 %vm1014_vm0, %v1693_v58 }
 0x29c   : > { %3370 = vmatpush1.bf16.msra.mxu0 %v4926_v28  ;;  %3393 = vmatprep.mubr.bf16.mxu0 %v6184_v57 }
 0x29d   : > { %3371 = vmatprep.subr.bf16.mxu0 %v4931_v61 }
 0x2a0   : > { %3372 = vmatpush1.bf16.msra.mxu0 %v4929_v5  ;;  %v6281_v5 = vld [vmem:[%s5499_s24 + $0xa0] ss:$8 sps:$4 sm:$0xff]  }
 0x2a1   : > { %3373 = vmatprep.subr.bf16.mxu0 %v4934_v24 }
 0x2a4   : > { %3374 = vmatpush1.bf16.msra.mxu0 %v4932_v15  ;;  %v6284_v15 = vld [vmem:[%s5499_s24 + $0xb4] ss:$8 sps:$4 sm:$0xff]  }
 0x2a5   : > { %3375 = vmatprep.subr.bf16.mxu0 %v4937_v34 }
 0x2a8   : > { %3376 = vmatpush1.bf16.msra.mxu0 %v4935_v42 }
 0x2a9   : > { %3377 = vmatprep.subr.bf16.mxu0 %v4940_v27 }
 0x2ac   : > { %3378 = vmatpush1.bf16.msra.mxu0 %v4938_v56 }
 0x2ad   : > { %3379 = vmatprep.subr.bf16.mxu0 %v4943_v63 }
 0x2b0   : > { %3380 = vmatpush1.bf16.msra.mxu0 %v4941_v0 }
 0x2b1   : > { %3381 = vmatprep.subr.bf16.mxu0 %v4946_v7 }
 0x2b4   : > { %3382 = vmatpush1.bf16.msra.mxu0 %v4944_v45 }
 0x2b5   : > { %3383 = vmatprep.subr.bf16.mxu0 %v4949_v62 }
 0x2b8   : > { %3384 = vmatpush1.bf16.msra.mxu0 %v4947_v59  ;;  %v6291_v59 = vld [vmem:[%s5499_s24 + $0xb0] ss:$8 sps:$4 sm:$0xff]  }
 0x2b9   : > { %3385 = vmatprep.subr.bf16.mxu0 %v4952_v21 }
 0x2bc   : > { %3386 = vmatpush1.bf16.msra.mxu0 %v4950_v1  ;;  %v2164_v1 = vrot.slane %v6236_v2, %v5700_v31  ;;  %v4967_v2 = vld [vmem:[%s6413_s1 + $0xe0] ss:$12 sps:$4 sm:$0xff]  }
 0x2bd   : > { %3387 = vmatprep.subr.bf16.mxu0 %v4955_v10 }
 0x2bf   : > { %v2488_v48 = vpop.f32.mrb[36].mxu1 }
 0x2c0   : > { %v2489_v60 = vadd.f32 %v2488_v48, %v2156_v38  ;;  %v2490_v36 = vpop.f32.mrb[37].mxu1  ;;  %3388 = vmatpush1.bf16.msra.mxu0 %v4953_v14 }
 0x2c1   : > { %v2491_v46 = vadd.f32 %v2490_v36, %v6248_v51  ;;  %v2492_v49 = vpop.f32.mrb[38].mxu1  ;;  %3389 = vmatprep.subr.bf16.mxu0 %v4958_v35 }
 0x2c2   : > { %v2574_v16 = vmax.f32 %v2489_v60, 0.0  ;;  %v2493_v3 = vadd.f32 %v2492_v49, %v2156_v38  ;;  %v2494_v4 = vpop.f32.mrb[39].mxu1 }
 0x2c3   : > { %v2495_v6 = vadd.f32 %v2494_v4, %v6248_v51  ;;  %v2575_v9 = vmax.f32 %v2491_v46, 0.0 }
 0x2c4   : > { %v2577_v53 = vmax.f32 %v2493_v3, 0.0  ;;  %3390 = vmatpush1.bf16.msra.mxu0 %v4956_v52 }
 0x2c5   : > { %v2578_v11 = vmax.f32 %v2495_v6, 0.0  ;;  %3391 = vmatprep.subr.bf16.mxu0 %v4962_v25  ;;  %v4963_v25 = vld [vmem:[%s6413_s1 + $0x8] ss:$12 sps:$4 sm:$0xff]  }
 0x2c6   : > { %v2592_v12 = vpack.c.bf16 %v2577_v53, %v2574_v16 }
 0x2c7   : > { %v2593_v18 = vpack.c.bf16 %v2578_v11, %v2575_v9  ;;  %v2498_v20 = vpop.f32.mrb[40].mxu1  ;;  %v4968_v9 = vld [vmem:[%s6413_s1 + $0x20] ss:$12 sps:$4 sm:$0xff]  }
 0x2c8   : > { %v2499_v32 = vadd.f32 %v2498_v20, %v2156_v38  ;;  %v2500_v33 = vpop.f32.mrb[41].mxu1  ;;  %3392 = vmatpush1.bf16.msra.mxu0 %v4960_v8 }
 0x2c9   : > { %2870 = vmatprep.mubr.bf16.mxu1 %v2593_v18  ;;  %v2501_v37 = vadd.f32 %v2500_v33, %v6248_v51  ;;  %v2502_v29 = vpop.f32.mrb[42].mxu1  ;;  %v4969_v18 = vld [vmem:[%s6413_s1 + $0xf8] ss:$12 sps:$4 sm:$0xff]  }
 0x2ca   : > { %2871 = vmatmul.mubr.bf16.vlgmr.msra.gmra.mrb[60].mxu1 %v2592_v12  ;;  %v2580_v39 = vmax.f32 %v2499_v32, 0.0  ;;  %v2503_v40 = vadd.f32 %v2502_v29, %v2156_v38  ;;  %v2504_v30 = vpop.f32.mrb[43].mxu1 }
 0x2cb   : > { %v2581_v26 = vmax.f32 %v2501_v37, 0.0  ;;  %v2505_v43 = vadd.f32 %v2504_v30, %v6248_v51  ;;  %2902 = vmatpush1.bf16.msra.mxu1 %v6090_v13  ;;  %3394 = vmatmul.mubr.bf16.vlgmr.msra.gmra.mrb[36].mxu0 %v6265_v22  ;;  %v4970_v37 = vld [vmem:[%s6413_s1 + $0x38] ss:$12 sps:$4 sm:$0xff]   ;;  %v4973_v30 = vld [vmem:[%s6413_s1 + $0x110] ss:$12 sps:$4 sm:$0xff]  }
 0x2cc   : > { %v2583_v47 = vmax.f32 %v2503_v40, 0.0  ;;  %2903 = vmatprep.subr.bf16.mxu1 %v6097_v19  ;;  %3403 = vmatprep.mubr.bf16.mxu0 %v6268_v23 }
 0x2cd   : > { %v2584_v54 = vmax.f32 %v2505_v43, 0.0 }
 0x2ce   : > { %v2595_v28 = vpack.c.bf16 %v2583_v47, %v2580_v39 }
 0x2cf   : > { %v2596_v58 = vpack.c.bf16 %v2584_v54, %v2581_v26  ;;  %v2508_v61 = vpop.f32.mrb[44].mxu1  ;;  %2904 = vmatpush1.bf16.msra.mxu1 %v6099_v17 }
 0x2d0   : > { %v2509_v13 = vadd.f32 %v2508_v61, %v2156_v38  ;;  %v2510_v24 = vpop.f32.mrb[45].mxu1  ;;  %4470 = vmatprep.subr.bf16.mxu1 %v4959_v50  ;;  %v4975_v50 = vld [vmem:[%s6413_s1 + $0x50] ss:$12 sps:$4 sm:$0xff]  }
 0x2d1   : > { %v2511_v19 = vadd.f32 %v2510_v24, %v6248_v51  ;;  %v2512_v34 = vpop.f32.mrb[46].mxu1  ;;  %2880 = vmatprep.mubr.bf16.mxu1 %v2596_v58  ;;  %v4976_v58 = vld [vmem:[%s6413_s1 + $0x128] ss:$12 sps:$4 sm:$0xff]  }
 0x2d2   : > { %v2586_v42 = vmax.f32 %v2509_v13, 0.0  ;;  %v2513_v27 = vadd.f32 %v2512_v34, %v2156_v38  ;;  %v2514_v56 = vpop.f32.mrb[47].mxu1  ;;  %2881 = vmatmul.mubr.bf16.gmra.mrb[64].mxu1 %v2595_v28  ;;  %v4977_v13 = vld [vmem:[%s6413_s1 + $0x68] ss:$12 sps:$4 sm:$0xff]   ;;  %v4982_v34 = vld [vmem:[%s6413_s1 + $0x80] ss:$12 sps:$4 sm:$0xff]  }
 0x2d3   : > { %v2587_v63 = vmax.f32 %v2511_v19, 0.0  ;;  %v2515_v0 = vadd.f32 %v2514_v56, %v6248_v51  ;;  %3404 = vmatmul.mubr.bf16.gmra.mrb[40].mxu0 %v6281_v5  ;;  %v4980_v19 = vld [vmem:[%s6413_s1 + $0x140] ss:$12 sps:$4 sm:$0xff]   ;;  %v4989_v56 = vld [vmem:[#allocation4 + $0x4] ss:$8 sps:$4 sm:$0xff]  }
 0x2d4   : > { %v2589_v17 = vmax.f32 %v2513_v27, 0.0  ;;  %3413 = vmatprep.mubr.bf16.mxu0 %v6284_v15  ;;  %v4987_v27 = vld [vmem:[#allocation4] ss:$8 sps:$4 sm:$0xff]   ;;  %3745 = vmatprep.subr.bf16.mxu0 %v4989_v56 }
 0x2d5   : > { %v2590_v7 = vmax.f32 %v2515_v0, 0.0  ;;  %v4992_v0 = vld [vmem:[#allocation4 + $0x14] ss:$8 sps:$4 sm:$0xff]   ;;  %3746 = vmatpush1.bf16.msra.mxu0 %v4987_v27 }
 0x2d6   : > { %v2598_v45 = vpack.c.bf16 %v2589_v17, %v2586_v42  ;;  %v4983_v42 = vld [vmem:[%s6413_s1 + $0x158] ss:$12 sps:$4 sm:$0xff]   ;;  %v4985_v17 = vld [vmem:[%s6413_s1 + $0x170] ss:$12 sps:$4 sm:$0xff]   ;;  %3747 = vmatprep.subr.bf16.mxu0 %v4992_v0 }
 0x2d7   : > { %v2599_v62 = vpack.c.bf16 %v2590_v7, %v2587_v63  ;;  %v4984_v63 = vld [vmem:[%s6413_s1 + $0x98] ss:$12 sps:$4 sm:$0xff]   ;;  %v4995_v7 = vld [vmem:[#allocation4 + $0x24] ss:$8 sps:$4 sm:$0xff]  }
 0x2d9   : > { %2890 = vmatprep.mubr.bf16.mxu1 %v2599_v62  ;;  %v4993_v62 = vld [vmem:[#allocation4 + $0x20] ss:$8 sps:$4 sm:$0xff]  }
 0x2da   : > { %2891 = vmatmul.mubr.bf16.gmra.mrb[68].mxu1 %v2598_v45  ;;  %v4986_v45 = vld [vmem:[%s6413_s1 + $0xb0] ss:$12 sps:$4 sm:$0xff]  }
 0x2db   : > { %2933 = vmatprep.mubr.bf16.mxu1 %v6429_v55  ;;  %3414 = vmatmul.mubr.bf16.gmra.mrb[44].mxu0 %v6291_v59 }
 0x2df   : > { %v4452_v21 = vpop.f32.mrb[48].mxu1 }
 0x2e0   : > { %v4453_v10 = vpop.f32.mrb[49].mxu1 }
 0x2e1   : > { %v4454_v38 = vadd.f32 %v4453_v10, %v4452_v21  ;;  %v4455_v14 = vpop.f32.mrb[50].mxu1  ;;  %v4998_v21 = vld [vmem:[#allocation4 + $0x34] ss:$8 sps:$4 sm:$0xff]   ;;  %v5001_v10 = vld [vmem:[#allocation4 + $0x44] ss:$8 sps:$4 sm:$0xff]  }
 0x2e2   : > { %v4456_v51 = vpop.f32.mrb[51].mxu1 }
 0x2e3   : > { %v2552_v35 = vadd.f32 %v4454_v38, %v2164_v1  ;;  %v4457_v48 = vadd.f32 %v4456_v51, %v4455_v14  ;;  %v4999_v38 = vld [vmem:[#allocation4 + $0x40] ss:$8 sps:$4 sm:$0xff]   ;;  %v5004_v14 = vld [vmem:[#allocation4 + $0x54] ss:$8 sps:$4 sm:$0xff]   ;;  %v5002_v51 = vld [vmem:[#allocation4 + $0x50] ss:$8 sps:$4 sm:$0xff]  }
 0x2e5   : > { %v2555_v60 = vadd.f32 %v4457_v48, %v2164_v1  ;;  %v2576_v36 = vmax.f32 %v2552_v35, 0.0  ;;  %v5007_v35 = vld [vmem:[#allocation4 + $0x64] ss:$8 sps:$4 sm:$0xff]   ;;  %v5005_v48 = vld [vmem:[#allocation4 + $0x60] ss:$8 sps:$4 sm:$0xff]  }
 0x2e7   : > { %v2579_v52 = vmax.f32 %v2555_v60, 0.0  ;;  %v4458_v46 = vpop.f32.mrb[52].mxu1  ;;  %v5008_v60 = vld [vmem:[#allocation4 + $0x70] ss:$8 sps:$4 sm:$0xff]  }
 0x2e8   : > { %v4459_v49 = vpop.f32.mrb[53].mxu1 }
 0x2e9   : > { %v2594_v16 = vpack.c.bf16 %v2579_v52, %v2576_v36  ;;  %v4460_v3 = vadd.f32 %v4459_v49, %v4458_v46  ;;  %v4461_v4 = vpop.f32.mrb[54].mxu1  ;;  %v5011_v36 = vld [vmem:[#allocation4 + $0x80] ss:$8 sps:$4 sm:$0xff]   ;;  %v5016_v52 = vld [vmem:[#allocation4 + $0x94] ss:$8 sps:$4 sm:$0xff]  }
 0x2ea   : > { %v4462_v6 = vpop.f32.mrb[55].mxu1  ;;  %v5019_v46 = vld [vmem:[#allocation4 + $0xa4] ss:$8 sps:$4 sm:$0xff]   ;;  %v5022_v49 = vld [vmem:[#allocation4 + $0xb4] ss:$8 sps:$4 sm:$0xff]  }
 0x2eb   : > { %v2560_v53 = vadd.f32 %v4460_v3, %v2164_v1  ;;  %v4463_v8 = vadd.f32 %v4462_v6, %v4461_v4  ;;  %4270 = vmatmul.mubr.msk.bf16.vlgmr.msra.gmra.mrb[60].mxu1 %vm1014_vm0, %v2594_v16  ;;  %v5025_v16 = vld [vmem:[#allocation4 + $0xc4] ss:$8 sps:$4 sm:$0xff]   ;;  %v5028_v3 = vld [vmem:[#allocation4 + $0xd4] ss:$8 sps:$4 sm:$0xff]   ;;  %v5026_v4 = vld [vmem:[#allocation4 + $0xd0] ss:$8 sps:$4 sm:$0xff]  }
 0x2ec   : > { %4471 = vmatpush3.bf16.msra.mxu1 %v4963_v25  ;;  %2943 = vmatprep.mubr.bf16.mxu1 %v6429_v55  ;;  %v5020_v25 = vld [vmem:[#allocation4 + $0xb0] ss:$8 sps:$4 sm:$0xff]   ;;  %v5029_v6 = vld [vmem:[#allocation4 + $0xe0] ss:$8 sps:$4 sm:$0xff]  }
 0x2ed   : > { %v2582_v11 = vmax.f32 %v2560_v53, 0.0  ;;  %v2563_v12 = vadd.f32 %v4463_v8, %v2164_v1  ;;  %4472 = vmatprep.subr.bf16.mxu1 %v4967_v2  ;;  %v5031_v2 = vld [vmem:[#allocation4 + $0xe4] ss:$8 sps:$4 sm:$0xff]   ;;  %v5034_v53 = vld [vmem:[#allocation4 + $0xf4] ss:$8 sps:$4 sm:$0xff]  }
 0x2ee   : > { %v5032_v8 = vld [vmem:[#allocation4 + $0xf0] ss:$8 sps:$4 sm:$0xff]  }
 0x2ef   : > { %v2585_v20 = vmax.f32 %v2563_v12, 0.0  ;;  %v4464_v32 = vpop.f32.mrb[56].mxu1 }
 0x2f0   : > { %4473 = vmatpush3.bf16.msra.mxu1 %v4968_v9  ;;  %v4465_v33 = vpop.f32.mrb[57].mxu1  ;;  %v1730_v9 = vld [vmem:[#allocation6] sm:$0x3] }
 0x2f1   : > { %v2597_v29 = vpack.c.bf16 %v2585_v20, %v2582_v11  ;;  %v4466_v39 = vadd.f32 %v4465_v33, %v4464_v32  ;;  %v4467_v40 = vpop.f32.mrb[58].mxu1  ;;  %4474 = vmatprep.subr.bf16.mxu1 %v4969_v18  ;;  %v1735_v11 = vrot.slane %v1730_v9, %v5703_v41  ;;  %v1739_v12 = vrot.slane %v1730_v9, %v5705_v44  ;;  %v5037_v20 = vld [vmem:[#allocation4 + $0x104] ss:$8 sps:$4 sm:$0xff]  }
 0x2f2   : > { %v4468_v26 = vpop.f32.mrb[59].mxu1 }
 0x2f3   : > { %v2568_v43 = vadd.f32 %v4466_v39, %v2164_v1  ;;  %v4469_v47 = vadd.f32 %v4468_v26, %v4467_v40  ;;  %4271 = vmatmul.mubr.msk.bf16.gmra.mrb[64].mxu1 %vm1014_vm0, %v2597_v29 }
 0x2f4   : > { %4475 = vmatpush3.bf16.msra.mxu1 %v4970_v37  ;;  %2953 = vmatprep.mubr.bf16.mxu1 %v6429_v55 }
 0x2f5   : > { %v2588_v54 = vmax.f32 %v2568_v43, 0.0  ;;  %v2571_v28 = vadd.f32 %v4469_v47, %v2164_v1  ;;  %4476 = vmatprep.subr.bf16.mxu1 %v4973_v30  ;;  %v4996_v1 = vld [vmem:[#allocation4 + $0x30] ss:$8 sps:$4 sm:$0xff]  }
 0x2f7   : > { %v2591_v61 = vmax.f32 %v2571_v28, 0.0 }
 0x2f8   : > { %4477 = vmatpush3.bf16.msra.mxu1 %v4975_v50 }
 0x2f9   : > { %v2600_v24 = vpack.c.bf16 %v2591_v61, %v2588_v54  ;;  %4478 = vmatprep.subr.bf16.mxu1 %v4976_v58 }
 0x2fb   : > { %4272 = vmatmul.mubr.msk.bf16.gmra.mrb[68].mxu1 %vm1014_vm0, %v2600_v24 }
 0x2fc   : > { %4479 = vmatpush3.bf16.msra.mxu1 %v4977_v13  ;;  %3456 = vmatprep.mubr.bf16.mxu1 %v6184_v57  ;;  %v4990_v57 = vld [vmem:[#allocation4 + $0x10] ss:$8 sps:$4 sm:$0xff]  }
 0x2fd   : > { %4480 = vmatprep.subr.bf16.mxu1 %v4980_v19  ;;  %3748 = vmatpush1.bf16.msra.mxu0 %v4990_v57 }
 0x2fe   : > { %3749 = vmatprep.subr.bf16.mxu0 %v4995_v7 }
 0x300   : > { %4481 = vmatpush3.bf16.msra.mxu1 %v4982_v34 }
 0x301   : > { %4482 = vmatprep.subr.bf16.mxu1 %v4983_v42  ;;  %3750 = vmatpush1.bf16.msra.mxu0 %v4993_v62 }
 0x302   : > { %3751 = vmatprep.subr.bf16.mxu0 %v4998_v21 }
 0x304   : > { %4483 = vmatpush3.bf16.msra.mxu1 %v4984_v63 }
 0x305   : > { %4484 = vmatprep.subr.bf16.mxu1 %v4985_v17  ;;  %3752 = vmatpush1.bf16.msra.mxu0 %v4996_v1 }
 0x306   : > { %3753 = vmatprep.subr.bf16.mxu0 %v5001_v10 }
 0x308   : > { %4485 = vmatpush3.bf16.msra.mxu1 %v4986_v45 }
 0x309   : > { %3754 = vmatpush1.bf16.msra.mxu0 %v4999_v38 }
 0x30a   : > { %3755 = vmatprep.subr.bf16.mxu0 %v5004_v14 }
 0x30b   : > { %3457 = vmatmul.mubr.bf16.vlgmr.msra.gmra.mrb[72].mxu1 %v6265_v22  ;;  %v5010_v22 = vld [vmem:[#allocation4 + $0x74] ss:$8 sps:$4 sm:$0xff]  }
 0x30c   : > { %3464 = vmatprep.mubr.bf16.mxu1 %v6268_v23  ;;  %v5013_v23 = vld [vmem:[#allocation4 + $0x84] ss:$8 sps:$4 sm:$0xff]  }
 0x30d   : > { %3756 = vmatpush1.bf16.msra.mxu0 %v5002_v51 }
 0x30e   : > { %3757 = vmatprep.subr.bf16.mxu0 %v5007_v35  ;;  %v6367_v35 = vld [vmem:[#allocation2] sm:$0x7] }
 0x311   : > { %3758 = vmatpush1.bf16.msra.mxu0 %v5005_v48  ;;  %v3063_v48 = vrot.slane %v6367_v35, %v5703_v41 }
 0x312   : > { %3759 = vmatprep.subr.bf16.mxu0 %v5010_v22  ;;  %v3067_v22 = vrot.slane %v6367_v35, %v5705_v44 }
 0x313   : > { %3465 = vmatmul.mubr.bf16.gmra.mrb[76].mxu1 %v6281_v5  ;;  %v5014_v5 = vld [vmem:[#allocation4 + $0x90] ss:$8 sps:$4 sm:$0xff]  }
 0x314   : > { %3472 = vmatprep.mubr.bf16.mxu1 %v6284_v15  ;;  %v5017_v15 = vld [vmem:[#allocation4 + $0xa0] ss:$8 sps:$4 sm:$0xff]  }
 0x315   : > { %3760 = vmatpush1.bf16.msra.mxu0 %v5008_v60 }
 0x316   : > { %3761 = vmatprep.subr.bf16.mxu0 %v5013_v23 }
 0x319   : > { %3762 = vmatpush1.bf16.msra.mxu0 %v5011_v36 }
 0x31a   : > { %3763 = vmatprep.subr.bf16.mxu0 %v5016_v52 }
 0x31b   : > { %3473 = vmatmul.mubr.bf16.gmra.mrb[80].mxu1 %v6291_v59  ;;  %v5023_v59 = vld [vmem:[#allocation4 + $0xc0] ss:$8 sps:$4 sm:$0xff]  }
 0x31d   : > { %3764 = vmatpush1.bf16.msra.mxu0 %v5014_v5 }
 0x31e   : > { %3765 = vmatprep.subr.bf16.mxu0 %v5019_v46 }
 0x321   : > { %3766 = vmatpush1.bf16.msra.mxu0 %v5017_v15 }
 0x322   : > { %3767 = vmatprep.subr.bf16.mxu0 %v5022_v49 }
 0x325   : > { %3768 = vmatpush1.bf16.msra.mxu0 %v5020_v25 }
 0x326   : > { %3769 = vmatprep.subr.bf16.mxu0 %v5025_v16 }
 0x329   : > { %3770 = vmatpush1.bf16.msra.mxu0 %v5023_v59 }
 0x32a   : > { %3771 = vmatprep.subr.bf16.mxu0 %v5028_v3 }
 0x32d   : > { %3772 = vmatpush1.bf16.msra.mxu0 %v5026_v4 }
 0x32e   : > { %3773 = vmatprep.subr.bf16.mxu0 %v5031_v2 }
 0x331   : > { %3774 = vmatpush1.bf16.msra.mxu0 %v5029_v6 }
 0x332   : > { %3775 = vmatprep.subr.bf16.mxu0 %v5034_v53  ;;  %v5035_v53 = vld [vmem:[#allocation4 + $0x100] ss:$8 sps:$4 sm:$0xff]  }
 0x335   : > { %3776 = vmatpush1.bf16.msra.mxu0 %v5032_v8 }
 0x336   : > { %3808 = vmatprep.subr.bf16.mxu0 %v5037_v20 }
 0x35e   : > { %v2028_v18 = vpop.f32.mrb[24].mxu0 }
 0x35f   : > { %v4516_v32 = vadd.f32 %v2028_v18, %v1735_v11  ;;  %v2030_v33 = vpop.f32.mrb[25].mxu0 }
 0x360   : > { %v4517_v37 = vadd.f32 %v2030_v33, %v1739_v12  ;;  %v2032_v29 = vpop.f32.mrb[26].mxu0 }
 0x361   : > { %5065 = vtanh.f32 %v4516_v32  ;;  %v4518_v39 = vadd.f32 %v2032_v29, %v1735_v11  ;;  %v2034_v40 = vpop.f32.mrb[27].mxu0 }
 0x362   : > { %5067 = vtanh.f32 %v4517_v37  ;;  %v4519_v30 = vadd.f32 %v2034_v40, %v1739_v12 }
 0x363   : > { %5069 = vtanh.f32 %v4518_v39  ;;  %v5038_v39 = vld [vmem:[#allocation4 + $0x110] ss:$8 sps:$4 sm:$0xff]  }
 0x364   : > { %5071 = vtanh.f32 %v4519_v30 }
 0x366   : > { %v2038_v26 = vpop.f32.mrb[28].mxu0 }
 0x367   : > { %v4520_v43 = vadd.f32 %v2038_v26, %v1735_v11  ;;  %v2040_v47 = vpop.f32.mrb[29].mxu0 }
 0x368   : > { %v4521_v50 = vadd.f32 %v2040_v47, %v1739_v12  ;;  %v2042_v54 = vpop.f32.mrb[30].mxu0 }
 0x369   : > { %5073 = vtanh.f32 %v4520_v43  ;;  %v4522_v28 = vadd.f32 %v2042_v54, %v1735_v11  ;;  %v2044_v58 = vpop.f32.mrb[31].mxu0 }
 0x36a   : > { %5075 = vtanh.f32 %v4521_v50  ;;  %v4523_v61 = vadd.f32 %v2044_v58, %v1739_v12 }
 0x36b   : > { %v5066_v13 = vpop.eup %5065  ;;  %5077 = vtanh.f32 %v4522_v28 }
 0x36c   : > { %v5068_v24 = vpop.eup %5067  ;;  %2069 = vst [vmem:[%s6146_s20 + $0x60] sm:$0xff] %v5066_v13  ;;  %5079 = vtanh.f32 %v4523_v61 }
 0x36d   : > { %v5070_v19 = vpop.eup %5069  ;;  %2070 = vst [vmem:[%s6146_s20 + $0x68] sm:$0xff] %v5068_v24 }
 0x36e   : > { %v5072_v34 = vpop.eup %5071  ;;  %2071 = vst [vmem:[%s6146_s20 + $0x70] sm:$0xff] %v5070_v19  ;;  %v2048_v42 = vpop.f32.mrb[32].mxu0 }
 0x36f   : > { %2072 = vst [vmem:[%s6146_s20 + $0x78] sm:$0xff] %v5072_v34  ;;  %v4524_v27 = vadd.f32 %v2048_v42, %v1735_v11  ;;  %v2050_v56 = vpop.f32.mrb[33].mxu0 }
 0x370   : > { %v4525_v63 = vadd.f32 %v2050_v56, %v1739_v12  ;;  %v2052_v0 = vpop.f32.mrb[34].mxu0 }
 0x371   : > { %5081 = vtanh.f32 %v4524_v27  ;;  %v4526_v17 = vadd.f32 %v2052_v0, %v1735_v11  ;;  %v2054_v57 = vpop.f32.mrb[35].mxu0  ;;  %v5040_v11 = vld [vmem:[#allocation4 + $0x114] ss:$8 sps:$4 sm:$0xff]   ;;  %v2637_v0 = vld [vmem:[#allocation6] sm:$0x3] }
 0x372   : > { %5083 = vtanh.f32 %v4525_v63  ;;  %v4527_v7 = vadd.f32 %v2054_v57, %v1739_v12  ;;  %v2646_v57 = vrot.slane %v2637_v0, %v5705_v44 }
 0x373   : > { %v5074_v45 = vpop.eup %5073  ;;  %5085 = vtanh.f32 %v4526_v17  ;;  %v2642_v17 = vrot.slane %v2637_v0, %v5703_v41 }
 0x374   : > { %v5076_v62 = vpop.eup %5075  ;;  %2073 = vst [vmem:[%s6146_s20 + $0x80] sm:$0xff] %v5074_v45  ;;  %5087 = vtanh.f32 %v4527_v7 }
 0x375   : > { %v5078_v21 = vpop.eup %5077  ;;  %2074 = vst [vmem:[%s6146_s20 + $0x88] sm:$0xff] %v5076_v62 }
 0x376   : > { %v5080_v1 = vpop.eup %5079  ;;  %2075 = vst [vmem:[%s6146_s20 + $0x90] sm:$0xff] %v5078_v21 }
 0x377   : > { %2076 = vst [vmem:[%s6146_s20 + $0x98] sm:$0xff] %v5080_v1 }
 0x37b   : > { %v5082_v10 = vpop.eup %5081 }
 0x37c   : > { %v5084_v38 = vpop.eup %5083  ;;  %2077 = vst [vmem:[%s6146_s20 + $0xa0] sm:$0xff] %v5082_v10 }
 0x37d   : > { %v5086_v14 = vpop.eup %5085  ;;  %2078 = vst [vmem:[%s6146_s20 + $0xa8] sm:$0xff] %v5084_v38 }
 0x37e   : > { %v5088_v51 = vpop.eup %5087  ;;  %2079 = vst [vmem:[%s6146_s20 + $0xb0] sm:$0xff] %v5086_v14 }
 0x37f   : > { %2080 = vst [vmem:[%s6146_s20 + $0xb8] sm:$0xff] %v5088_v51 }
 0x39e   : > { %v3395_v60 = vpop.f32.mrb[36].mxu0 }
 0x39f   : > { %v3396_v23 = vadd.f32 %v3395_v60, %v3063_v48  ;;  %v3397_v36 = vpop.f32.mrb[37].mxu0 }
 0x3a0   : > { %v3398_v52 = vadd.f32 %v3397_v36, %v3067_v22  ;;  %v3399_v5 = vpop.f32.mrb[38].mxu0 }
 0x3a1   : > { %v3481_v46 = vmax.f32 %v3396_v23, 0.0  ;;  %v3400_v15 = vadd.f32 %v3399_v5, %v3063_v48  ;;  %v3401_v49 = vpop.f32.mrb[39].mxu0 }
 0x3a2   : > { %v3482_v25 = vmax.f32 %v3398_v52, 0.0  ;;  %v3402_v16 = vadd.f32 %v3401_v49, %v3067_v22 }
 0x3a3   : > { %v3484_v59 = vmax.f32 %v3400_v15, 0.0 }
 0x3a4   : > { %v3485_v3 = vmax.f32 %v3402_v16, 0.0 }
 0x3a5   : > { %v3499_v4 = vpack.c.bf16 %v3484_v59, %v3481_v46 }
 0x3a6   : > { %v3500_v2 = vpack.c.bf16 %v3485_v3, %v3482_v25  ;;  %v3405_v6 = vpop.f32.mrb[40].mxu0 }
 0x3a7   : > { %v3406_v8 = vadd.f32 %v3405_v6, %v3063_v48  ;;  %v3407_v9 = vpop.f32.mrb[41].mxu0 }
 0x3a8   : > { %v3408_v12 = vadd.f32 %v3407_v9, %v3067_v22  ;;  %v3409_v18 = vpop.f32.mrb[42].mxu0  ;;  %3777 = vmatprep.mubr.bf16.mxu0 %v3500_v2 }
 0x3a9   : > { %v3487_v20 = vmax.f32 %v3406_v8, 0.0  ;;  %v3410_v32 = vadd.f32 %v3409_v18, %v3063_v48  ;;  %v3411_v33 = vpop.f32.mrb[43].mxu0  ;;  %3778 = vmatmul.mubr.bf16.vlgmr.msra.gmra.mrb[48].mxu0 %v3499_v4 }
 0x3aa   : > { %v3488_v37 = vmax.f32 %v3408_v12, 0.0  ;;  %v3412_v29 = vadd.f32 %v3411_v33, %v3067_v22  ;;  %3809 = vmatpush1.bf16.msra.mxu0 %v5035_v53 }
 0x3ab   : > { %v3490_v40 = vmax.f32 %v3410_v32, 0.0  ;;  %3810 = vmatprep.subr.bf16.mxu0 %v5040_v11 }
 0x3ac   : > { %v3491_v30 = vmax.f32 %v3412_v29, 0.0 }
 0x3ad   : > { %v3502_v26 = vpack.c.bf16 %v3490_v40, %v3487_v20 }
 0x3ae   : > { %v3503_v43 = vpack.c.bf16 %v3491_v30, %v3488_v37  ;;  %v3415_v47 = vpop.f32.mrb[44].mxu0  ;;  %3811 = vmatpush1.bf16.msra.mxu0 %v5038_v39  ;;  %v3071_v39 = vrot.slane %v6367_v35, %v5700_v31 }
 0x3af   : > { %v3416_v50 = vadd.f32 %v3415_v47, %v3063_v48  ;;  %v3417_v54 = vpop.f32.mrb[45].mxu0 }
 0x3b0   : > { %v3418_v28 = vadd.f32 %v3417_v54, %v3067_v22  ;;  %v3419_v58 = vpop.f32.mrb[46].mxu0  ;;  %3787 = vmatprep.mubr.bf16.mxu0 %v3503_v43 }
 0x3b1   : > { %v3493_v61 = vmax.f32 %v3416_v50, 0.0  ;;  %v3420_v13 = vadd.f32 %v3419_v58, %v3063_v48  ;;  %v3421_v24 = vpop.f32.mrb[47].mxu0  ;;  %3788 = vmatmul.mubr.bf16.gmra.mrb[52].mxu0 %v3502_v26 }
 0x3b2   : > { %v3494_v19 = vmax.f32 %v3418_v28, 0.0  ;;  %v3422_v34 = vadd.f32 %v3421_v24, %v3067_v22 }
 0x3b3   : > { %v3496_v42 = vmax.f32 %v3420_v13, 0.0 }
 0x3b4   : > { %v3497_v27 = vmax.f32 %v3422_v34, 0.0 }
 0x3b5   : > { %v3505_v56 = vpack.c.bf16 %v3496_v42, %v3493_v61 }
 0x3b6   : > { %v3506_v63 = vpack.c.bf16 %v3497_v27, %v3494_v19 }
 0x3b8   : > { %3797 = vmatprep.mubr.bf16.mxu0 %v3506_v63 }
 0x3b9   : > { %3798 = vmatmul.mubr.bf16.gmra.mrb[56].mxu0 %v3505_v56 }
 0x3ba   : > { %3840 = vmatprep.mubr.bf16.mxu0 %v6429_v55 }
 0x3be   : > { %v2935_v7 = vpop.f32.mrb[60].mxu1 }
 0x3bf   : > { %v4528_v45 = vadd.f32 %v2935_v7, %v2642_v17  ;;  %v2937_v62 = vpop.f32.mrb[61].mxu1 }
 0x3c0   : > { %v4529_v21 = vadd.f32 %v2937_v62, %v2646_v57  ;;  %v2939_v1 = vpop.f32.mrb[62].mxu1 }
 0x3c1   : > { %5089 = vtanh.f32 %v4528_v45  ;;  %v4530_v10 = vadd.f32 %v2939_v1, %v2642_v17  ;;  %v2941_v38 = vpop.f32.mrb[63].mxu1 }
 0x3c2   : > { %5091 = vtanh.f32 %v4529_v21  ;;  %v4531_v14 = vadd.f32 %v2941_v38, %v2646_v57 }
 0x3c3   : > { %5093 = vtanh.f32 %v4530_v10 }
 0x3c4   : > { %5095 = vtanh.f32 %v4531_v14 }
 0x3c6   : > { %v2945_v51 = vpop.f32.mrb[64].mxu1 }
 0x3c7   : > { %v4532_v48 = vadd.f32 %v2945_v51, %v2642_v17  ;;  %v2947_v22 = vpop.f32.mrb[65].mxu1 }
 0x3c8   : > { %v4533_v60 = vadd.f32 %v2947_v22, %v2646_v57  ;;  %v2949_v23 = vpop.f32.mrb[66].mxu1 }
 0x3c9   : > { %5097 = vtanh.f32 %v4532_v48  ;;  %v4534_v36 = vadd.f32 %v2949_v23, %v2642_v17  ;;  %v2951_v52 = vpop.f32.mrb[67].mxu1  ;;  %v3544_v48 = vld [vmem:[#allocation6] sm:$0x3] }
 0x3ca   : > { %5099 = vtanh.f32 %v4533_v60  ;;  %v4535_v5 = vadd.f32 %v2951_v52, %v2646_v57  ;;  %v3549_v22 = vrot.slane %v3544_v48, %v5703_v41  ;;  %v3553_v60 = vrot.slane %v3544_v48, %v5705_v44 }
 0x3cb   : > { %v5090_v46 = vpop.eup %5089  ;;  %5101 = vtanh.f32 %v4534_v36 }
 0x3cc   : > { %v5092_v15 = vpop.eup %5091  ;;  %2976 = vst [vmem:[%s6146_s20 + $0xc0] sm:$0xff] %v5090_v46  ;;  %5103 = vtanh.f32 %v4535_v5 }
 0x3cd   : > { %v5094_v49 = vpop.eup %5093  ;;  %2977 = vst [vmem:[%s6146_s20 + $0xc8] sm:$0xff] %v5092_v15 }
 0x3ce   : > { %v5096_v25 = vpop.eup %5095  ;;  %2978 = vst [vmem:[%s6146_s20 + $0xd0] sm:$0xff] %v5094_v49  ;;  %v2955_v16 = vpop.f32.mrb[68].mxu1 }
 0x3cf   : > { %2979 = vst [vmem:[%s6146_s20 + $0xd8] sm:$0xff] %v5096_v25  ;;  %v4536_v59 = vadd.f32 %v2955_v16, %v2642_v17  ;;  %v2957_v3 = vpop.f32.mrb[69].mxu1 }
 0x3d0   : > { %v4537_v4 = vadd.f32 %v2957_v3, %v2646_v57  ;;  %v2959_v2 = vpop.f32.mrb[70].mxu1 }
 0x3d1   : > { %5105 = vtanh.f32 %v4536_v59  ;;  %v4538_v6 = vadd.f32 %v2959_v2, %v2642_v17  ;;  %v2961_v53 = vpop.f32.mrb[71].mxu1 }
 0x3d2   : > { %5107 = vtanh.f32 %v4537_v4  ;;  %v4539_v8 = vadd.f32 %v2961_v53, %v2646_v57 }
 0x3d3   : > { %v5098_v9 = vpop.eup %5097  ;;  %5109 = vtanh.f32 %v4538_v6 }
 0x3d4   : > { %v5100_v11 = vpop.eup %5099  ;;  %2980 = vst [vmem:[%s6146_s20 + $0xe0] sm:$0xff] %v5098_v9  ;;  %5111 = vtanh.f32 %v4539_v8 }
 0x3d5   : > { %v5102_v12 = vpop.eup %5101  ;;  %2981 = vst [vmem:[%s6146_s20 + $0xe8] sm:$0xff] %v5100_v11 }
 0x3d6   : > { %v5104_v18 = vpop.eup %5103  ;;  %2982 = vst [vmem:[%s6146_s20 + $0xf0] sm:$0xff] %v5102_v12 }
 0x3d7   : > { %2983 = vst [vmem:[%s6146_s20 + $0xf8] sm:$0xff] %v5104_v18 }
 0x3db   : > { %v5106_v20 = vpop.eup %5105 }
 0x3dc   : > { %v5108_v32 = vpop.eup %5107  ;;  %2984 = vst [vmem:[%s6146_s20 + $0x100] sm:$0xff] %v5106_v20 }
 0x3dd   : > { %v5110_v33 = vpop.eup %5109  ;;  %2985 = vst [vmem:[%s6146_s20 + $0x108] sm:$0xff] %v5108_v32 }
 0x3de   : > { %v5112_v37 = vpop.eup %5111  ;;  %2986 = vst [vmem:[%s6146_s20 + $0x110] sm:$0xff] %v5110_v33  ;;  %v4486_v29 = vpop.f32.mrb[72].mxu1 }
 0x3df   : > { %2987 = vst [vmem:[%s6146_s20 + $0x118] sm:$0xff] %v5112_v37  ;;  %v4487_v40 = vpop.f32.mrb[73].mxu1 }
 0x3e0   : > { %v4488_v30 = vadd.f32 %v4487_v40, %v4486_v29  ;;  %v4489_v26 = vpop.f32.mrb[74].mxu1 }
 0x3e1   : > { %v4490_v43 = vpop.f32.mrb[75].mxu1 }
 0x3e2   : > { %v3459_v47 = vadd.f32 %v4488_v30, %v3071_v39  ;;  %v4491_v50 = vadd.f32 %v4490_v43, %v4489_v26 }
 0x3e4   : > { %v3462_v54 = vadd.f32 %v4491_v50, %v3071_v39  ;;  %v3483_v28 = vmax.f32 %v3459_v47, 0.0 }
 0x3e6   : > { %v3486_v58 = vmax.f32 %v3462_v54, 0.0  ;;  %v4492_v61 = vpop.f32.mrb[76].mxu1 }
 0x3e7   : > { %v4493_v13 = vpop.f32.mrb[77].mxu1 }
 0x3e8   : > { %v3501_v24 = vpack.c.bf16 %v3486_v58, %v3483_v28  ;;  %v4494_v19 = vadd.f32 %v4493_v13, %v4492_v61  ;;  %v4495_v34 = vpop.f32.mrb[78].mxu1 }
 0x3e9   : > { %v4496_v42 = vpop.f32.mrb[79].mxu1 }
 0x3ea   : > { %v3467_v27 = vadd.f32 %v4494_v19, %v3071_v39  ;;  %v4497_v56 = vadd.f32 %v4496_v42, %v4495_v34  ;;  %4363 = vmatmul.mubr.msk.bf16.vlgmr.msra.gmra.mrb[48].mxu0 %vm1014_vm0, %v3501_v24 }
 0x3eb   : > { %3850 = vmatprep.mubr.bf16.mxu0 %v6429_v55 }
 0x3ec   : > { %v3470_v31 = vadd.f32 %v4497_v56, %v3071_v39  ;;  %v3489_v35 = vmax.f32 %v3467_v27, 0.0 }
 0x3ee   : > { %v3492_v63 = vmax.f32 %v3470_v31, 0.0  ;;  %v4498_v0 = vpop.f32.mrb[80].mxu1 }
 0x3ef   : > { %v4499_v17 = vpop.f32.mrb[81].mxu1 }
 0x3f0   : > { %v3504_v57 = vpack.c.bf16 %v3492_v63, %v3489_v35  ;;  %v4500_v7 = vadd.f32 %v4499_v17, %v4498_v0  ;;  %v4501_v45 = vpop.f32.mrb[82].mxu1 }
 0x3f1   : > { %v4502_v62 = vpop.f32.mrb[83].mxu1 }
 0x3f2   : > { %v3475_v21 = vadd.f32 %v4500_v7, %v3071_v39  ;;  %v4503_v1 = vadd.f32 %v4502_v62, %v4501_v45  ;;  %4364 = vmatmul.mubr.msk.bf16.gmra.mrb[52].mxu0 %vm1014_vm0, %v3504_v57 }
 0x3f3   : > { %3860 = vmatprep.mubr.bf16.mxu0 %v6429_v55 }
 0x3f4   : > { %v3478_v10 = vadd.f32 %v4503_v1, %v3071_v39  ;;  %v3495_v38 = vmax.f32 %v3475_v21, 0.0 }
 0x3f6   : > { %v3498_v14 = vmax.f32 %v3478_v10, 0.0 }
 0x3f8   : > { %v3507_v51 = vpack.c.bf16 %v3498_v14, %v3495_v38 }
 0x3fa   : > { %4365 = vmatmul.mubr.msk.bf16.gmra.mrb[56].mxu0 %vm1014_vm0, %v3507_v51 }
 0x4bd   : > { %v3842_v23 = vpop.f32.mrb[48].mxu0 }
 0x4be   : > { %v4540_v36 = vadd.f32 %v3842_v23, %v3549_v22  ;;  %v3844_v52 = vpop.f32.mrb[49].mxu0 }
 0x4bf   : > { %v4541_v5 = vadd.f32 %v3844_v52, %v3553_v60  ;;  %v3846_v46 = vpop.f32.mrb[50].mxu0 }
 0x4c0   : > { %5113 = vtanh.f32 %v4540_v36  ;;  %v4542_v15 = vadd.f32 %v3846_v46, %v3549_v22  ;;  %v3848_v49 = vpop.f32.mrb[51].mxu0 }
 0x4c1   : > { %5115 = vtanh.f32 %v4541_v5  ;;  %v4543_v55 = vadd.f32 %v3848_v49, %v3553_v60 }
 0x4c2   : > { %5117 = vtanh.f32 %v4542_v15 }
 0x4c3   : > { %5119 = vtanh.f32 %v4543_v55 }
 0x4c5   : > { %v3852_v25 = vpop.f32.mrb[52].mxu0 }
 0x4c6   : > { %v4544_v16 = vadd.f32 %v3852_v25, %v3549_v22  ;;  %v3854_v59 = vpop.f32.mrb[53].mxu0 }
 0x4c7   : > { %v4545_v41 = vadd.f32 %v3854_v59, %v3553_v60  ;;  %v3856_v44 = vpop.f32.mrb[54].mxu0 }
 0x4c8   : > { %5121 = vtanh.f32 %v4544_v16  ;;  %v4546_v3 = vadd.f32 %v3856_v44, %v3549_v22  ;;  %v3858_v4 = vpop.f32.mrb[55].mxu0 }
 0x4c9   : > { %5123 = vtanh.f32 %v4545_v41  ;;  %v4547_v2 = vadd.f32 %v3858_v4, %v3553_v60 }
 0x4ca   : > { %v5114_v6 = vpop.eup %5113  ;;  %5125 = vtanh.f32 %v4546_v3 }
 0x4cb   : > { %v5116_v53 = vpop.eup %5115  ;;  %3883 = vst [vmem:[%s6146_s20 + $0x120] sm:$0xff] %v5114_v6  ;;  %5127 = vtanh.f32 %v4547_v2 }
 0x4cc   : > { %v5118_v8 = vpop.eup %5117  ;;  %3884 = vst [vmem:[%s6146_s20 + $0x128] sm:$0xff] %v5116_v53 }
 0x4cd   : > { %v5120_v9 = vpop.eup %5119  ;;  %3885 = vst [vmem:[%s6146_s20 + $0x130] sm:$0xff] %v5118_v8  ;;  %v3862_v11 = vpop.f32.mrb[56].mxu0 }
 0x4ce   : > { %3886 = vst [vmem:[%s6146_s20 + $0x138] sm:$0xff] %v5120_v9  ;;  %v4548_v12 = vadd.f32 %v3862_v11, %v3549_v22  ;;  %v3864_v18 = vpop.f32.mrb[57].mxu0 }
 0x4cf   : > { %v4549_v20 = vadd.f32 %v3864_v18, %v3553_v60  ;;  %v3866_v32 = vpop.f32.mrb[58].mxu0 }
 0x4d0   : > { %5129 = vtanh.f32 %v4548_v12  ;;  %v4550_v33 = vadd.f32 %v3866_v32, %v3549_v22  ;;  %v3868_v37 = vpop.f32.mrb[59].mxu0 }
 0x4d1   : > { %5131 = vtanh.f32 %v4549_v20  ;;  %v4551_v29 = vadd.f32 %v3868_v37, %v3553_v60 }
 0x4d2   : > { %v5122_v39 = vpop.eup %5121  ;;  %5133 = vtanh.f32 %v4550_v33 }
 0x4d3   : > { %v5124_v40 = vpop.eup %5123  ;;  %3887 = vst [vmem:[%s6146_s20 + $0x140] sm:$0xff] %v5122_v39  ;;  %5135 = vtanh.f32 %v4551_v29 }
 0x4d4   : > { %v5126_v30 = vpop.eup %5125  ;;  %3888 = vst [vmem:[%s6146_s20 + $0x148] sm:$0xff] %v5124_v40 }
 0x4d5   : > { %v5128_v26 = vpop.eup %5127  ;;  %3889 = vst [vmem:[%s6146_s20 + $0x150] sm:$0xff] %v5126_v30 }
 0x4d6   : > { %3890 = vst [vmem:[%s6146_s20 + $0x158] sm:$0xff] %v5128_v26 }
 0x4da   : > { %v5130_v43 = vpop.eup %5129 }
 0x4db   : > { %v5132_v47 = vpop.eup %5131  ;;  %3891 = vst [vmem:[%s6146_s20 + $0x160] sm:$0xff] %v5130_v43 }
 0x4dc   : > { %v5134_v50 = vpop.eup %5133  ;;  %3892 = vst [vmem:[%s6146_s20 + $0x168] sm:$0xff] %v5132_v47 }
 0x4dd   : > { %v5136_v54 = vpop.eup %5135  ;;  %3893 = vst [vmem:[%s6146_s20 + $0x170] sm:$0xff] %v5134_v50 }
 0x4de   : > { %3894 = vst [vmem:[%s6146_s20 + $0x178] sm:$0xff] %v5136_v54 }
 0x4df PF: > { %s17_s18 = sadd.s32 1, %s5235_s18  }
 0x4e0   : > { %p14_p3 = scmp.ge.s32.totalorder %s17_s18, 4  }
 0x4e2   :  { %16 = sbr.rel (!%p14_p3) target bundleno = 2 (0x2), region = 83 }
 0x4e9   :  { %3916 = vsyncpa [#allocation3], 1 }
 0x4ea   :  { %3918 = vsyncpa [#allocation3 + $0x1], 1 }
 0x4eb   :  { %3919 = vsyncpa [#allocation5], 1 }

</bundles_post_ra>
